<compile_context>
chip_gen: v5e
topology: v5e:2x2
jax: 0.10.0
libtpu: 0.0.40
codegen_flags: <defaults>
</compile_context>

<pallas_src>
import jax
import jax.numpy as jnp
from jax.experimental import pallas as pl
from jax.experimental.pallas import tpu as pltpu

NUM_FEA = 128
IN_CH = NUM_FEA * 2 * 2 * 2 * 2   # num_fea_4 * 2 = 2048
HID1 = 512
HID2 = 128
OUT = 1
BN_EPS = 1e-5

MAX_TILE_B = 512        # 4 MiB f32 x-tile; ~15 MiB total double-buffered VMEM
MIN_TILE_B = 128        # keep full MXU M occupancy once the batch is large
TARGET_GRID_STEPS = 4   # >=4 grid steps when possible (v7x dual-TC + pipeline depth)


def _round_up(n, m):
    return ((n + m - 1) // m) * m


def _choose_tile_b(batch):
    """Batch tile: big enough to amortize the ~0.35us per-step overhead, small
    enough to (a) not pad tiny batches and (b) keep several grid steps."""
    if batch <= MIN_TILE_B:
        # Latency path: one (near-)exact tile. x is f32 in HBM -> sublane quantum 8.
        return _round_up(batch, 8)
    tile = _round_up(pl.cdiv(batch, TARGET_GRID_STEPS), 16)
    return max(MIN_TILE_B, min(MAX_TILE_B, tile))


def _relation_kernel(x_ref, w1_ref, shift_ref, w2_ref, b2_ref, w3_ref, b3_ref, o_ref):
    # layer1: 1x1 conv over H=W=1 == matmul. BN scale pre-folded into w1;
    # conv bias + BN shift folded into `shift`. x arrives f32 and is cast to
    # bf16 here (saves the wrapper-side cast+pad HBM round-trip); f32 MXU acc.
    x = x_ref[...].astype(jnp.bfloat16)
    h = jnp.dot(x, w1_ref[...], preferred_element_type=jnp.float32)
    h = jnp.maximum(h + shift_ref[...], 0.0)
    # fc1 + ReLU
    h = jnp.dot(h.astype(jnp.bfloat16), w2_ref[...], preferred_element_type=jnp.float32)
    h = jnp.maximum(h + b2_ref[...], 0.0)
    # dropout(p=0.5): identity in eval/inference mode.
    # TODO(synk): training-mode dropout mask (pltpu.prng_random_bits) not emitted.
    # fc2 (N=1): VPU multiply + lane reduction instead of a 1-column MXU matmul.
    logits = jnp.sum(h * w3_ref[...], axis=-1, keepdims=True) + b3_ref[...]
    o_ref[...] = jax.nn.sigmoid(logits)


def init_params(key):
    """Deterministic synthetic parameters matching the PyTorch module shapes."""
    ks = jax.random.split(key, 10)
    f32 = jnp.float32
    # Conv2d(2048, 512, k=1): weight (512, 2048, 1, 1) -> stored transposed (2048, 512)
    w_conv = jax.random.normal(ks[0], (IN_CH, HID1), f32) * (1.0 / jnp.sqrt(IN_CH))
    b_conv = jax.random.normal(ks[1], (HID1,), f32) * 0.01
    # BatchNorm2d(512) (inference statistics)
    gamma = 1.0 + 0.1 * jax.random.normal(ks[2], (HID1,), f32)
    beta = 0.1 * jax.random.normal(ks[3], (HID1,), f32)
    run_mean = 0.1 * jax.random.normal(ks[4], (HID1,), f32)
    run_var = jnp.abs(1.0 + 0.1 * jax.random.normal(ks[5], (HID1,), f32))
    # Linear(512, 128)
    w_fc1 = jax.random.normal(ks[6], (HID1, HID2), f32) * (1.0 / jnp.sqrt(HID1))
    b_fc1 = jax.random.normal(ks[7], (HID2,), f32) * 0.01
    # Linear(128, 1)
    w_fc2 = jax.random.normal(ks[8], (HID2, OUT), f32) * (1.0 / jnp.sqrt(HID2))
    b_fc2 = jax.random.normal(ks[9], (OUT,), f32) * 0.01
    return dict(w_conv=w_conv, b_conv=b_conv, gamma=gamma, beta=beta,
                run_mean=run_mean, run_var=run_var,
                w_fc1=w_fc1, b_fc1=b_fc1, w_fc2=w_fc2, b_fc2=b_fc2)


def _fold_params(params):
    """Fold BatchNorm (inference) + conv bias into (w1, shift); bf16 matmul weights."""
    inv_std = 1.0 / jnp.sqrt(params["run_var"] + BN_EPS)
    scale = params["gamma"] * inv_std                                    # (512,)
    shift = ((params["b_conv"] - params["run_mean"]) * scale
             + params["beta"]).reshape(1, HID1)                          # (1, 512) f32
    w1 = (params["w_conv"] * scale[None, :]).astype(jnp.bfloat16)        # (2048, 512)
    w2 = params["w_fc1"].astype(jnp.bfloat16)                            # (512, 128)
    b2 = params["b_fc1"].reshape(1, HID2)                                # (1, 128) f32
    w3 = params["w_fc2"].reshape(1, HID2)                                # (1, 128) f32 row
    b3 = params["b_fc2"].reshape(1, OUT)                                 # (1, 1)   f32
    return w1, shift, w2, b2, w3, b3


def relation_network_forward(x_nchw, params):
    """x_nchw: (B, 2048, 1, 1) float32 -> (B, 1) float32 (inference forward)."""
    B = x_nchw.shape[0]
    x = x_nchw.reshape(B, IN_CH)          # H=W=1, flatten is exact (no data movement)
    w1, shift, w2, b2, w3, b3 = _fold_params(params)

    tile_b = _choose_tile_b(B)
    grid = (pl.cdiv(B, tile_b),)          # ragged last tile: OOB rows read undefined,
                                          # OOB writes dropped -> no pad/copy of x.
    resident = lambda shape: pl.BlockSpec(shape, lambda i: (0, 0))

    cost = pl.CostEstimate(
        flops=2 * B * (IN_CH * HID1 + HID1 * HID2 + HID2 * OUT),
        transcendentals=B,                # sigmoid
        bytes_accessed=(B * IN_CH * 4 + B * OUT * 4
                        + IN_CH * HID1 * 2 + HID1 * HID2 * 2
                        + (HID1 + HID2 + HID2 + OUT) * 4),
    )

    out = pl.pallas_call(
        _relation_kernel,
        out_shape=jax.ShapeDtypeStruct((B, OUT), jnp.float32),
        grid=grid,
        in_specs=[
            pl.BlockSpec((tile_b, IN_CH), lambda i: (i, 0)),  # x batch tile (f32)
            resident((IN_CH, HID1)),                          # w1 (bf16, BN folded)
            resident((1, HID1)),                              # shift
            resident((HID1, HID2)),                           # w2 (bf16)
            resident((1, HID2)),                              # b2
            resident((1, HID2)),                              # w3 row
            resident((1, OUT)),                               # b3
        ],
        out_specs=pl.BlockSpec((tile_b, OUT), lambda i: (i, 0)),
        compiler_params=pltpu.CompilerParams(
            dimension_semantics=("parallel",),
            vmem_limit_bytes=32 << 20,
        ),
        cost_estimate=cost,
    )(x, w1, shift, w2, b2, w3, b3)

    return out


def _reference_forward(x_nchw, params):
    """Pure-JAX f32 reference for a sanity check."""
    B = x_nchw.shape[0]
    x = x_nchw.reshape(B, IN_CH)
    h = x @ params["w_conv"] + params["b_conv"]
    h = (h - params["run_mean"]) / jnp.sqrt(params["run_var"] + BN_EPS)
    h = h * params["gamma"] + params["beta"]
    h = jnp.maximum(h, 0.0)
    h = jnp.maximum(h @ params["w_fc1"] + params["b_fc1"], 0.0)
    return jax.nn.sigmoid(h @ params["w_fc2"] + params["b_fc2"])


if __name__ == "__main__":
    key = jax.random.PRNGKey(0)
    k_x, k_x2, k_p = jax.random.split(key, 3)
    params = init_params(k_p)

    # Small latency-path batch: single exact 8-row tile (no padding, no wasted MXU work).
    B = 8
    x = jax.random.normal(k_x, (B, IN_CH, 1, 1), jnp.float32)
    out = jax.block_until_ready(relation_network_forward(x, params))
    ref = _reference_forward(x, params)
    assert out.shape == (B, 1), out.shape
    # bf16 matmul operands (f32 accumulation) -> modest tolerance vs f32 reference.
    assert jnp.allclose(out, ref, atol=3e-2, rtol=3e-2), (out, ref)

    # Multi-tile throughput path with a ragged final tile (exercises the cdiv grid).
    B2 = 300
    x2 = jax.random.normal(k_x2, (B2, IN_CH, 1, 1), jnp.float32)
    out2 = jax.block_until_ready(relation_network_forward(x2, params))
    ref2 = _reference_forward(x2, params)
    assert out2.shape == (B2, 1), out2.shape
    assert jnp.allclose(out2, ref2, atol=3e-2, rtol=3e-2), (out2, ref2)

    print("KERNEL_OK")
</pallas_src>

<mosaic_0001>
module attributes {stable_mosaic.version = 11 : i64} {
  func.func @_relation_kernel(%arg0: i32, %arg1: memref<8x2048xf32, #tpu.memory_space<vmem>>, %arg2: memref<2048x512xbf16, #tpu.memory_space<vmem>>, %arg3: memref<1x512xf32, #tpu.memory_space<vmem>>, %arg4: memref<512x128xbf16, #tpu.memory_space<vmem>>, %arg5: memref<1x128xf32, #tpu.memory_space<vmem>>, %arg6: memref<1x128xf32, #tpu.memory_space<vmem>>, %arg7: memref<1x1xf32, #tpu.memory_space<vmem>>, %arg8: memref<8x1xf32, #tpu.memory_space<vmem>>) attributes {dimension_semantics = [#tpu.dimension_semantics<parallel>], iteration_bounds = array<i64: 1>, scalar_prefetch = 0 : i64, scratch_operands = 0 : i64, tpu.core_type = #tpu.core_type<tc>, window_params = [{transform_indices = @transform_0, window_bounds = array<i64: 8, 2048>}, {pipeline_mode = #tpu.pipeline_mode<synchronous>, transform_indices = @transform_1, window_bounds = array<i64: 2048, 512>}, {pipeline_mode = #tpu.pipeline_mode<synchronous>, transform_indices = @transform_2, window_bounds = array<i64: 1, 512>}, {pipeline_mode = #tpu.pipeline_mode<synchronous>, transform_indices = @transform_3, window_bounds = array<i64: 512, 128>}, {pipeline_mode = #tpu.pipeline_mode<synchronous>, transform_indices = @transform_4, window_bounds = array<i64: 1, 128>}, {pipeline_mode = #tpu.pipeline_mode<synchronous>, transform_indices = @transform_5, window_bounds = array<i64: 1, 128>}, {pipeline_mode = #tpu.pipeline_mode<synchronous>, transform_indices = @transform_6, window_bounds = array<i64: 1, 1>}, {transform_indices = @transform_7, window_bounds = array<i64: 8, 1>}]} {
    %c0 = arith.constant 0 : index
    %c0_0 = arith.constant 0 : index
    %0 = vector.load %arg1[%c0, %c0_0] : memref<8x2048xf32, #tpu.memory_space<vmem>>, vector<8x2048xf32>
    %1 = arith.truncf %0 : vector<8x2048xf32> to vector<8x2048xbf16>
    %c0_1 = arith.constant 0 : index
    %c0_2 = arith.constant 0 : index
    %2 = vector.load %arg2[%c0_1, %c0_2] : memref<2048x512xbf16, #tpu.memory_space<vmem>>, vector<2048x512xbf16>
    %cst = arith.constant dense<0.000000e+00> : vector<8x512xf32>
    %3 = tpu.matmul %1, %2, %cst {dimension_numbers = #tpu.dot_dimension_numbers<[1], [0], [0], [1], [0, 0, 1, 1], [], []>} : vector<8x2048xbf16>, vector<2048x512xbf16>, vector<8x512xf32> -> vector<8x512xf32>
    %c0_3 = arith.constant 0 : index
    %c0_4 = arith.constant 0 : index
    %4 = vector.load %arg3[%c0_3, %c0_4] : memref<1x512xf32, #tpu.memory_space<vmem>>, vector<1x512xf32>
    %5 = vector.broadcast %4 : vector<1x512xf32> to vector<8x512xf32>
    %6 = arith.addf %3, %5 : vector<8x512xf32>
    %cst_5 = arith.constant 0.000000e+00 : f32
    %7 = vector.broadcast %cst_5 : f32 to vector<8x512xf32>
    %8 = arith.maximumf %6, %7 : vector<8x512xf32>
    %9 = arith.truncf %8 : vector<8x512xf32> to vector<8x512xbf16>
    %c0_6 = arith.constant 0 : index
    %c0_7 = arith.constant 0 : index
    %10 = vector.load %arg4[%c0_6, %c0_7] : memref<512x128xbf16, #tpu.memory_space<vmem>>, vector<512x128xbf16>
    %cst_8 = arith.constant dense<0.000000e+00> : vector<8x128xf32>
    %11 = tpu.matmul %9, %10, %cst_8 {dimension_numbers = #tpu.dot_dimension_numbers<[1], [0], [0], [1], [0, 0, 1, 1], [], []>} : vector<8x512xbf16>, vector<512x128xbf16>, vector<8x128xf32> -> vector<8x128xf32>
    %c0_9 = arith.constant 0 : index
    %c0_10 = arith.constant 0 : index
    %12 = vector.load %arg5[%c0_9, %c0_10] : memref<1x128xf32, #tpu.memory_space<vmem>>, vector<1x128xf32>
    %13 = vector.broadcast %12 : vector<1x128xf32> to vector<8x128xf32>
    %14 = arith.addf %11, %13 : vector<8x128xf32>
    %cst_11 = arith.constant 0.000000e+00 : f32
    %15 = vector.broadcast %cst_11 : f32 to vector<8x128xf32>
    %16 = arith.maximumf %14, %15 : vector<8x128xf32>
    %c0_12 = arith.constant 0 : index
    %c0_13 = arith.constant 0 : index
    %17 = vector.load %arg6[%c0_12, %c0_13] : memref<1x128xf32, #tpu.memory_space<vmem>>, vector<1x128xf32>
    %18 = vector.broadcast %17 : vector<1x128xf32> to vector<8x128xf32>
    %19 = arith.mulf %16, %18 : vector<8x128xf32>
    %cst_14 = arith.constant dense<0.000000e+00> : vector<8xf32>
    %20 = vector.multi_reduction <add>, %19, %cst_14 [1] : vector<8x128xf32> to vector<8xf32>
    %21 = vector.shape_cast %20 : vector<8xf32> to vector<8x1xf32>
    %c0_15 = arith.constant 0 : index
    %c0_16 = arith.constant 0 : index
    %22 = vector.load %arg7[%c0_15, %c0_16] : memref<1x1xf32, #tpu.memory_space<vmem>>, vector<1x1xf32>
    %23 = vector.broadcast %22 : vector<1x1xf32> to vector<8x1xf32>
    %24 = arith.addf %21, %23 : vector<8x1xf32>
    %25 = arith.negf %24 : vector<8x1xf32>
    %26 = math.exp %25 : vector<8x1xf32>
    %cst_17 = arith.constant 1.000000e+00 : f32
    %27 = vector.broadcast %cst_17 : f32 to vector<8x1xf32>
    %28 = arith.addf %27, %26 : vector<8x1xf32>
    %29 = arith.divf %27, %28 : vector<8x1xf32>
    %c0_18 = arith.constant 0 : index
    %c0_19 = arith.constant 0 : index
    %30 = vector.load %arg8[%c0_18, %c0_19] : memref<8x1xf32, #tpu.memory_space<vmem>>, vector<8x1xf32>
    tpu.vector_store %arg8[%c0_18, %c0_19], %29 {strides = array<i32>} : memref<8x1xf32, #tpu.memory_space<vmem>>, vector<8x1xf32>,
    return
  }
  func.func @transform_0(%arg0: i32) -> (i32, i32) {
    %c0_i32 = arith.constant 0 : i32
    %c0_i32_0 = arith.constant 0 : i32
    return %arg0, %c0_i32 : i32, i32
  }
  func.func @transform_1(%arg0: i32) -> (i32, i32) {
    %c0_i32 = arith.constant 0 : i32
    %c0_i32_0 = arith.constant 0 : i32
    %c0_i32_1 = arith.constant 0 : i32
    return %c0_i32, %c0_i32_0 : i32, i32
  }
  func.func @transform_2(%arg0: i32) -> (i32, i32) {
    %c0_i32 = arith.constant 0 : i32
    %c0_i32_0 = arith.constant 0 : i32
    %c0_i32_1 = arith.constant 0 : i32
    return %c0_i32, %c0_i32_0 : i32, i32
  }
  func.func @transform_3(%arg0: i32) -> (i32, i32) {
    %c0_i32 = arith.constant 0 : i32
    %c0_i32_0 = arith.constant 0 : i32
    %c0_i32_1 = arith.constant 0 : i32
    return %c0_i32, %c0_i32_0 : i32, i32
  }
  func.func @transform_4(%arg0: i32) -> (i32, i32) {
    %c0_i32 = arith.constant 0 : i32
    %c0_i32_0 = arith.constant 0 : i32
    %c0_i32_1 = arith.constant 0 : i32
    return %c0_i32, %c0_i32_0 : i32, i32
  }
  func.func @transform_5(%arg0: i32) -> (i32, i32) {
    %c0_i32 = arith.constant 0 : i32
    %c0_i32_0 = arith.constant 0 : i32
    %c0_i32_1 = arith.constant 0 : i32
    return %c0_i32, %c0_i32_0 : i32, i32
  }
  func.func @transform_6(%arg0: i32) -> (i32, i32) {
    %c0_i32 = arith.constant 0 : i32
    %c0_i32_0 = arith.constant 0 : i32
    %c0_i32_1 = arith.constant 0 : i32
    return %c0_i32, %c0_i32_0 : i32, i32
  }
  func.func @transform_7(%arg0: i32) -> (i32, i32) {
    %c0_i32 = arith.constant 0 : i32
    %c0_i32_0 = arith.constant 0 : i32
    return %arg0, %c0_i32 : i32, i32
  }
}

</mosaic_0001>

<bundles_post_ra>
// kernel: tpu_custom_call.1
= control target key start
LH: loop header
LB: loop body
LE: loop exit
PB: predicated region body
PF: predicated region fallthrough
CT: control target
= control target key end

     0   :  { %s7539_s0 = inlined_call_operand.hbm [shape: f32[8,2048], index: 0, kind: input, shape index: {}]   ;;  %s7540_s1 = inlined_call_operand.hbm [shape: bf16[2048,512], index: 1, kind: input, shape index: {}]   ;;  %s7541_s2 = inlined_call_operand.hbm [shape: f32[1,512], index: 2, kind: input, shape index: {}]   ;;  %s7542_s3 = inlined_call_operand.hbm [shape: bf16[512,128], index: 3, kind: input, shape index: {}]   ;;  %s7543_s4 = inlined_call_operand.hbm [shape: f32[1,128], index: 4, kind: input, shape index: {}]   ;;  %s7544_s5 = inlined_call_operand.hbm [shape: f32[1,128], index: 5, kind: input, shape index: {}]   ;;  %s7545_s6 = inlined_call_operand.<no memory space> [shape: f32[1,1], index: 6, kind: input, shape index: {}]   ;;  %s7546_s7 = inlined_call_operand.vmem [shape: f32[8,1], index: 7, kind: output, shape index: {}]  }
   0x1   :  { %v12_v0 = vstv %s7545_s6 }
   0x2   :  { %13 = vst [vmem:[#allocation2] sm:$0x1] %v12_v0 }
   0x3   :  { %14 = vsyncpa [#allocation4], 0 }
   0x4   :  { %15 = vsyncpa [#allocation6], 0 }
   0x5   :  { %16 = vsyncpa [#allocation9], 0  ;;  %s33_s28 = sshll.u32 %s7540_s1, 4  ;;  %s34_s28 = int_to_ptr.hbm [resolvable:$true] %s33_s28 }
   0x6   :  { %17 = vsyncpa [#allocation12], 0  ;;  %s7314_s29 = smov [#allocation5]   ;;  %s57_s10 = sshll.u32 %s7542_s3, 4  ;;  %s58_s10 = int_to_ptr.hbm [resolvable:$true] %s57_s10 }
   0x7   :  { %s35_s30 = sshll.u32 %s7314_s29, 4  ;;  %s7315_s11 = smov 256   ;;  %s36_s30 = int_to_ptr.vmem [resolvable:$true] %s35_s30 }
   0x8   :  { %s7316_s12 = smov 16   ;;  %s7317_s6 = smov [#allocation8]  }
   0x9   :  { %41 = dma.hbm_to_vmem [thread:$0]  %s34_s28, 65536, %s36_s30, [#allocation6], %s7315_s11, %s7315_s11, %s7316_s12  }
   0xa   :  { %s59_s13 = sshll.u32 %s7317_s6, 4  ;;  %s7318_s14 = smov 64   ;;  %s60_s13 = int_to_ptr.vmem [resolvable:$true] %s59_s13 }
   0xb   :  { %s7319_s15 = smov 4   ;;  %s23_s17 = sshll.u32 %s7539_s0, 4  ;;  %s24_s17 = int_to_ptr.hbm [resolvable:$true] %s23_s17 }
   0xc   :  { %65 = dma.hbm_to_vmem [thread:$0]  %s58_s10, 4096, %s60_s13, [#allocation9], %s7318_s14, %s7318_s14, %s7319_s15  }
   0xd   :  { %s7320_s18 = smov [#allocation3]   ;;  %s47_s21 = sshll.u32 %s7541_s2, 4  ;;  %s48_s21 = int_to_ptr.hbm [resolvable:$true] %s47_s21 }
   0xe   :  { %s25_s19 = sshll.u32 %s7320_s18, 4  ;;  %s7321_s22 = smov [#allocation7]   ;;  %s26_s19 = int_to_ptr.vmem [resolvable:$true] %s25_s19 }
   0xf   :  { %28 = dma.hbm_to_vmem [thread:$0]  %s24_s17, 2048, %s26_s19, [#allocation4]  }
  0x10   :  { %s49_s23 = sshll.u32 %s7321_s22, 4  ;;  %s71_s26 = sshll.u32 %s7543_s4, 4  ;;  %s50_s23 = int_to_ptr.vmem [resolvable:$true] %s49_s23  ;;  %s72_s26 = int_to_ptr.hbm [resolvable:$true] %s71_s26 }
  0x11   :  { %52 = dma.hbm_to_vmem [thread:$0]  %s48_s21, 64, %s50_s23, [#allocation6]  }
  0x12   :  { %s82_s28 = sshll.u32 %s7544_s5, 4  ;;  %s7322_s29 = smov [#allocation10]   ;;  %s83_s28 = int_to_ptr.hbm [resolvable:$true] %s82_s28 }
  0x13   :  { %s73_s30 = sshll.u32 %s7322_s29, 4  ;;  %s7323_s2 = smov [#allocation11]   ;;  %s74_s30 = int_to_ptr.vmem [resolvable:$true] %s73_s30 }
  0x14   :  { %76 = dma.hbm_to_vmem [thread:$0]  %s72_s26, 16, %s74_s30, [#allocation9]  }
  0x15   :  { %s84_s8 = sshll.u32 %s7323_s2, 4  ;;  %s85_s8 = int_to_ptr.vmem [resolvable:$true] %s84_s8 }
  0x16   :  { %87 = dma.hbm_to_vmem [thread:$0]  %s83_s28, 16, %s85_s8, [#allocation12]  }
  0x17   :  { %7306 = dma.done.wait [#allocation4], 2048  }
  0x18   :  { %7307 = vsyncadd [#allocation4], 4294965248 }
  0x19   :  { %7308 = dma.done.wait [#allocation6], 65600  }
  0x1a   :  { %7309 = vsyncadd [#allocation6], 4294901696 }
  0x1b   :  { %7310 = dma.done.wait [#allocation9], 4112  }
  0x1c   :  { %7311 = vsyncadd [#allocation9], 4294963184 }
  0x1d   :  { %7312 = dma.done.wait [#allocation12], 16  }
  0x1e   :  { %7313 = vsyncadd [#allocation12], 4294967280  ;;  %v4536_v1 = vld [vmem:[#allocation5 + $0xe0] sm:$0xf]  ;;  %v6629_v2 = vld [vmem:[#allocation5 + $0xec] sm:$0xf0] }
  0x1f   :  { %v4664_v3 = vld [vmem:[#allocation5 + $0x1e0] sm:$0xf]  ;;  %v4537_v4 = vor.u32 %v6629_v2, %v4536_v1  ;;  %v6661_v5 = vld [vmem:[#allocation5 + $0x1ec] sm:$0xf0]  ;;  %vm4412_vm3 = vcmask 7168  }
  0x20   :  { %v4792_v6 = vld [vmem:[#allocation5 + $0x2e0] sm:$0xf]  ;;  %v6693_v7 = vld [vmem:[#allocation5 + $0x2ec] sm:$0xf0]  ;;  %v4665_v8 = vor.u32 %v6661_v5, %v4664_v3 }
  0x21   :  { %v4793_v9 = vor.u32 %v6693_v7, %v4792_v6  ;;  %v4920_v10 = vld [vmem:[#allocation5 + $0x3e0] sm:$0xf]  ;;  %v6725_v11 = vld [vmem:[#allocation5 + $0x3ec] sm:$0xf0]  ;;  %3228 = vmatpush.bf16.msra.mxu0 %v4537_v4 }
  0x22   :  { %v4520_v12 = vld [vmem:[#allocation5 + $0xc0] sm:$0xf]  ;;  %v4921_v13 = vor.u32 %v6725_v11, %v4920_v10  ;;  %v6625_v14 = vld [vmem:[#allocation5 + $0xcc] sm:$0xf0]  ;;  %3241 = vmatpush.bf16.msra.mxu1 %v4665_v8 }
  0x23   :  { %v4648_v15 = vld [vmem:[#allocation5 + $0x1c0] sm:$0xf]  ;;  %v6657_v16 = vld [vmem:[#allocation5 + $0x1cc] sm:$0xf0]  ;;  %3254 = vmatpush.bf16.msra.mxu2 %v4793_v9  ;;  %v4521_v17 = vor.u32 %v6625_v14, %v4520_v12 }
  0x24   :  { %v4649_v18 = vor.u32 %v6657_v16, %v4648_v15  ;;  %v4776_v19 = vld [vmem:[#allocation5 + $0x2c0] sm:$0xf]  ;;  %v6689_v20 = vld [vmem:[#allocation5 + $0x2cc] sm:$0xf0]  ;;  %3267 = vmatpush.bf16.msra.mxu3 %v4921_v13 }
  0x25   :  { %v4904_v21 = vld [vmem:[#allocation5 + $0x3c0] sm:$0xf]  ;;  %v4777_v22 = vor.u32 %v6689_v20, %v4776_v19  ;;  %v6721_v23 = vld [vmem:[#allocation5 + $0x3cc] sm:$0xf0]  ;;  %3229 = vmatpush.bf16.msra.mxu0 %v4521_v17 }
  0x26   :  { %v4504_v24 = vld [vmem:[#allocation5 + $0xa0] sm:$0xf]  ;;  %v6621_v25 = vld [vmem:[#allocation5 + $0xac] sm:$0xf0]  ;;  %v4905_v26 = vor.u32 %v6721_v23, %v4904_v21  ;;  %3242 = vmatpush.bf16.msra.mxu1 %v4649_v18 }
  0x27   :  { %v4632_v27 = vld [vmem:[#allocation5 + $0x1a0] sm:$0xf]  ;;  %v6653_v28 = vld [vmem:[#allocation5 + $0x1ac] sm:$0xf0]  ;;  %v4505_v30 = vor.u32 %v6621_v25, %v4504_v24  ;;  %3255 = vmatpush.bf16.msra.mxu2 %v4777_v22 }
  0x28   :  { %v4760_v29 = vld [vmem:[#allocation5 + $0x2a0] sm:$0xf]  ;;  %v6685_v31 = vld [vmem:[#allocation5 + $0x2ac] sm:$0xf0]  ;;  %v4633_v34 = vor.u32 %v6653_v28, %v4632_v27  ;;  %3268 = vmatpush.bf16.msra.mxu3 %v4905_v26 }
  0x29   :  { %v4888_v32 = vld [vmem:[#allocation5 + $0x3a0] sm:$0xf]  ;;  %v6717_v33 = vld [vmem:[#allocation5 + $0x3ac] sm:$0xf0]  ;;  %v4761_v35 = vor.u32 %v6685_v31, %v4760_v29  ;;  %3230 = vmatpush.bf16.msra.mxu0 %v4505_v30 }
  0x2a   :  { %v4488_v36 = vld [vmem:[#allocation5 + $0x80] sm:$0xf]  ;;  %v6617_v37 = vld [vmem:[#allocation5 + $0x8c] sm:$0xf0]  ;;  %v4889_v39 = vor.u32 %v6717_v33, %v4888_v32  ;;  %3243 = vmatpush.bf16.msra.mxu1 %v4633_v34 }
  0x2b   :  { %v4616_v38 = vld [vmem:[#allocation5 + $0x180] sm:$0xf]  ;;  %v6649_v40 = vld [vmem:[#allocation5 + $0x18c] sm:$0xf0]  ;;  %v4489_v45 = vor.u32 %v6617_v37, %v4488_v36  ;;  %3256 = vmatpush.bf16.msra.mxu2 %v4761_v35 }
  0x2c   :  { %v4744_v41 = vld [vmem:[#allocation5 + $0x280] sm:$0xf]  ;;  %v6681_v42 = vld [vmem:[#allocation5 + $0x28c] sm:$0xf0]  ;;  %v4617_v46 = vor.u32 %v6649_v40, %v4616_v38  ;;  %3269 = vmatpush.bf16.msra.mxu3 %v4889_v39 }
  0x2d   :  { %v4872_v43 = vld [vmem:[#allocation5 + $0x380] sm:$0xf]  ;;  %v6713_v44 = vld [vmem:[#allocation5 + $0x38c] sm:$0xf0]  ;;  %v4745_v47 = vor.u32 %v6681_v42, %v4744_v41  ;;  %3231 = vmatpush.bf16.msra.mxu0 %v4489_v45 }
  0x2e   :  { %v4472_v48 = vld [vmem:[#allocation5 + $0x60] sm:$0xf]  ;;  %v6613_v49 = vld [vmem:[#allocation5 + $0x6c] sm:$0xf0]  ;;  %v4873_v51 = vor.u32 %v6713_v44, %v4872_v43  ;;  %3244 = vmatpush.bf16.msra.mxu1 %v4617_v46 }
  0x2f   :  { %v4600_v50 = vld [vmem:[#allocation5 + $0x160] sm:$0xf]  ;;  %v6645_v52 = vld [vmem:[#allocation5 + $0x16c] sm:$0xf0]  ;;  %v4473_v57 = vor.u32 %v6613_v49, %v4472_v48  ;;  %3257 = vmatpush.bf16.msra.mxu2 %v4745_v47 }
  0x30   :  { %v4728_v53 = vld [vmem:[#allocation5 + $0x260] sm:$0xf]  ;;  %v6677_v54 = vld [vmem:[#allocation5 + $0x26c] sm:$0xf0]  ;;  %v4601_v58 = vor.u32 %v6645_v52, %v4600_v50  ;;  %3270 = vmatpush.bf16.msra.mxu3 %v4873_v51 }
  0x31   :  { %v4856_v55 = vld [vmem:[#allocation5 + $0x360] sm:$0xf]  ;;  %v6709_v56 = vld [vmem:[#allocation5 + $0x36c] sm:$0xf0]  ;;  %v4729_v59 = vor.u32 %v6677_v54, %v4728_v53  ;;  %3232 = vmatpush.bf16.msra.mxu0 %v4473_v57 }
  0x32   :  { %v4456_v60 = vld [vmem:[#allocation5 + $0x40] sm:$0xf]  ;;  %v6609_v61 = vld [vmem:[#allocation5 + $0x4c] sm:$0xf0]  ;;  %v4857_v63 = vor.u32 %v6709_v56, %v4856_v55  ;;  %3245 = vmatpush.bf16.msra.mxu1 %v4601_v58 }
  0x33   :  { %v4584_v62 = vld [vmem:[#allocation5 + $0x140] sm:$0xf]  ;;  %v6641_v0 = vld [vmem:[#allocation5 + $0x14c] sm:$0xf0]  ;;  %v4457_v5 = vor.u32 %v6609_v61, %v4456_v60  ;;  %3258 = vmatpush.bf16.msra.mxu2 %v4729_v59 }
  0x34   :  { %v4712_v1 = vld [vmem:[#allocation5 + $0x240] sm:$0xf]  ;;  %v6673_v2 = vld [vmem:[#allocation5 + $0x24c] sm:$0xf0]  ;;  %v4585_v6 = vor.u32 %v6641_v0, %v4584_v62  ;;  %3271 = vmatpush.bf16.msra.mxu3 %v4857_v63 }
  0x35   :  { %v4840_v3 = vld [vmem:[#allocation5 + $0x340] sm:$0xf]  ;;  %v6705_v4 = vld [vmem:[#allocation5 + $0x34c] sm:$0xf0]  ;;  %v4713_v7 = vor.u32 %v6673_v2, %v4712_v1  ;;  %3233 = vmatpush.bf16.msra.mxu0 %v4457_v5 }
  0x36   :  { %v4440_v8 = vld [vmem:[#allocation5 + $0x20] sm:$0xf]  ;;  %v6605_v9 = vld [vmem:[#allocation5 + $0x2c] sm:$0xf0]  ;;  %v4841_v11 = vor.u32 %v6705_v4, %v4840_v3  ;;  %3246 = vmatpush.bf16.msra.mxu1 %v4585_v6 }
  0x37   :  { %v4568_v10 = vld [vmem:[#allocation5 + $0x120] sm:$0xf]  ;;  %v6637_v12 = vld [vmem:[#allocation5 + $0x12c] sm:$0xf0]  ;;  %v4441_v17 = vor.u32 %v6605_v9, %v4440_v8  ;;  %3259 = vmatpush.bf16.msra.mxu2 %v4713_v7 }
  0x38   :  { %v4696_v13 = vld [vmem:[#allocation5 + $0x220] sm:$0xf]  ;;  %v6669_v14 = vld [vmem:[#allocation5 + $0x22c] sm:$0xf0]  ;;  %v4569_v20 = vor.u32 %v6637_v12, %v4568_v10  ;;  %3272 = vmatpush.bf16.msra.mxu3 %v4841_v11  ;;  %v117_v11 = vld [vmem:[#allocation3 + $0x18] sm:$0xff] }
  0x39   :  { %v4824_v15 = vld [vmem:[#allocation5 + $0x320] sm:$0xf]  ;;  %v6701_v16 = vld [vmem:[#allocation5 + $0x32c] sm:$0xf0]  ;;  %v4697_v21 = vor.u32 %v6669_v14, %v4696_v13  ;;  %3234 = vmatpush.bf16.msra.mxu0 %v4441_v17 }
  0x3a   :  { %v4424_v18 = vld [vmem:[#allocation5] sm:$0xf]  ;;  %v6601_v19 = vld [vmem:[#allocation5 + $0xc] sm:$0xf0]  ;;  %v4825_v25 = vor.u32 %v6701_v16, %v4824_v15  ;;  %3247 = vmatpush.bf16.msra.mxu1 %v4569_v20  ;;  %v7389_v16 = vpack.c.bf16 %v117_v11, %v117_v11  ;;  %v115_v20 = vld [vmem:[#allocation3 + $0x8] sm:$0xff] }
  0x3b   :  { %v4552_v22 = vld [vmem:[#allocation5 + $0x100] sm:$0xf]  ;;  %v6633_v23 = vld [vmem:[#allocation5 + $0x10c] sm:$0xf0]  ;;  %v4425_v32 = vor.u32 %v6601_v19, %v4424_v18  ;;  %3260 = vmatpush.bf16.msra.mxu2 %v4697_v21 }
  0x3c   :  { %v4680_v24 = vld [vmem:[#allocation5 + $0x200] sm:$0xf]  ;;  %v6665_v26 = vld [vmem:[#allocation5 + $0x20c] sm:$0xf0]  ;;  %v4553_v36 = vor.u32 %v6633_v23, %v4552_v22  ;;  %3273 = vmatpush.bf16.msra.mxu3 %v4825_v25 }
  0x3d   :  { %v4808_v27 = vld [vmem:[#allocation5 + $0x300] sm:$0xf]  ;;  %v6697_v28 = vld [vmem:[#allocation5 + $0x30c] sm:$0xf0]  ;;  %v4681_v37 = vor.u32 %v6665_v26, %v4680_v24  ;;  %3235 = vmatpush.bf16.msra.mxu0 %v4425_v32  ;;  %v7394_v26 = vpack.c.bf16 %v115_v20, %v115_v20 }
  0x3e   :  { %v5048_v29 = vld [vmem:[#allocation5 + $0x4e0] sm:$0xf]  ;;  %v6757_v30 = vld [vmem:[#allocation5 + $0x4ec] sm:$0xf0]  ;;  %v4809_v40 = vor.u32 %v6697_v28, %v4808_v27  ;;  %3248 = vmatpush.bf16.msra.mxu1 %v4553_v36 }
  0x3f   :  { %v5176_v31 = vld [vmem:[#allocation5 + $0x5e0] sm:$0xf]  ;;  %v6789_v33 = vld [vmem:[#allocation5 + $0x5ec] sm:$0xf0]  ;;  %v5049_v41 = vor.u32 %v6757_v30, %v5048_v29  ;;  %3261 = vmatpush.bf16.msra.mxu2 %v4681_v37 }
  0x40   :  { %v5304_v34 = vld [vmem:[#allocation5 + $0x6e0] sm:$0xf]  ;;  %v6821_v35 = vld [vmem:[#allocation5 + $0x6ec] sm:$0xf0]  ;;  %v5177_v42 = vor.u32 %v6789_v33, %v5176_v31  ;;  %3274 = vmatpush.bf16.msra.mxu3 %v4809_v40 }
  0x41   :  { %v5432_v38 = vld [vmem:[#allocation5 + $0x7e0] sm:$0xf]  ;;  %v6853_v39 = vld [vmem:[#allocation5 + $0x7ec] sm:$0xf0]  ;;  %v5305_v43 = vor.u32 %v6821_v35, %v5304_v34  ;;  %3280 = vmatpush.bf16.msrb.mxu0 %v5049_v41  ;;  %3249 = vmatmul.bf16.vlgmr.msra.gmra.mxu1 %v7394_v26 }
  0x42   :  { %v5032_v44 = vld [vmem:[#allocation5 + $0x4c0] sm:$0xf]  ;;  %v6753_v45 = vld [vmem:[#allocation5 + $0x4cc] sm:$0xf0]  ;;  %v5433_v47 = vor.u32 %v6853_v39, %v5432_v38  ;;  %3293 = vmatpush.bf16.msrb.mxu1 %v5177_v42 }
  0x43   :  { %v5160_v46 = vld [vmem:[#allocation5 + $0x5c0] sm:$0xf]  ;;  %v6785_v48 = vld [vmem:[#allocation5 + $0x5cc] sm:$0xf0]  ;;  %v5033_v53 = vor.u32 %v6753_v45, %v5032_v44  ;;  %3306 = vmatpush.bf16.msrb.mxu2 %v5305_v43  ;;  %3275 = vmatmul.bf16.vlgmr.msra.gmra.mxu3 %v7389_v16 }
  0x44   :  { %v5288_v49 = vld [vmem:[#allocation5 + $0x6c0] sm:$0xf]  ;;  %v6817_v50 = vld [vmem:[#allocation5 + $0x6cc] sm:$0xf0]  ;;  %v5161_v55 = vor.u32 %v6785_v48, %v5160_v46  ;;  %3319 = vmatpush.bf16.msrb.mxu3 %v5433_v47 }
  0x45   :  { %v5416_v51 = vld [vmem:[#allocation5 + $0x7c0] sm:$0xf]  ;;  %v6849_v52 = vld [vmem:[#allocation5 + $0x7cc] sm:$0xf0]  ;;  %v5289_v56 = vor.u32 %v6817_v50, %v5288_v49  ;;  %3281 = vmatpush.bf16.msrb.mxu0 %v5033_v53 }
  0x46   :  { %v5016_v54 = vld [vmem:[#allocation5 + $0x4a0] sm:$0xf]  ;;  %v6749_v57 = vld [vmem:[#allocation5 + $0x4ac] sm:$0xf0]  ;;  %v5417_v60 = vor.u32 %v6849_v52, %v5416_v51  ;;  %3294 = vmatpush.bf16.msrb.mxu1 %v5161_v55 }
  0x47   :  { %v5144_v58 = vld [vmem:[#allocation5 + $0x5a0] sm:$0xf]  ;;  %v6781_v59 = vld [vmem:[#allocation5 + $0x5ac] sm:$0xf0]  ;;  %v5017_v1 = vor.u32 %v6749_v57, %v5016_v54  ;;  %3307 = vmatpush.bf16.msrb.mxu2 %v5289_v56 }
  0x48   :  { %v5272_v61 = vld [vmem:[#allocation5 + $0x6a0] sm:$0xf]  ;;  %v6813_v62 = vld [vmem:[#allocation5 + $0x6ac] sm:$0xf0]  ;;  %v5145_v2 = vor.u32 %v6781_v59, %v5144_v58  ;;  %3320 = vmatpush.bf16.msrb.mxu3 %v5417_v60 }
  0x49   :  { %v5400_v63 = vld [vmem:[#allocation5 + $0x7a0] sm:$0xf]  ;;  %v6845_v0 = vld [vmem:[#allocation5 + $0x7ac] sm:$0xf0]  ;;  %v5273_v6 = vor.u32 %v6813_v62, %v5272_v61  ;;  %3282 = vmatpush.bf16.msrb.mxu0 %v5017_v1 }
  0x4a   :  { %v5000_v3 = vld [vmem:[#allocation5 + $0x480] sm:$0xf]  ;;  %v116_v4 = vld [vmem:[#allocation3 + $0x10] sm:$0xff]  ;;  %v5401_v12 = vor.u32 %v6845_v0, %v5400_v63  ;;  %3295 = vmatpush.bf16.msrb.mxu1 %v5145_v2 }
  0x4b   :  { %v114_v5 = vld [vmem:[#allocation3] sm:$0xff]  ;;  %v6745_v7 = vld [vmem:[#allocation5 + $0x48c] sm:$0xf0]  ;;  %v7385_v9 = vpack.c.bf16 %v116_v4, %v116_v4  ;;  %3308 = vmatpush.bf16.msrb.mxu2 %v5273_v6 }
  0x4c   :  { %v5128_v8 = vld [vmem:[#allocation5 + $0x580] sm:$0xf]  ;;  %v7387_v10 = vpack.c.bf16 %v114_v5, %v114_v5  ;;  %v6777_v13 = vld [vmem:[#allocation5 + $0x58c] sm:$0xf0]  ;;  %v5001_v19 = vor.u32 %v6745_v7, %v5000_v3  ;;  %3321 = vmatpush.bf16.msrb.mxu3 %v5401_v12 }
  0x4d   :  { %v5256_v14 = vld [vmem:[#allocation5 + $0x680] sm:$0xf]  ;;  %v6809_v15 = vld [vmem:[#allocation5 + $0x68c] sm:$0xf0]  ;;  %3262 = vmatmul.bf16.vlgmr.msra.gmra.mxu2 %v7385_v9  ;;  %v5129_v21 = vor.u32 %v6777_v13, %v5128_v8 }
  0x4e   :  { %v5384_v17 = vld [vmem:[#allocation5 + $0x780] sm:$0xf]  ;;  %v6841_v18 = vld [vmem:[#allocation5 + $0x78c] sm:$0xf0]  ;;  %3236 = vmatmul.bf16.vlgmr.msra.gmra.mxu0 %v7387_v10  ;;  %v5257_v22 = vor.u32 %v6809_v15, %v5256_v14 }
  0x4f   :  { %v4984_v23 = vld [vmem:[#allocation5 + $0x460] sm:$0xf]  ;;  %v6741_v24 = vld [vmem:[#allocation5 + $0x46c] sm:$0xf0]  ;;  %v5385_v27 = vor.u32 %v6841_v18, %v5384_v17  ;;  %3283 = vmatpush.bf16.msrb.mxu0 %v5001_v19  ;;  %3296 = vmatpush.bf16.msrb.mxu1 %v5129_v21 }
  0x50   :  { %v5112_v25 = vld [vmem:[#allocation5 + $0x560] sm:$0xf]  ;;  %v6773_v28 = vld [vmem:[#allocation5 + $0x56c] sm:$0xf0]  ;;  %v4985_v33 = vor.u32 %v6741_v24, %v4984_v23  ;;  %3309 = vmatpush.bf16.msrb.mxu2 %v5257_v22  ;;  %v121_v24 = vld [vmem:[#allocation3 + $0x38] sm:$0xff] }
  0x51   :  { %v5240_v29 = vld [vmem:[#allocation5 + $0x660] sm:$0xf]  ;;  %v6805_v30 = vld [vmem:[#allocation5 + $0x66c] sm:$0xf0]  ;;  %v5113_v34 = vor.u32 %v6773_v28, %v5112_v25  ;;  %3322 = vmatpush.bf16.msrb.mxu3 %v5385_v27 }
  0x52   :  { %v5368_v31 = vld [vmem:[#allocation5 + $0x760] sm:$0xf]  ;;  %v6837_v32 = vld [vmem:[#allocation5 + $0x76c] sm:$0xf0]  ;;  %v5241_v35 = vor.u32 %v6805_v30, %v5240_v29  ;;  %v119_v30 = vld [vmem:[#allocation3 + $0x28] sm:$0xff] }
  0x53   :  { %v4968_v36 = vld [vmem:[#allocation5 + $0x440] sm:$0xf]  ;;  %v6737_v37 = vld [vmem:[#allocation5 + $0x44c] sm:$0xf0]  ;;  %v5369_v39 = vor.u32 %v6837_v32, %v5368_v31  ;;  %3284 = vmatpush.bf16.msrb.mxu0 %v4985_v33  ;;  %3297 = vmatpush.bf16.msrb.mxu1 %v5113_v34 }
  0x54   :  { %v5096_v38 = vld [vmem:[#allocation5 + $0x540] sm:$0xf]  ;;  %v6769_v40 = vld [vmem:[#allocation5 + $0x54c] sm:$0xf0]  ;;  %v4969_v45 = vor.u32 %v6737_v37, %v4968_v36  ;;  %3310 = vmatpush.bf16.msrb.mxu2 %v5241_v35 }
  0x55   :  { %v5224_v41 = vld [vmem:[#allocation5 + $0x640] sm:$0xf]  ;;  %v6801_v42 = vld [vmem:[#allocation5 + $0x64c] sm:$0xf0]  ;;  %v5097_v46 = vor.u32 %v6769_v40, %v5096_v38  ;;  %3323 = vmatpush.bf16.msrb.mxu3 %v5369_v39  ;;  %v7401_v39 = vpack.c.bf16 %v121_v24, %v121_v24 }
  0x56   :  { %v5352_v43 = vld [vmem:[#allocation5 + $0x740] sm:$0xf]  ;;  %v6833_v44 = vld [vmem:[#allocation5 + $0x74c] sm:$0xf0]  ;;  %v5225_v47 = vor.u32 %v6801_v42, %v5224_v41  ;;  %v7403_v41 = vpack.c.bf16 %v119_v30, %v119_v30 }
  0x57   :  { %v4952_v48 = vld [vmem:[#allocation5 + $0x420] sm:$0xf]  ;;  %v6733_v49 = vld [vmem:[#allocation5 + $0x42c] sm:$0xf0]  ;;  %v5353_v51 = vor.u32 %v6833_v44, %v5352_v43  ;;  %3285 = vmatpush.bf16.msrb.mxu0 %v4969_v45  ;;  %3298 = vmatpush.bf16.msrb.mxu1 %v5097_v46 }
  0x58   :  { %v5080_v50 = vld [vmem:[#allocation5 + $0x520] sm:$0xf]  ;;  %v6765_v52 = vld [vmem:[#allocation5 + $0x52c] sm:$0xf0]  ;;  %v4953_v57 = vor.u32 %v6733_v49, %v4952_v48  ;;  %3311 = vmatpush.bf16.msrb.mxu2 %v5225_v47 }
  0x59   :  { %v5208_v53 = vld [vmem:[#allocation5 + $0x620] sm:$0xf]  ;;  %v6797_v54 = vld [vmem:[#allocation5 + $0x62c] sm:$0xf0]  ;;  %v5081_v60 = vor.u32 %v6765_v52, %v5080_v50  ;;  %3324 = vmatpush.bf16.msrb.mxu3 %v5353_v51 }
  0x5a   :  { %v5336_v55 = vld [vmem:[#allocation5 + $0x720] sm:$0xf]  ;;  %v6829_v56 = vld [vmem:[#allocation5 + $0x72c] sm:$0xf0]  ;;  %v5209_v61 = vor.u32 %v6797_v54, %v5208_v53 }
  0x5b   :  { %v4936_v58 = vld [vmem:[#allocation5 + $0x400] sm:$0xf]  ;;  %v6729_v59 = vld [vmem:[#allocation5 + $0x40c] sm:$0xf0]  ;;  %v5337_v1 = vor.u32 %v6829_v56, %v5336_v55  ;;  %3286 = vmatpush.bf16.msrb.mxu0 %v4953_v57  ;;  %3299 = vmatpush.bf16.msrb.mxu1 %v5081_v60 }
  0x5c   :  { %v5064_v62 = vld [vmem:[#allocation5 + $0x500] sm:$0xf]  ;;  %v6761_v63 = vld [vmem:[#allocation5 + $0x50c] sm:$0xf0]  ;;  %v4937_v8 = vor.u32 %v6729_v59, %v4936_v58  ;;  %3312 = vmatpush.bf16.msrb.mxu2 %v5209_v61 }
  0x5d   :  { %v5192_v0 = vld [vmem:[#allocation5 + $0x600] sm:$0xf]  ;;  %v6793_v2 = vld [vmem:[#allocation5 + $0x60c] sm:$0xf0]  ;;  %v5065_v14 = vor.u32 %v6761_v63, %v5064_v62  ;;  %3325 = vmatpush.bf16.msrb.mxu3 %v5337_v1 }
  0x5e   :  { %v5320_v3 = vld [vmem:[#allocation5 + $0x700] sm:$0xf]  ;;  %v6825_v4 = vld [vmem:[#allocation5 + $0x70c] sm:$0xf0]  ;;  %v5193_v15 = vor.u32 %v6793_v2, %v5192_v0 }
  0x5f   :  { %v5560_v5 = vld [vmem:[#allocation5 + $0x8e0] sm:$0xf]  ;;  %v6885_v6 = vld [vmem:[#allocation5 + $0x8ec] sm:$0xf0]  ;;  %v5321_v20 = vor.u32 %v6825_v4, %v5320_v3  ;;  %3287 = vmatpush.bf16.msrb.mxu0 %v4937_v8  ;;  %3300 = vmatpush.bf16.msrb.mxu1 %v5065_v14 }
  0x60   :  { %v5688_v7 = vld [vmem:[#allocation5 + $0x9e0] sm:$0xf]  ;;  %v6917_v11 = vld [vmem:[#allocation5 + $0x9ec] sm:$0xf0]  ;;  %v5561_v21 = vor.u32 %v6885_v6, %v5560_v5  ;;  %3313 = vmatpush.bf16.msrb.mxu2 %v5193_v15 }
  0x61   :  { %v5816_v12 = vld [vmem:[#allocation5 + $0xae0] sm:$0xf]  ;;  %v6949_v13 = vld [vmem:[#allocation5 + $0xaec] sm:$0xf0]  ;;  %v5689_v25 = vor.u32 %v6917_v11, %v5688_v7  ;;  %3326 = vmatpush.bf16.msrb.mxu3 %v5321_v20 }
  0x62   :  { %v5944_v17 = vld [vmem:[#allocation5 + $0xbe0] sm:$0xf]  ;;  %v6981_v18 = vld [vmem:[#allocation5 + $0xbec] sm:$0xf0]  ;;  %v5817_v27 = vor.u32 %v6949_v13, %v5816_v12  ;;  %3301 = vmatmul.bf16.vlgmr.msrb.gmra.mxu1 %v7403_v41 }
  0x63   :  { %v120_v19 = vld [vmem:[#allocation3 + $0x30] sm:$0xff]  ;;  %v5544_v22 = vld [vmem:[#allocation5 + $0x8c0] sm:$0xf]  ;;  %v5945_v31 = vor.u32 %v6981_v18, %v5944_v17  ;;  %3332 = vmatpush.bf16.msra.mxu0 %v5561_v21  ;;  %3345 = vmatpush.bf16.msra.mxu1 %v5689_v25 }
  0x64   :  { %v118_v23 = vld [vmem:[#allocation3 + $0x20] sm:$0xff]  ;;  %v6881_v28 = vld [vmem:[#allocation5 + $0x8cc] sm:$0xf0]  ;;  %v7397_v35 = vpack.c.bf16 %v120_v19, %v120_v19  ;;  %3358 = vmatpush.bf16.msra.mxu2 %v5817_v27  ;;  %3327 = vmatmul.bf16.vlgmr.msrb.gmra.mxu3 %v7401_v39 }
  0x65   :  { %v5672_v29 = vld [vmem:[#allocation5 + $0x9c0] sm:$0xf]  ;;  %v6913_v32 = vld [vmem:[#allocation5 + $0x9cc] sm:$0xf0]  ;;  %v7399_v38 = vpack.c.bf16 %v118_v23, %v118_v23  ;;  %v5545_v40 = vor.u32 %v6881_v28, %v5544_v22  ;;  %3371 = vmatpush.bf16.msra.mxu3 %v5945_v31 }
  0x66   :  { %v5800_v33 = vld [vmem:[#allocation5 + $0xac0] sm:$0xf]  ;;  %v6945_v34 = vld [vmem:[#allocation5 + $0xacc] sm:$0xf0]  ;;  %v5673_v42 = vor.u32 %v6913_v32, %v5672_v29  ;;  %3314 = vmatmul.bf16.vlgmr.msrb.gmra.mxu2 %v7397_v35 }
  0x67   :  { %v5928_v36 = vld [vmem:[#allocation5 + $0xbc0] sm:$0xf]  ;;  %v6977_v37 = vld [vmem:[#allocation5 + $0xbcc] sm:$0xf0]  ;;  %v5801_v43 = vor.u32 %v6945_v34, %v5800_v33  ;;  %3288 = vmatmul.bf16.vlgmr.msrb.gmra.mxu0 %v7399_v38 }
  0x68   :  { %v5528_v44 = vld [vmem:[#allocation5 + $0x8a0] sm:$0xf]  ;;  %v6877_v45 = vld [vmem:[#allocation5 + $0x8ac] sm:$0xf0]  ;;  %v5929_v47 = vor.u32 %v6977_v37, %v5928_v36  ;;  %3333 = vmatpush.bf16.msra.mxu0 %v5545_v40  ;;  %3346 = vmatpush.bf16.msra.mxu1 %v5673_v42 }
  0x69   :  { %v5656_v46 = vld [vmem:[#allocation5 + $0x9a0] sm:$0xf]  ;;  %v6909_v48 = vld [vmem:[#allocation5 + $0x9ac] sm:$0xf0]  ;;  %v5529_v53 = vor.u32 %v6877_v45, %v5528_v44  ;;  %3359 = vmatpush.bf16.msra.mxu2 %v5801_v43 }
  0x6a   :  { %v5784_v49 = vld [vmem:[#allocation5 + $0xaa0] sm:$0xf]  ;;  %v6941_v50 = vld [vmem:[#allocation5 + $0xaac] sm:$0xf0]  ;;  %v5657_v54 = vor.u32 %v6909_v48, %v5656_v46  ;;  %3372 = vmatpush.bf16.msra.mxu3 %v5929_v47 }
  0x6b   :  { %v5912_v51 = vld [vmem:[#allocation5 + $0xba0] sm:$0xf]  ;;  %v6973_v52 = vld [vmem:[#allocation5 + $0xbac] sm:$0xf0]  ;;  %v5785_v55 = vor.u32 %v6941_v50, %v5784_v49 }
  0x6c   :  { %v5512_v56 = vld [vmem:[#allocation5 + $0x880] sm:$0xf]  ;;  %v6873_v57 = vld [vmem:[#allocation5 + $0x88c] sm:$0xf0]  ;;  %v5913_v59 = vor.u32 %v6973_v52, %v5912_v51  ;;  %3334 = vmatpush.bf16.msra.mxu0 %v5529_v53  ;;  %3347 = vmatpush.bf16.msra.mxu1 %v5657_v54 }
  0x6d   :  { %v5640_v58 = vld [vmem:[#allocation5 + $0x980] sm:$0xf]  ;;  %v6905_v60 = vld [vmem:[#allocation5 + $0x98c] sm:$0xf0]  ;;  %v5513_v1 = vor.u32 %v6873_v57, %v5512_v56  ;;  %3360 = vmatpush.bf16.msra.mxu2 %v5785_v55 }
  0x6e   :  { %v5768_v61 = vld [vmem:[#allocation5 + $0xa80] sm:$0xf]  ;;  %v6937_v62 = vld [vmem:[#allocation5 + $0xa8c] sm:$0xf0]  ;;  %v5641_v2 = vor.u32 %v6905_v60, %v5640_v58  ;;  %3373 = vmatpush.bf16.msra.mxu3 %v5913_v59 }
  0x6f   :  { %v5896_v63 = vld [vmem:[#allocation5 + $0xb80] sm:$0xf]  ;;  %v6969_v0 = vld [vmem:[#allocation5 + $0xb8c] sm:$0xf0]  ;;  %v5769_v3 = vor.u32 %v6937_v62, %v5768_v61 }
  0x70   :  { %v5496_v4 = vld [vmem:[#allocation5 + $0x860] sm:$0xf]  ;;  %v6869_v5 = vld [vmem:[#allocation5 + $0x86c] sm:$0xf0]  ;;  %v5897_v7 = vor.u32 %v6969_v0, %v5896_v63  ;;  %3335 = vmatpush.bf16.msra.mxu0 %v5513_v1  ;;  %3348 = vmatpush.bf16.msra.mxu1 %v5641_v2 }
  0x71   :  { %v5624_v6 = vld [vmem:[#allocation5 + $0x960] sm:$0xf]  ;;  %v6901_v8 = vld [vmem:[#allocation5 + $0x96c] sm:$0xf0]  ;;  %v5497_v15 = vor.u32 %v6869_v5, %v5496_v4  ;;  %3361 = vmatpush.bf16.msra.mxu2 %v5769_v3 }
  0x72   :  { %v5752_v11 = vld [vmem:[#allocation5 + $0xa60] sm:$0xf]  ;;  %v6933_v12 = vld [vmem:[#allocation5 + $0xa6c] sm:$0xf0]  ;;  %v5625_v17 = vor.u32 %v6901_v8, %v5624_v6  ;;  %3374 = vmatpush.bf16.msra.mxu3 %v5897_v7  ;;  %v123_v8 = vld [vmem:[#allocation3 + $0x48] sm:$0xff] }
  0x73   :  { %v5880_v13 = vld [vmem:[#allocation5 + $0xb60] sm:$0xf]  ;;  %v6965_v14 = vld [vmem:[#allocation5 + $0xb6c] sm:$0xf0]  ;;  %v5753_v18 = vor.u32 %v6933_v12, %v5752_v11  ;;  %v125_v11 = vld [vmem:[#allocation3 + $0x58] sm:$0xff] }
  0x74   :  { %v5480_v19 = vld [vmem:[#allocation5 + $0x840] sm:$0xf]  ;;  %v6865_v20 = vld [vmem:[#allocation5 + $0x84c] sm:$0xf0]  ;;  %v5881_v22 = vor.u32 %v6965_v14, %v5880_v13  ;;  %3336 = vmatpush.bf16.msra.mxu0 %v5497_v15  ;;  %3349 = vmatpush.bf16.msra.mxu1 %v5625_v17 }
  0x75   :  { %v5608_v21 = vld [vmem:[#allocation5 + $0x940] sm:$0xf]  ;;  %v6897_v23 = vld [vmem:[#allocation5 + $0x94c] sm:$0xf0]  ;;  %v5481_v29 = vor.u32 %v6865_v20, %v5480_v19  ;;  %3362 = vmatpush.bf16.msra.mxu2 %v5753_v18 }
  0x76   :  { %v5736_v24 = vld [vmem:[#allocation5 + $0xa40] sm:$0xf]  ;;  %v6929_v25 = vld [vmem:[#allocation5 + $0xa4c] sm:$0xf0]  ;;  %v5609_v30 = vor.u32 %v6897_v23, %v5608_v21  ;;  %3375 = vmatpush.bf16.msra.mxu3 %v5881_v22 }
  0x77   :  { %v5864_v27 = vld [vmem:[#allocation5 + $0xb40] sm:$0xf]  ;;  %v6961_v28 = vld [vmem:[#allocation5 + $0xb4c] sm:$0xf0]  ;;  %v5737_v31 = vor.u32 %v6929_v25, %v5736_v24  ;;  %v7413_v24 = vpack.c.bf16 %v123_v8, %v123_v8 }
  0x78   :  { %v5464_v32 = vld [vmem:[#allocation5 + $0x820] sm:$0xf]  ;;  %v6861_v33 = vld [vmem:[#allocation5 + $0x82c] sm:$0xf0]  ;;  %v5865_v36 = vor.u32 %v6961_v28, %v5864_v27  ;;  %3337 = vmatpush.bf16.msra.mxu0 %v5481_v29  ;;  %3350 = vmatpush.bf16.msra.mxu1 %v5609_v30  ;;  %v7415_v28 = vpack.c.bf16 %v125_v11, %v125_v11 }
  0x79   :  { %v5592_v34 = vld [vmem:[#allocation5 + $0x920] sm:$0xf]  ;;  %v6893_v37 = vld [vmem:[#allocation5 + $0x92c] sm:$0xf0]  ;;  %v5465_v46 = vor.u32 %v6861_v33, %v5464_v32  ;;  %3363 = vmatpush.bf16.msra.mxu2 %v5737_v31 }
  0x7a   :  { %v5720_v40 = vld [vmem:[#allocation5 + $0xa20] sm:$0xf]  ;;  %v6925_v42 = vld [vmem:[#allocation5 + $0xa2c] sm:$0xf0]  ;;  %v5593_v50 = vor.u32 %v6893_v37, %v5592_v34  ;;  %3376 = vmatpush.bf16.msra.mxu3 %v5865_v36 }
  0x7b   :  { %v5848_v43 = vld [vmem:[#allocation5 + $0xb20] sm:$0xf]  ;;  %v6957_v44 = vld [vmem:[#allocation5 + $0xb2c] sm:$0xf0]  ;;  %v5721_v51 = vor.u32 %v6925_v42, %v5720_v40 }
  0x7c   :  { %v5448_v45 = vld [vmem:[#allocation5 + $0x800] sm:$0xf]  ;;  %v6857_v47 = vld [vmem:[#allocation5 + $0x80c] sm:$0xf0]  ;;  %v5849_v55 = vor.u32 %v6957_v44, %v5848_v43  ;;  %3338 = vmatpush.bf16.msra.mxu0 %v5465_v46  ;;  %3351 = vmatpush.bf16.msra.mxu1 %v5593_v50 }
  0x7d   :  { %v5576_v48 = vld [vmem:[#allocation5 + $0x900] sm:$0xf]  ;;  %v6889_v49 = vld [vmem:[#allocation5 + $0x90c] sm:$0xf0]  ;;  %v5449_v61 = vor.u32 %v6857_v47, %v5448_v45  ;;  %3364 = vmatpush.bf16.msra.mxu2 %v5721_v51 }
  0x7e   :  { %v5704_v52 = vld [vmem:[#allocation5 + $0xa00] sm:$0xf]  ;;  %v6921_v53 = vld [vmem:[#allocation5 + $0xa0c] sm:$0xf0]  ;;  %v5577_v0 = vor.u32 %v6889_v49, %v5576_v48  ;;  %3377 = vmatpush.bf16.msra.mxu3 %v5849_v55 }
  0x7f   :  { %v5832_v54 = vld [vmem:[#allocation5 + $0xb00] sm:$0xf]  ;;  %v6953_v56 = vld [vmem:[#allocation5 + $0xb0c] sm:$0xf0]  ;;  %v5705_v1 = vor.u32 %v6921_v53, %v5704_v52 }
  0x80   :  { %v6072_v57 = vld [vmem:[#allocation5 + $0xce0] sm:$0xf]  ;;  %v7013_v58 = vld [vmem:[#allocation5 + $0xcec] sm:$0xf0]  ;;  %v5833_v5 = vor.u32 %v6953_v56, %v5832_v54  ;;  %3339 = vmatpush.bf16.msra.mxu0 %v5449_v61  ;;  %3352 = vmatpush.bf16.msra.mxu1 %v5577_v0 }
  0x81   :  { %v6200_v59 = vld [vmem:[#allocation5 + $0xde0] sm:$0xf]  ;;  %v7045_v60 = vld [vmem:[#allocation5 + $0xdec] sm:$0xf0]  ;;  %v6073_v6 = vor.u32 %v7013_v58, %v6072_v57  ;;  %3365 = vmatpush.bf16.msra.mxu2 %v5705_v1 }
  0x82   :  { %v6328_v62 = vld [vmem:[#allocation5 + $0xee0] sm:$0xf]  ;;  %v7077_v63 = vld [vmem:[#allocation5 + $0xeec] sm:$0xf0]  ;;  %v6201_v12 = vor.u32 %v7045_v60, %v6200_v59  ;;  %3378 = vmatpush.bf16.msra.mxu3 %v5833_v5 }
  0x83   :  { %v6456_v2 = vld [vmem:[#allocation5 + $0xfe0] sm:$0xf]  ;;  %v7109_v3 = vld [vmem:[#allocation5 + $0xfec] sm:$0xf0]  ;;  %v6329_v13 = vor.u32 %v7077_v63, %v6328_v62  ;;  %3353 = vmatmul.bf16.vlgmr.msra.gmra.mxu1 %v7413_v24 }
  0x84   :  { %v122_v4 = vld [vmem:[#allocation3 + $0x40] sm:$0xff]  ;;  %v124_v7 = vld [vmem:[#allocation3 + $0x50] sm:$0xff]  ;;  %v6457_v18 = vor.u32 %v7109_v3, %v6456_v2  ;;  %3384 = vmatpush.bf16.msrb.mxu0 %v6073_v6  ;;  %3397 = vmatpush.bf16.msrb.mxu1 %v6201_v12 }
  0x85   :  { %v6056_v14 = vld [vmem:[#allocation5 + $0xcc0] sm:$0xf]  ;;  %v7009_v15 = vld [vmem:[#allocation5 + $0xccc] sm:$0xf0]  ;;  %v7409_v19 = vpack.c.bf16 %v122_v4, %v122_v4  ;;  %v7411_v23 = vpack.c.bf16 %v124_v7, %v124_v7  ;;  %3410 = vmatpush.bf16.msrb.mxu2 %v6329_v13  ;;  %3379 = vmatmul.bf16.vlgmr.msra.gmra.mxu3 %v7415_v28 }
  0x86   :  { %v6184_v17 = vld [vmem:[#allocation5 + $0xdc0] sm:$0xf]  ;;  %v7041_v20 = vld [vmem:[#allocation5 + $0xdcc] sm:$0xf0]  ;;  %v6057_v29 = vor.u32 %v7009_v15, %v6056_v14  ;;  %3423 = vmatpush.bf16.msrb.mxu3 %v6457_v18 }
  0x87   :  { %v6312_v21 = vld [vmem:[#allocation5 + $0xec0] sm:$0xf]  ;;  %v7073_v22 = vld [vmem:[#allocation5 + $0xecc] sm:$0xf0]  ;;  %v6185_v30 = vor.u32 %v7041_v20, %v6184_v17  ;;  %3340 = vmatmul.bf16.vlgmr.msra.gmra.mxu0 %v7409_v19  ;;  %3366 = vmatmul.bf16.vlgmr.msra.gmra.mxu2 %v7411_v23 }
  0x88   :  { %v6440_v25 = vld [vmem:[#allocation5 + $0xfc0] sm:$0xf]  ;;  %v7105_v27 = vld [vmem:[#allocation5 + $0xfcc] sm:$0xf0]  ;;  %v6313_v31 = vor.u32 %v7073_v22, %v6312_v21  ;;  %3385 = vmatpush.bf16.msrb.mxu0 %v6057_v29 }
  0x89   :  { %v6040_v32 = vld [vmem:[#allocation5 + $0xca0] sm:$0xf]  ;;  %v7005_v33 = vld [vmem:[#allocation5 + $0xcac] sm:$0xf0]  ;;  %v6441_v36 = vor.u32 %v7105_v27, %v6440_v25  ;;  %3398 = vmatpush.bf16.msrb.mxu1 %v6185_v30 }
  0x8a   :  { %v6168_v34 = vld [vmem:[#allocation5 + $0xda0] sm:$0xf]  ;;  %v7037_v37 = vld [vmem:[#allocation5 + $0xdac] sm:$0xf0]  ;;  %v6041_v45 = vor.u32 %v7005_v33, %v6040_v32  ;;  %3411 = vmatpush.bf16.msrb.mxu2 %v6313_v31 }
  0x8b   :  { %v6296_v40 = vld [vmem:[#allocation5 + $0xea0] sm:$0xf]  ;;  %v7069_v42 = vld [vmem:[#allocation5 + $0xeac] sm:$0xf0]  ;;  %v6169_v46 = vor.u32 %v7037_v37, %v6168_v34  ;;  %3424 = vmatpush.bf16.msrb.mxu3 %v6441_v36 }
  0x8c   :  { %v6424_v43 = vld [vmem:[#allocation5 + $0xfa0] sm:$0xf]  ;;  %v7101_v44 = vld [vmem:[#allocation5 + $0xfac] sm:$0xf0]  ;;  %v6297_v47 = vor.u32 %v7069_v42, %v6296_v40  ;;  %3386 = vmatpush.bf16.msrb.mxu0 %v6041_v45 }
  0x8d   :  { %v6024_v48 = vld [vmem:[#allocation5 + $0xc80] sm:$0xf]  ;;  %v7001_v49 = vld [vmem:[#allocation5 + $0xc8c] sm:$0xf0]  ;;  %v6425_v51 = vor.u32 %v7101_v44, %v6424_v43  ;;  %3399 = vmatpush.bf16.msrb.mxu1 %v6169_v46 }
  0x8e   :  { %v6152_v50 = vld [vmem:[#allocation5 + $0xd80] sm:$0xf]  ;;  %v7033_v52 = vld [vmem:[#allocation5 + $0xd8c] sm:$0xf0]  ;;  %v6025_v57 = vor.u32 %v7001_v49, %v6024_v48  ;;  %3412 = vmatpush.bf16.msrb.mxu2 %v6297_v47 }
  0x8f   :  { %v6280_v53 = vld [vmem:[#allocation5 + $0xe80] sm:$0xf]  ;;  %v7065_v54 = vld [vmem:[#allocation5 + $0xe8c] sm:$0xf0]  ;;  %v6153_v58 = vor.u32 %v7033_v52, %v6152_v50  ;;  %3425 = vmatpush.bf16.msrb.mxu3 %v6425_v51 }
  0x90   :  { %v6408_v55 = vld [vmem:[#allocation5 + $0xf80] sm:$0xf]  ;;  %v7097_v56 = vld [vmem:[#allocation5 + $0xf8c] sm:$0xf0]  ;;  %v6281_v59 = vor.u32 %v7065_v54, %v6280_v53  ;;  %3387 = vmatpush.bf16.msrb.mxu0 %v6025_v57  ;;  %v6627_v53 = vld [vmem:[#allocation5 + $0xe4] sm:$0xf] }
  0x91   :  { %v6008_v60 = vld [vmem:[#allocation5 + $0xc60] sm:$0xf]  ;;  %v6997_v61 = vld [vmem:[#allocation5 + $0xc6c] sm:$0xf0]  ;;  %v6409_v63 = vor.u32 %v7097_v56, %v6408_v55  ;;  %3400 = vmatpush.bf16.msrb.mxu1 %v6153_v58  ;;  %v4538_v54 = vld [vmem:[#allocation5 + $0xf0] sm:$0xf0] }
  0x92   :  { %v6136_v62 = vld [vmem:[#allocation5 + $0xd60] sm:$0xf]  ;;  %v7029_v0 = vld [vmem:[#allocation5 + $0xd6c] sm:$0xf0]  ;;  %v6009_v5 = vor.u32 %v6997_v61, %v6008_v60  ;;  %3413 = vmatpush.bf16.msrb.mxu2 %v6281_v59  ;;  %v6659_v55 = vld [vmem:[#allocation5 + $0x1e4] sm:$0xf] }
  0x93   :  { %v6264_v1 = vld [vmem:[#allocation5 + $0xe60] sm:$0xf]  ;;  %v7061_v2 = vld [vmem:[#allocation5 + $0xe6c] sm:$0xf0]  ;;  %v6137_v6 = vor.u32 %v7029_v0, %v6136_v62  ;;  %3426 = vmatpush.bf16.msrb.mxu3 %v6409_v63  ;;  %v4666_v57 = vld [vmem:[#allocation5 + $0x1f0] sm:$0xf0] }
  0x94   :  { %v6392_v3 = vld [vmem:[#allocation5 + $0xf60] sm:$0xf]  ;;  %v7093_v4 = vld [vmem:[#allocation5 + $0xf6c] sm:$0xf0]  ;;  %v6265_v7 = vor.u32 %v7061_v2, %v6264_v1  ;;  %3388 = vmatpush.bf16.msrb.mxu0 %v6009_v5  ;;  %v6691_v58 = vld [vmem:[#allocation5 + $0x2e4] sm:$0xf]  ;;  %v4541_v2 = vor.u32 %v6627_v53, %v4538_v54 }
  0x95   :  { %v5992_v8 = vld [vmem:[#allocation5 + $0xc40] sm:$0xf]  ;;  %v6993_v11 = vld [vmem:[#allocation5 + $0xc4c] sm:$0xf0]  ;;  %v6393_v13 = vor.u32 %v7093_v4, %v6392_v3  ;;  %3401 = vmatpush.bf16.msrb.mxu1 %v6137_v6  ;;  %v4794_v59 = vld [vmem:[#allocation5 + $0x2f0] sm:$0xf0]  ;;  %v4669_v6 = vor.u32 %v6659_v55, %v4666_v57 }
  0x96   :  { %v6120_v12 = vld [vmem:[#allocation5 + $0xd40] sm:$0xf]  ;;  %v7025_v14 = vld [vmem:[#allocation5 + $0xd4c] sm:$0xf0]  ;;  %v5993_v21 = vor.u32 %v6993_v11, %v5992_v8  ;;  %3414 = vmatpush.bf16.msrb.mxu2 %v6265_v7  ;;  %v6723_v62 = vld [vmem:[#allocation5 + $0x3e4] sm:$0xf]  ;;  %v4797_v7 = vor.u32 %v6691_v58, %v4794_v59 }
  0x97   :  { %v6248_v15 = vld [vmem:[#allocation5 + $0xe40] sm:$0xf]  ;;  %v7057_v17 = vld [vmem:[#allocation5 + $0xe4c] sm:$0xf0]  ;;  %v6121_v22 = vor.u32 %v7025_v14, %v6120_v12  ;;  %3427 = vmatpush.bf16.msrb.mxu3 %v6393_v13  ;;  %v4922_v63 = vld [vmem:[#allocation5 + $0x3f0] sm:$0xf0] }
  0x98   :  { %v6376_v18 = vld [vmem:[#allocation5 + $0xf40] sm:$0xf]  ;;  %v7089_v20 = vld [vmem:[#allocation5 + $0xf4c] sm:$0xf0]  ;;  %v6249_v25 = vor.u32 %v7057_v17, %v6248_v15  ;;  %3389 = vmatpush.bf16.msrb.mxu0 %v5993_v21  ;;  %v127_v4 = vld [vmem:[#allocation3 + $0x68] sm:$0xff]  ;;  %v4925_v13 = vor.u32 %v6723_v62, %v4922_v63 }
  0x99   :  { %v5976_v27 = vld [vmem:[#allocation5 + $0xc20] sm:$0xf]  ;;  %v6989_v29 = vld [vmem:[#allocation5 + $0xc2c] sm:$0xf0]  ;;  %v6377_v31 = vor.u32 %v7089_v20, %v6376_v18  ;;  %3402 = vmatpush.bf16.msrb.mxu1 %v6121_v22  ;;  %v129_v5 = vld [vmem:[#allocation3 + $0x78] sm:$0xff]  ;;  %v7425_v21 = vpack.c.bf16 %v127_v4, %v127_v4 }
  0x9a   :  { %v6104_v30 = vld [vmem:[#allocation5 + $0xd20] sm:$0xf]  ;;  %v7021_v32 = vld [vmem:[#allocation5 + $0xd2c] sm:$0xf0]  ;;  %v5977_v40 = vor.u32 %v6989_v29, %v5976_v27  ;;  %3415 = vmatpush.bf16.msrb.mxu2 %v6249_v25  ;;  %v6623_v8 = vld [vmem:[#allocation5 + $0xc4] sm:$0xf]  ;;  %v7427_v27 = vpack.c.bf16 %v129_v5, %v129_v5 }
  0x9b   :  { %v6232_v33 = vld [vmem:[#allocation5 + $0xe20] sm:$0xf]  ;;  %v7053_v34 = vld [vmem:[#allocation5 + $0xe2c] sm:$0xf0]  ;;  %v6105_v44 = vor.u32 %v7021_v32, %v6104_v30  ;;  %3428 = vmatpush.bf16.msrb.mxu3 %v6377_v31  ;;  %v4522_v11 = vld [vmem:[#allocation5 + $0xd0] sm:$0xf0] }
  0x9c   :  { %v6360_v36 = vld [vmem:[#allocation5 + $0xf20] sm:$0xf]  ;;  %v7085_v37 = vld [vmem:[#allocation5 + $0xf2c] sm:$0xf0]  ;;  %v6233_v45 = vor.u32 %v7053_v34, %v6232_v33  ;;  %3390 = vmatpush.bf16.msrb.mxu0 %v5977_v40  ;;  %v6655_v12 = vld [vmem:[#allocation5 + $0x1c4] sm:$0xf]  ;;  %v4525_v29 = vor.u32 %v6623_v8, %v4522_v11 }
  0x9d   :  { %v5960_v42 = vld [vmem:[#allocation5 + $0xc00] sm:$0xf]  ;;  %v6985_v43 = vld [vmem:[#allocation5 + $0xc0c] sm:$0xf0]  ;;  %v6361_v49 = vor.u32 %v7085_v37, %v6360_v36  ;;  %3403 = vmatpush.bf16.msrb.mxu1 %v6105_v44  ;;  %v4650_v15 = vld [vmem:[#allocation5 + $0x1d0] sm:$0xf0] }
  0x9e   :  { %v6088_v46 = vld [vmem:[#allocation5 + $0xd00] sm:$0xf]  ;;  %v7017_v47 = vld [vmem:[#allocation5 + $0xd0c] sm:$0xf0]  ;;  %v5961_v56 = vor.u32 %v6985_v43, %v5960_v42  ;;  %3416 = vmatpush.bf16.msrb.mxu2 %v6233_v45  ;;  %v6687_v17 = vld [vmem:[#allocation5 + $0x2c4] sm:$0xf]  ;;  %v4653_v30 = vor.u32 %v6655_v12, %v4650_v15 }
  0x9f   :  { %v6216_v48 = vld [vmem:[#allocation5 + $0xe00] sm:$0xf]  ;;  %v7049_v50 = vld [vmem:[#allocation5 + $0xe0c] sm:$0xf0]  ;;  %v6089_v60 = vor.u32 %v7017_v47, %v6088_v46  ;;  %3429 = vmatpush.bf16.msrb.mxu3 %v6361_v49  ;;  %v4778_v18 = vld [vmem:[#allocation5 + $0x2d0] sm:$0xf0] }
  0xa0   :  { %v6344_v51 = vld [vmem:[#allocation5 + $0xf00] sm:$0xf]  ;;  %v7081_v52 = vld [vmem:[#allocation5 + $0xf0c] sm:$0xf0]  ;;  %v6217_v61 = vor.u32 %v7049_v50, %v6216_v48  ;;  %3391 = vmatpush.bf16.msrb.mxu0 %v5961_v56  ;;  %v6719_v22 = vld [vmem:[#allocation5 + $0x3c4] sm:$0xf]  ;;  %v4781_v31 = vor.u32 %v6687_v17, %v4778_v18 }
  0xa1   :  { %v126_v0 = vld [vmem:[#allocation3 + $0x60] sm:$0xff]  ;;  %v6345_v1 = vor.u32 %v7081_v52, %v6344_v51  ;;  %v128_v3 = vld [vmem:[#allocation3 + $0x70] sm:$0xff]  ;;  %3404 = vmatpush.bf16.msrb.mxu1 %v6089_v60 }
  0xa2   :  { %v7421_v14 = vpack.c.bf16 %v126_v0, %v126_v0  ;;  %3417 = vmatpush.bf16.msrb.mxu2 %v6217_v61  ;;  %v7423_v20 = vpack.c.bf16 %v128_v3, %v128_v3  ;;  %v4906_v25 = vld [vmem:[#allocation5 + $0x3d0] sm:$0xf0]  ;;  %v6619_v32 = vld [vmem:[#allocation5 + $0xa4] sm:$0xf] }
  0xa3   :  { %3430 = vmatpush.bf16.msrb.mxu3 %v6345_v1  ;;  %v4506_v33 = vld [vmem:[#allocation5 + $0xb0] sm:$0xf0]  ;;  %v6651_v34 = vld [vmem:[#allocation5 + $0x1a4] sm:$0xf]  ;;  %v4909_v36 = vor.u32 %v6719_v22, %v4906_v25 }
  0xa4   :  { %3436 = vmatpush.bf16.msra.mxu0 %v4541_v2  ;;  %v4634_v37 = vld [vmem:[#allocation5 + $0x1b0] sm:$0xf0]  ;;  %v6683_v40 = vld [vmem:[#allocation5 + $0x2a4] sm:$0xf]  ;;  %3405 = vmatmul.bf16.vlgmr.msrb.gmra.mxu1 %v7425_v21  ;;  %v4509_v45 = vor.u32 %v6619_v32, %v4506_v33 }
  0xa5   :  { %3449 = vmatpush.bf16.msra.mxu1 %v4669_v6  ;;  %3392 = vmatmul.bf16.vlgmr.msrb.gmra.mxu0 %v7421_v14  ;;  %v4762_v42 = vld [vmem:[#allocation5 + $0x2b0] sm:$0xf0]  ;;  %v6715_v43 = vld [vmem:[#allocation5 + $0x3a4] sm:$0xf]  ;;  %v4637_v46 = vor.u32 %v6651_v34, %v4634_v37 }
  0xa6   :  { %3462 = vmatpush.bf16.msra.mxu2 %v4797_v7  ;;  %v4890_v44 = vld [vmem:[#allocation5 + $0x3b0] sm:$0xf0]  ;;  %3431 = vmatmul.bf16.vlgmr.msrb.gmra.mxu3 %v7427_v27  ;;  %v4765_v47 = vor.u32 %v6683_v40, %v4762_v42  ;;  %v6615_v48 = vld [vmem:[#allocation5 + $0x84] sm:$0xf] }
  0xa7   :  { %3475 = vmatpush.bf16.msra.mxu3 %v4925_v13  ;;  %3418 = vmatmul.bf16.vlgmr.msrb.gmra.mxu2 %v7423_v20  ;;  %v4490_v49 = vld [vmem:[#allocation5 + $0x90] sm:$0xf0]  ;;  %v6647_v50 = vld [vmem:[#allocation5 + $0x184] sm:$0xf]  ;;  %v4893_v51 = vor.u32 %v6715_v43, %v4890_v44 }
  0xa8   :  { %3437 = vmatpush.bf16.msra.mxu0 %v4525_v29  ;;  %v4618_v52 = vld [vmem:[#allocation5 + $0x190] sm:$0xf0]  ;;  %v6679_v53 = vld [vmem:[#allocation5 + $0x284] sm:$0xf]  ;;  %v4493_v57 = vor.u32 %v6615_v48, %v4490_v49 }
  0xa9   :  { %3450 = vmatpush.bf16.msra.mxu1 %v4653_v30  ;;  %v4746_v54 = vld [vmem:[#allocation5 + $0x290] sm:$0xf0]  ;;  %v6711_v55 = vld [vmem:[#allocation5 + $0x384] sm:$0xf]  ;;  %v4621_v58 = vor.u32 %v6647_v50, %v4618_v52 }
  0xaa   :  { %3463 = vmatpush.bf16.msra.mxu2 %v4781_v31  ;;  %v4874_v56 = vld [vmem:[#allocation5 + $0x390] sm:$0xf0]  ;;  %v4749_v59 = vor.u32 %v6679_v53, %v4746_v54  ;;  %v6611_v60 = vld [vmem:[#allocation5 + $0x64] sm:$0xf] }
  0xab   :  { %3476 = vmatpush.bf16.msra.mxu3 %v4909_v36  ;;  %v4474_v61 = vld [vmem:[#allocation5 + $0x70] sm:$0xf0]  ;;  %v6643_v62 = vld [vmem:[#allocation5 + $0x164] sm:$0xf]  ;;  %v4877_v63 = vor.u32 %v6711_v55, %v4874_v56 }
  0xac   :  { %3438 = vmatpush.bf16.msra.mxu0 %v4509_v45  ;;  %v4602_v0 = vld [vmem:[#allocation5 + $0x170] sm:$0xf0]  ;;  %v6675_v1 = vld [vmem:[#allocation5 + $0x264] sm:$0xf]  ;;  %v4477_v5 = vor.u32 %v6611_v60, %v4474_v61 }
  0xad   :  { %3451 = vmatpush.bf16.msra.mxu1 %v4637_v46  ;;  %v4730_v2 = vld [vmem:[#allocation5 + $0x270] sm:$0xf0]  ;;  %v6707_v3 = vld [vmem:[#allocation5 + $0x364] sm:$0xf]  ;;  %v4605_v6 = vor.u32 %v6643_v62, %v4602_v0 }
  0xae   :  { %3464 = vmatpush.bf16.msra.mxu2 %v4765_v47  ;;  %v4858_v4 = vld [vmem:[#allocation5 + $0x370] sm:$0xf0]  ;;  %v4733_v7 = vor.u32 %v6675_v1, %v4730_v2  ;;  %v6607_v8 = vld [vmem:[#allocation5 + $0x44] sm:$0xf] }
  0xaf   :  { %3477 = vmatpush.bf16.msra.mxu3 %v4893_v51  ;;  %v4458_v11 = vld [vmem:[#allocation5 + $0x50] sm:$0xf0]  ;;  %v6639_v12 = vld [vmem:[#allocation5 + $0x144] sm:$0xf]  ;;  %v4861_v13 = vor.u32 %v6707_v3, %v4858_v4 }
  0xb0   :  { %3439 = vmatpush.bf16.msra.mxu0 %v4493_v57  ;;  %v4586_v15 = vld [vmem:[#allocation5 + $0x150] sm:$0xf0]  ;;  %v6671_v17 = vld [vmem:[#allocation5 + $0x244] sm:$0xf]  ;;  %v4461_v29 = vor.u32 %v6607_v8, %v4458_v11 }
  0xb1   :  { %3452 = vmatpush.bf16.msra.mxu1 %v4621_v58  ;;  %v4714_v18 = vld [vmem:[#allocation5 + $0x250] sm:$0xf0]  ;;  %v6703_v22 = vld [vmem:[#allocation5 + $0x344] sm:$0xf]  ;;  %v4589_v30 = vor.u32 %v6639_v12, %v4586_v15 }
  0xb2   :  { %3465 = vmatpush.bf16.msra.mxu2 %v4749_v59  ;;  %v4842_v25 = vld [vmem:[#allocation5 + $0x350] sm:$0xf0]  ;;  %v4717_v31 = vor.u32 %v6671_v17, %v4714_v18  ;;  %v6603_v32 = vld [vmem:[#allocation5 + $0x24] sm:$0xf] }
  0xb3   :  { %3478 = vmatpush.bf16.msra.mxu3 %v4877_v63  ;;  %v4442_v33 = vld [vmem:[#allocation5 + $0x30] sm:$0xf0]  ;;  %v6635_v34 = vld [vmem:[#allocation5 + $0x124] sm:$0xf]  ;;  %v4845_v36 = vor.u32 %v6703_v22, %v4842_v25 }
  0xb4   :  { %3440 = vmatpush.bf16.msra.mxu0 %v4477_v5  ;;  %v4570_v37 = vld [vmem:[#allocation5 + $0x130] sm:$0xf0]  ;;  %v6667_v40 = vld [vmem:[#allocation5 + $0x224] sm:$0xf]  ;;  %v4445_v45 = vor.u32 %v6603_v32, %v4442_v33 }
  0xb5   :  { %3453 = vmatpush.bf16.msra.mxu1 %v4605_v6  ;;  %v4698_v42 = vld [vmem:[#allocation5 + $0x230] sm:$0xf0]  ;;  %v6699_v43 = vld [vmem:[#allocation5 + $0x324] sm:$0xf]  ;;  %v4573_v48 = vor.u32 %v6635_v34, %v4570_v37 }
  0xb6   :  { %3466 = vmatpush.bf16.msra.mxu2 %v4733_v7  ;;  %v4826_v44 = vld [vmem:[#allocation5 + $0x330] sm:$0xf0]  ;;  %v6599_v46 = vld [vmem:[#allocation5 + $0x4] sm:$0xf]  ;;  %v4701_v49 = vor.u32 %v6667_v40, %v4698_v42 }
  0xb7   :  { %3479 = vmatpush.bf16.msra.mxu3 %v4861_v13  ;;  %v4426_v47 = vld [vmem:[#allocation5 + $0x10] sm:$0xf0]  ;;  %v6631_v50 = vld [vmem:[#allocation5 + $0x104] sm:$0xf]  ;;  %v4829_v53 = vor.u32 %v6699_v43, %v4826_v44 }
  0xb8   :  { %3441 = vmatpush.bf16.msra.mxu0 %v4461_v29  ;;  %v4554_v51 = vld [vmem:[#allocation5 + $0x110] sm:$0xf0]  ;;  %v6663_v52 = vld [vmem:[#allocation5 + $0x204] sm:$0xf]  ;;  %v4429_v60 = vor.u32 %v6599_v46, %v4426_v47 }
  0xb9   :  { %3454 = vmatpush.bf16.msra.mxu1 %v4589_v30  ;;  %v4682_v54 = vld [vmem:[#allocation5 + $0x210] sm:$0xf0]  ;;  %v6695_v55 = vld [vmem:[#allocation5 + $0x304] sm:$0xf]  ;;  %v4557_v0 = vor.u32 %v6631_v50, %v4554_v51 }
  0xba   :  { %3467 = vmatpush.bf16.msra.mxu2 %v4717_v31  ;;  %v4810_v56 = vld [vmem:[#allocation5 + $0x310] sm:$0xf0]  ;;  %v6755_v57 = vld [vmem:[#allocation5 + $0x4e4] sm:$0xf]  ;;  %v4685_v1 = vor.u32 %v6663_v52, %v4682_v54 }
  0xbb   :  { %3480 = vmatpush.bf16.msra.mxu3 %v4845_v36  ;;  %v5050_v58 = vld [vmem:[#allocation5 + $0x4f0] sm:$0xf0]  ;;  %v6787_v59 = vld [vmem:[#allocation5 + $0x5e4] sm:$0xf]  ;;  %v4813_v4 = vor.u32 %v6695_v55, %v4810_v56  ;;  %v658_v55 = vld [vmem:[#allocation7] sm:$0xf] }
  0xbc   :  { %3442 = vmatpush.bf16.msra.mxu0 %v4445_v45  ;;  %v5178_v61 = vld [vmem:[#allocation5 + $0x5f0] sm:$0xf0]  ;;  %v6819_v62 = vld [vmem:[#allocation5 + $0x6e4] sm:$0xf]  ;;  %v5053_v5 = vor.u32 %v6755_v57, %v5050_v58 }
  0xbd   :  { %v5306_v63 = vld [vmem:[#allocation5 + $0x6f0] sm:$0xf0]  ;;  %3455 = vmatpush.bf16.msra.mxu1 %v4573_v48  ;;  %v6851_v2 = vld [vmem:[#allocation5 + $0x7e4] sm:$0xf]  ;;  %v5181_v6 = vor.u32 %v6787_v59, %v5178_v61 }
  0xbe   :  { %3468 = vmatpush.bf16.msra.mxu2 %v4701_v49  ;;  %v5434_v3 = vld [vmem:[#allocation5 + $0x7f0] sm:$0xf0]  ;;  %v5309_v7 = vor.u32 %v6819_v62, %v5306_v63  ;;  %v6751_v8 = vld [vmem:[#allocation5 + $0x4c4] sm:$0xf] }
  0xbf   :  { %3481 = vmatpush.bf16.msra.mxu3 %v4829_v53  ;;  %v5034_v11 = vld [vmem:[#allocation5 + $0x4d0] sm:$0xf0]  ;;  %v6783_v12 = vld [vmem:[#allocation5 + $0x5c4] sm:$0xf]  ;;  %v5437_v13 = vor.u32 %v6851_v2, %v5434_v3 }
  0xc0   :  { %3443 = vmatpush.bf16.msra.mxu0 %v4429_v60  ;;  %v5162_v15 = vld [vmem:[#allocation5 + $0x5d0] sm:$0xf0]  ;;  %v6815_v17 = vld [vmem:[#allocation5 + $0x6c4] sm:$0xf]  ;;  %v5037_v29 = vor.u32 %v6751_v8, %v5034_v11 }
  0xc1   :  { %v5290_v18 = vld [vmem:[#allocation5 + $0x6d0] sm:$0xf0]  ;;  %3456 = vmatpush.bf16.msra.mxu1 %v4557_v0  ;;  %v6847_v22 = vld [vmem:[#allocation5 + $0x7c4] sm:$0xf]  ;;  %v5165_v30 = vor.u32 %v6783_v12, %v5162_v15  ;;  %v660_v0 = vperm.slane %v658_v55, 0 }
  0xc2   :  { %3469 = vmatpush.bf16.msra.mxu2 %v4685_v1  ;;  %v5418_v25 = vld [vmem:[#allocation5 + $0x7d0] sm:$0xf0]  ;;  %v5293_v31 = vor.u32 %v6815_v17, %v5290_v18  ;;  %v6747_v32 = vld [vmem:[#allocation5 + $0x4a4] sm:$0xf] }
  0xc3   :  { %3482 = vmatpush.bf16.msra.mxu3 %v4813_v4  ;;  %v5018_v33 = vld [vmem:[#allocation5 + $0x4b0] sm:$0xf0]  ;;  %v6779_v34 = vld [vmem:[#allocation5 + $0x5a4] sm:$0xf]  ;;  %v5421_v36 = vor.u32 %v6847_v22, %v5418_v25  ;;  %3444 = vmatmul.bf16.vlgmr.msra.gmra.mxu0 %v7387_v10 }
  0xc4   :  { %3488 = vmatpush.bf16.msrb.mxu0 %v5053_v5  ;;  %v5146_v37 = vld [vmem:[#allocation5 + $0x5b0] sm:$0xf0]  ;;  %v6811_v40 = vld [vmem:[#allocation5 + $0x6a4] sm:$0xf]  ;;  %v5021_v45 = vor.u32 %v6747_v32, %v5018_v33  ;;  %3457 = vmatmul.bf16.vlgmr.msra.gmra.mxu1 %v7394_v26 }
  0xc5   :  { %3501 = vmatpush.bf16.msrb.mxu1 %v5181_v6  ;;  %v5274_v42 = vld [vmem:[#allocation5 + $0x6b0] sm:$0xf0]  ;;  %3470 = vmatmul.bf16.vlgmr.msra.gmra.mxu2 %v7385_v9  ;;  %v6843_v43 = vld [vmem:[#allocation5 + $0x7a4] sm:$0xf]  ;;  %v5149_v47 = vor.u32 %v6779_v34, %v5146_v37  ;;  %v3250_v34 = vpop.f32.mrf.mxu1 }
  0xc6   :  { %3514 = vmatpush.bf16.msrb.mxu2 %v5309_v7  ;;  %v5402_v44 = vld [vmem:[#allocation5 + $0x7b0] sm:$0xf0]  ;;  %3483 = vmatmul.bf16.vlgmr.msra.gmra.mxu3 %v7389_v16  ;;  %v6743_v46 = vld [vmem:[#allocation5 + $0x484] sm:$0xf]  ;;  %v5277_v48 = vor.u32 %v6811_v40, %v5274_v42 }
  0xc7   :  { %3527 = vmatpush.bf16.msrb.mxu3 %v5437_v13  ;;  %v5002_v49 = vld [vmem:[#allocation5 + $0x490] sm:$0xf0]  ;;  %v6775_v50 = vld [vmem:[#allocation5 + $0x584] sm:$0xf]  ;;  %v5405_v52 = vor.u32 %v6843_v43, %v5402_v44 }
  0xc8   :  { %3489 = vmatpush.bf16.msrb.mxu0 %v5037_v29  ;;  %v5130_v51 = vld [vmem:[#allocation5 + $0x590] sm:$0xf0]  ;;  %v6807_v53 = vld [vmem:[#allocation5 + $0x684] sm:$0xf]  ;;  %v5005_v58 = vor.u32 %v6743_v46, %v5002_v49 }
  0xc9   :  { %3502 = vmatpush.bf16.msrb.mxu1 %v5165_v30  ;;  %v5258_v54 = vld [vmem:[#allocation5 + $0x690] sm:$0xf0]  ;;  %v6839_v56 = vld [vmem:[#allocation5 + $0x784] sm:$0xf]  ;;  %v5133_v60 = vor.u32 %v6775_v50, %v5130_v51 }
  0xca   :  { %3515 = vmatpush.bf16.msrb.mxu2 %v5293_v31  ;;  %v5386_v57 = vld [vmem:[#allocation5 + $0x790] sm:$0xf0]  ;;  %v6739_v59 = vld [vmem:[#allocation5 + $0x464] sm:$0xf]  ;;  %v5261_v61 = vor.u32 %v6807_v53, %v5258_v54  ;;  %v3276_v53 = vpop.f32.mrf.mxu3 }
  0xcb   :  { %3528 = vmatpush.bf16.msrb.mxu3 %v5421_v36  ;;  %v4986_v62 = vld [vmem:[#allocation5 + $0x470] sm:$0xf0]  ;;  %v6771_v63 = vld [vmem:[#allocation5 + $0x564] sm:$0xf]  ;;  %v5389_v1 = vor.u32 %v6839_v56, %v5386_v57  ;;  %v3237_v8 = vpop.f32.mrf.mxu0 }
  0xcc   :  { %3490 = vmatpush.bf16.msrb.mxu0 %v5021_v45  ;;  %v5114_v2 = vld [vmem:[#allocation5 + $0x570] sm:$0xf0]  ;;  %v6803_v3 = vld [vmem:[#allocation5 + $0x664] sm:$0xf]  ;;  %v4989_v7 = vor.u32 %v6739_v59, %v4986_v62  ;;  %v3238_v18 = vadd.f32 %v3237_v8, %v660_v0 }
  0xcd   :  { %3503 = vmatpush.bf16.msrb.mxu1 %v5149_v47  ;;  %v5242_v4 = vld [vmem:[#allocation5 + $0x670] sm:$0xf0]  ;;  %v6835_v5 = vld [vmem:[#allocation5 + $0x764] sm:$0xf]  ;;  %v5117_v11 = vor.u32 %v6771_v63, %v5114_v2 }
  0xce   :  { %3516 = vmatpush.bf16.msrb.mxu2 %v5277_v48  ;;  %v5370_v6 = vld [vmem:[#allocation5 + $0x770] sm:$0xf0]  ;;  %v5245_v12 = vor.u32 %v6803_v3, %v5242_v4  ;;  %v6735_v13 = vld [vmem:[#allocation5 + $0x444] sm:$0xf]  ;;  %v3251_v44 = vadd.f32 %v3250_v34, %v3238_v18 }
  0xcf   :  { %3529 = vmatpush.bf16.msrb.mxu3 %v5405_v52  ;;  %v4970_v15 = vld [vmem:[#allocation5 + $0x450] sm:$0xf0]  ;;  %v6767_v17 = vld [vmem:[#allocation5 + $0x544] sm:$0xf]  ;;  %v5373_v22 = vor.u32 %v6835_v5, %v5370_v6 }
  0xd0   :  { %3491 = vmatpush.bf16.msrb.mxu0 %v5005_v58  ;;  %v5098_v25 = vld [vmem:[#allocation5 + $0x550] sm:$0xf0]  ;;  %v6799_v29 = vld [vmem:[#allocation5 + $0x644] sm:$0xf]  ;;  %v4973_v33 = vor.u32 %v6735_v13, %v4970_v15  ;;  %v3263_v49 = vpop.f32.mrf.mxu2  ;;  %v3252_v13 = vpop.f32.mrf.mxu1 }
  0xd1   :  { %3504 = vmatpush.bf16.msrb.mxu1 %v5133_v60  ;;  %v5226_v30 = vld [vmem:[#allocation5 + $0x650] sm:$0xf0]  ;;  %v6831_v31 = vld [vmem:[#allocation5 + $0x744] sm:$0xf]  ;;  %v5101_v36 = vor.u32 %v6767_v17, %v5098_v25  ;;  %v3264_v52 = vadd.f32 %v3263_v49, %v3251_v44 }
  0xd2   :  { %3517 = vmatpush.bf16.msrb.mxu2 %v5261_v61  ;;  %v5354_v32 = vld [vmem:[#allocation5 + $0x750] sm:$0xf0]  ;;  %v5229_v37 = vor.u32 %v6799_v29, %v5226_v30  ;;  %v6731_v40 = vld [vmem:[#allocation5 + $0x424] sm:$0xf] }
  0xd3   :  { %3530 = vmatpush.bf16.msrb.mxu3 %v5389_v1  ;;  %v4954_v42 = vld [vmem:[#allocation5 + $0x430] sm:$0xf0]  ;;  %v6763_v43 = vld [vmem:[#allocation5 + $0x524] sm:$0xf]  ;;  %v5357_v45 = vor.u32 %v6831_v31, %v5354_v32  ;;  %v3239_v57 = vpop.f32.mrf.mxu0  ;;  %v7437_v63 = vadd.f32 %v3276_v53, %v3264_v52 }
  0xd4   :  { %3492 = vmatpush.bf16.msrb.mxu0 %v4989_v7  ;;  %v5082_v46 = vld [vmem:[#allocation5 + $0x530] sm:$0xf0]  ;;  %v6795_v47 = vld [vmem:[#allocation5 + $0x624] sm:$0xf]  ;;  %v4957_v54 = vor.u32 %v6731_v40, %v4954_v42 }
  0xd5   :  { %3505 = vmatpush.bf16.msrb.mxu1 %v5117_v11  ;;  %v5210_v48 = vld [vmem:[#allocation5 + $0x630] sm:$0xf0]  ;;  %v6827_v50 = vld [vmem:[#allocation5 + $0x724] sm:$0xf]  ;;  %v5085_v58 = vor.u32 %v6763_v43, %v5082_v46 }
  0xd6   :  { %3518 = vmatpush.bf16.msrb.mxu2 %v5245_v12  ;;  %v5338_v51 = vld [vmem:[#allocation5 + $0x730] sm:$0xf0]  ;;  %v6727_v55 = vld [vmem:[#allocation5 + $0x404] sm:$0xf]  ;;  %v5213_v59 = vor.u32 %v6795_v47, %v5210_v48 }
  0xd7   :  { %3531 = vmatpush.bf16.msrb.mxu3 %v5373_v22  ;;  %v4938_v56 = vld [vmem:[#allocation5 + $0x410] sm:$0xf0]  ;;  %v6759_v60 = vld [vmem:[#allocation5 + $0x504] sm:$0xf]  ;;  %v5341_v0 = vor.u32 %v6827_v50, %v5338_v51 }
  0xd8   :  { %3493 = vmatpush.bf16.msrb.mxu0 %v4973_v33  ;;  %v5066_v61 = vld [vmem:[#allocation5 + $0x510] sm:$0xf0]  ;;  %v6791_v62 = vld [vmem:[#allocation5 + $0x604] sm:$0xf]  ;;  %v4941_v7 = vor.u32 %v6727_v55, %v4938_v56  ;;  %v3265_v30 = vpop.f32.mrf.mxu2 }
  0xd9   :  { %3506 = vmatpush.bf16.msrb.mxu1 %v5101_v36  ;;  %v5194_v1 = vld [vmem:[#allocation5 + $0x610] sm:$0xf0]  ;;  %v6823_v2 = vld [vmem:[#allocation5 + $0x704] sm:$0xf]  ;;  %v5069_v15 = vor.u32 %v6759_v60, %v5066_v61 }
  0xda   :  { %3519 = vmatpush.bf16.msrb.mxu2 %v5229_v37  ;;  %v5322_v3 = vld [vmem:[#allocation5 + $0x710] sm:$0xf0]  ;;  %v6883_v4 = vld [vmem:[#allocation5 + $0x8e4] sm:$0xf]  ;;  %v5197_v17 = vor.u32 %v6791_v62, %v5194_v1  ;;  %v3278_v37 = vpop.f32.mrf.mxu3 }
  0xdb   :  { %3532 = vmatpush.bf16.msrb.mxu3 %v5357_v45  ;;  %v5562_v5 = vld [vmem:[#allocation5 + $0x8f0] sm:$0xf0]  ;;  %v6915_v6 = vld [vmem:[#allocation5 + $0x9e4] sm:$0xf]  ;;  %v5325_v25 = vor.u32 %v6823_v2, %v5322_v3 }
  0xdc   :  { %3494 = vmatpush.bf16.msrb.mxu0 %v4957_v54  ;;  %v5690_v8 = vld [vmem:[#allocation5 + $0x9f0] sm:$0xf0]  ;;  %v6947_v11 = vld [vmem:[#allocation5 + $0xae4] sm:$0xf]  ;;  %v5565_v29 = vor.u32 %v6883_v4, %v5562_v5 }
  0xdd   :  { %v5818_v12 = vld [vmem:[#allocation5 + $0xaf0] sm:$0xf0]  ;;  %3507 = vmatpush.bf16.msrb.mxu1 %v5085_v58  ;;  %v6979_v18 = vld [vmem:[#allocation5 + $0xbe4] sm:$0xf]  ;;  %v5693_v31 = vor.u32 %v6915_v6, %v5690_v8 }
  0xde   :  { %3520 = vmatpush.bf16.msrb.mxu2 %v5213_v59  ;;  %v5946_v22 = vld [vmem:[#allocation5 + $0xbf0] sm:$0xf0]  ;;  %v5821_v32 = vor.u32 %v6947_v11, %v5818_v12  ;;  %v6879_v33 = vld [vmem:[#allocation5 + $0x8c4] sm:$0xf] }
  0xdf   :  { %3533 = vmatpush.bf16.msrb.mxu3 %v5341_v0  ;;  %v5546_v34 = vld [vmem:[#allocation5 + $0x8d0] sm:$0xf0]  ;;  %v6911_v36 = vld [vmem:[#allocation5 + $0x9c4] sm:$0xf]  ;;  %v5949_v40 = vor.u32 %v6979_v18, %v5946_v22 }
  0xe0   :  { %3495 = vmatpush.bf16.msrb.mxu0 %v4941_v7  ;;  %v5674_v42 = vld [vmem:[#allocation5 + $0x9d0] sm:$0xf0]  ;;  %v6943_v43 = vld [vmem:[#allocation5 + $0xac4] sm:$0xf]  ;;  %v5549_v47 = vor.u32 %v6879_v33, %v5546_v34 }
  0xe1   :  { %v5802_v44 = vld [vmem:[#allocation5 + $0xad0] sm:$0xf0]  ;;  %3508 = vmatpush.bf16.msrb.mxu1 %v5069_v15  ;;  %v6975_v45 = vld [vmem:[#allocation5 + $0xbc4] sm:$0xf]  ;;  %v5677_v48 = vor.u32 %v6911_v36, %v5674_v42 }
  0xe2   :  { %3521 = vmatpush.bf16.msrb.mxu2 %v5197_v17  ;;  %v5930_v46 = vld [vmem:[#allocation5 + $0xbd0] sm:$0xf0]  ;;  %v5805_v49 = vor.u32 %v6943_v43, %v5802_v44  ;;  %v6875_v50 = vld [vmem:[#allocation5 + $0x8a4] sm:$0xf] }
  0xe3   :  { %3534 = vmatpush.bf16.msrb.mxu3 %v5325_v25  ;;  %v5530_v51 = vld [vmem:[#allocation5 + $0x8b0] sm:$0xf0]  ;;  %v6907_v52 = vld [vmem:[#allocation5 + $0x9a4] sm:$0xf]  ;;  %v5933_v53 = vor.u32 %v6975_v45, %v5930_v46  ;;  %3496 = vmatmul.bf16.vlgmr.msrb.gmra.mxu0 %v7399_v38  ;;  %v3302_v25 = vpop.f32.mrf.mxu1 }
  0xe4   :  { %3540 = vmatpush.bf16.msra.mxu0 %v5565_v29  ;;  %v5658_v54 = vld [vmem:[#allocation5 + $0x9b0] sm:$0xf0]  ;;  %v6939_v55 = vld [vmem:[#allocation5 + $0xaa4] sm:$0xf]  ;;  %v5533_v59 = vor.u32 %v6875_v50, %v5530_v51  ;;  %3509 = vmatmul.bf16.vlgmr.msrb.gmra.mxu1 %v7403_v41  ;;  %v3289_v11 = vpop.f32.mrf.mxu0 }
  0xe5   :  { %3553 = vmatpush.bf16.msra.mxu1 %v5693_v31  ;;  %3522 = vmatmul.bf16.vlgmr.msrb.gmra.mxu2 %v7397_v35  ;;  %v5786_v56 = vld [vmem:[#allocation5 + $0xab0] sm:$0xf0]  ;;  %v6971_v57 = vld [vmem:[#allocation5 + $0xba4] sm:$0xf]  ;;  %v5661_v60 = vor.u32 %v6907_v52, %v5658_v54  ;;  %v3290_v22 = vadd.f32 %v3289_v11, %v7437_v63 }
  0xe6   :  { %3566 = vmatpush.bf16.msra.mxu2 %v5821_v32  ;;  %v5914_v58 = vld [vmem:[#allocation5 + $0xbb0] sm:$0xf0]  ;;  %3535 = vmatmul.bf16.vlgmr.msrb.gmra.mxu3 %v7401_v39  ;;  %v5789_v61 = vor.u32 %v6939_v55, %v5786_v56  ;;  %v6871_v62 = vld [vmem:[#allocation5 + $0x884] sm:$0xf] }
  0xe7   :  { %3579 = vmatpush.bf16.msra.mxu3 %v5949_v40  ;;  %v5514_v0 = vld [vmem:[#allocation5 + $0x890] sm:$0xf0]  ;;  %v6903_v1 = vld [vmem:[#allocation5 + $0x984] sm:$0xf]  ;;  %v5917_v2 = vor.u32 %v6971_v57, %v5914_v58  ;;  %v3303_v36 = vadd.f32 %v3302_v25, %v3290_v22  ;;  %v3328_v51 = vpop.f32.mrf.mxu3 }
  0xe8   :  { %3541 = vmatpush.bf16.msra.mxu0 %v5549_v47  ;;  %v5642_v3 = vld [vmem:[#allocation5 + $0x990] sm:$0xf0]  ;;  %v6935_v4 = vld [vmem:[#allocation5 + $0xa84] sm:$0xf]  ;;  %v5517_v8 = vor.u32 %v6871_v62, %v5514_v0 }
  0xe9   :  { %3554 = vmatpush.bf16.msra.mxu1 %v5677_v48  ;;  %v5770_v5 = vld [vmem:[#allocation5 + $0xa90] sm:$0xf0]  ;;  %v6967_v6 = vld [vmem:[#allocation5 + $0xb84] sm:$0xf]  ;;  %v5645_v12 = vor.u32 %v6903_v1, %v5642_v3  ;;  %v3315_v46 = vpop.f32.mrf.mxu2 }
  0xea   :  { %3567 = vmatpush.bf16.msra.mxu2 %v5805_v49  ;;  %v5898_v7 = vld [vmem:[#allocation5 + $0xb90] sm:$0xf0]  ;;  %v5773_v13 = vor.u32 %v6935_v4, %v5770_v5  ;;  %v6867_v15 = vld [vmem:[#allocation5 + $0x864] sm:$0xf]  ;;  %v3316_v50 = vadd.f32 %v3315_v46, %v3303_v36 }
  0xeb   :  { %3580 = vmatpush.bf16.msra.mxu3 %v5933_v53  ;;  %v5498_v17 = vld [vmem:[#allocation5 + $0x870] sm:$0xf0]  ;;  %v6899_v18 = vld [vmem:[#allocation5 + $0x964] sm:$0xf]  ;;  %v5901_v29 = vor.u32 %v6967_v6, %v5898_v7  ;;  %v3304_v62 = vpop.f32.mrf.mxu1 }
  0xec   :  { %3542 = vmatpush.bf16.msra.mxu0 %v5533_v59  ;;  %v5626_v30 = vld [vmem:[#allocation5 + $0x970] sm:$0xf0]  ;;  %v6931_v31 = vld [vmem:[#allocation5 + $0xa64] sm:$0xf]  ;;  %v5501_v37 = vor.u32 %v6867_v15, %v5498_v17  ;;  %v7444_v55 = vadd.f32 %v3328_v51, %v3316_v50  ;;  %v3291_v56 = vpop.f32.mrf.mxu0 }
  0xed   :  { %3555 = vmatpush.bf16.msra.mxu1 %v5661_v60  ;;  %v5754_v32 = vld [vmem:[#allocation5 + $0xa70] sm:$0xf0]  ;;  %v6963_v33 = vld [vmem:[#allocation5 + $0xb64] sm:$0xf]  ;;  %v5629_v40 = vor.u32 %v6899_v18, %v5626_v30 }
  0xee   :  { %3568 = vmatpush.bf16.msra.mxu2 %v5789_v61  ;;  %v5882_v34 = vld [vmem:[#allocation5 + $0xb70] sm:$0xf0]  ;;  %v5757_v42 = vor.u32 %v6931_v31, %v5754_v32  ;;  %v6863_v43 = vld [vmem:[#allocation5 + $0x844] sm:$0xf] }
  0xef   :  { %3581 = vmatpush.bf16.msra.mxu3 %v5917_v2  ;;  %v5482_v44 = vld [vmem:[#allocation5 + $0x850] sm:$0xf0]  ;;  %v6895_v45 = vld [vmem:[#allocation5 + $0x944] sm:$0xf]  ;;  %v5885_v63 = vor.u32 %v6963_v33, %v5882_v34  ;;  %v3330_v31 = vpop.f32.mrf.mxu3 }
  0xf0   :  { %3543 = vmatpush.bf16.msra.mxu0 %v5517_v8  ;;  %v5610_v47 = vld [vmem:[#allocation5 + $0x950] sm:$0xf0]  ;;  %v6927_v48 = vld [vmem:[#allocation5 + $0xa44] sm:$0xf]  ;;  %v5485_v54 = vor.u32 %v6863_v43, %v5482_v44 }
  0xf1   :  { %3556 = vmatpush.bf16.msra.mxu1 %v5645_v12  ;;  %v5738_v49 = vld [vmem:[#allocation5 + $0xa50] sm:$0xf0]  ;;  %v6959_v52 = vld [vmem:[#allocation5 + $0xb44] sm:$0xf]  ;;  %v5613_v57 = vor.u32 %v6895_v45, %v5610_v47  ;;  %v3317_v18 = vpop.f32.mrf.mxu2 }
  0xf2   :  { %3569 = vmatpush.bf16.msra.mxu2 %v5773_v13  ;;  %v5866_v53 = vld [vmem:[#allocation5 + $0xb50] sm:$0xf0]  ;;  %v5741_v58 = vor.u32 %v6927_v48, %v5738_v49  ;;  %v6859_v59 = vld [vmem:[#allocation5 + $0x824] sm:$0xf] }
  0xf3   :  { %3582 = vmatpush.bf16.msra.mxu3 %v5901_v29  ;;  %v5466_v60 = vld [vmem:[#allocation5 + $0x830] sm:$0xf0]  ;;  %v6891_v61 = vld [vmem:[#allocation5 + $0x924] sm:$0xf]  ;;  %v5869_v0 = vor.u32 %v6959_v52, %v5866_v53 }
  0xf4   :  { %3544 = vmatpush.bf16.msra.mxu0 %v5501_v37  ;;  %v5594_v1 = vld [vmem:[#allocation5 + $0x930] sm:$0xf0]  ;;  %v6923_v2 = vld [vmem:[#allocation5 + $0xa24] sm:$0xf]  ;;  %v5469_v6 = vor.u32 %v6859_v59, %v5466_v60 }
  0xf5   :  { %3557 = vmatpush.bf16.msra.mxu1 %v5629_v40  ;;  %v5722_v3 = vld [vmem:[#allocation5 + $0xa30] sm:$0xf0]  ;;  %v6955_v4 = vld [vmem:[#allocation5 + $0xb24] sm:$0xf]  ;;  %v5597_v11 = vor.u32 %v6891_v61, %v5594_v1 }
  0xf6   :  { %3570 = vmatpush.bf16.msra.mxu2 %v5757_v42  ;;  %v5850_v5 = vld [vmem:[#allocation5 + $0xb30] sm:$0xf0]  ;;  %v6855_v7 = vld [vmem:[#allocation5 + $0x804] sm:$0xf]  ;;  %v5725_v12 = vor.u32 %v6923_v2, %v5722_v3 }
  0xf7   :  { %3583 = vmatpush.bf16.msra.mxu3 %v5885_v63  ;;  %v5450_v8 = vld [vmem:[#allocation5 + $0x810] sm:$0xf0]  ;;  %v6887_v13 = vld [vmem:[#allocation5 + $0x904] sm:$0xf]  ;;  %v5853_v22 = vor.u32 %v6955_v4, %v5850_v5 }
  0xf8   :  { %3545 = vmatpush.bf16.msra.mxu0 %v5485_v54  ;;  %v5578_v15 = vld [vmem:[#allocation5 + $0x910] sm:$0xf0]  ;;  %v6919_v17 = vld [vmem:[#allocation5 + $0xa04] sm:$0xf]  ;;  %v5453_v36 = vor.u32 %v6855_v7, %v5450_v8 }
  0xf9   :  { %3558 = vmatpush.bf16.msra.mxu1 %v5613_v57  ;;  %v5706_v25 = vld [vmem:[#allocation5 + $0xa10] sm:$0xf0]  ;;  %v6951_v29 = vld [vmem:[#allocation5 + $0xb04] sm:$0xf]  ;;  %v5581_v43 = vor.u32 %v6887_v13, %v5578_v15 }
  0xfa   :  { %3571 = vmatpush.bf16.msra.mxu2 %v5741_v58  ;;  %v5834_v30 = vld [vmem:[#allocation5 + $0xb10] sm:$0xf0]  ;;  %v7011_v32 = vld [vmem:[#allocation5 + $0xce4] sm:$0xf]  ;;  %v5709_v44 = vor.u32 %v6919_v17, %v5706_v25 }
  0xfb   :  { %3584 = vmatpush.bf16.msra.mxu3 %v5869_v0  ;;  %v6074_v33 = vld [vmem:[#allocation5 + $0xcf0] sm:$0xf0]  ;;  %v7043_v34 = vld [vmem:[#allocation5 + $0xde4] sm:$0xf]  ;;  %v5837_v63 = vor.u32 %v6951_v29, %v5834_v30 }
  0xfc   :  { %3546 = vmatpush.bf16.msra.mxu0 %v5469_v6  ;;  %v6202_v37 = vld [vmem:[#allocation5 + $0xdf0] sm:$0xf0]  ;;  %v7075_v40 = vld [vmem:[#allocation5 + $0xee4] sm:$0xf]  ;;  %v6077_v47 = vor.u32 %v7011_v32, %v6074_v33 }
  0xfd   :  { %v6330_v42 = vld [vmem:[#allocation5 + $0xef0] sm:$0xf0]  ;;  %3559 = vmatpush.bf16.msra.mxu1 %v5597_v11  ;;  %v7107_v45 = vld [vmem:[#allocation5 + $0xfe4] sm:$0xf]  ;;  %v6205_v48 = vor.u32 %v7043_v34, %v6202_v37 }
  0xfe   :  { %3572 = vmatpush.bf16.msra.mxu2 %v5725_v12  ;;  %v6458_v46 = vld [vmem:[#allocation5 + $0xff0] sm:$0xf0]  ;;  %v6333_v49 = vor.u32 %v7075_v40, %v6330_v42  ;;  %v7007_v50 = vld [vmem:[#allocation5 + $0xcc4] sm:$0xf] }
  0xff   :  { %3585 = vmatpush.bf16.msra.mxu3 %v5853_v22  ;;  %v6058_v51 = vld [vmem:[#allocation5 + $0xcd0] sm:$0xf0]  ;;  %v7039_v52 = vld [vmem:[#allocation5 + $0xdc4] sm:$0xf]  ;;  %v6461_v53 = vor.u32 %v7107_v45, %v6458_v46 }
 0x100   :  { %3547 = vmatpush.bf16.msra.mxu0 %v5453_v36  ;;  %v6186_v54 = vld [vmem:[#allocation5 + $0xdd0] sm:$0xf0]  ;;  %v7071_v56 = vld [vmem:[#allocation5 + $0xec4] sm:$0xf]  ;;  %v6061_v60 = vor.u32 %v7007_v50, %v6058_v51  ;;  %v3354_v37 = vpop.f32.mrf.mxu1 }
 0x101   :  { %v6314_v57 = vld [vmem:[#allocation5 + $0xed0] sm:$0xf0]  ;;  %3560 = vmatpush.bf16.msra.mxu1 %v5581_v43  ;;  %v7103_v58 = vld [vmem:[#allocation5 + $0xfc4] sm:$0xf]  ;;  %v6189_v61 = vor.u32 %v7039_v52, %v6186_v54 }
 0x102   :  { %3573 = vmatpush.bf16.msra.mxu2 %v5709_v44  ;;  %v6442_v59 = vld [vmem:[#allocation5 + $0xfd0] sm:$0xf0]  ;;  %v6317_v62 = vor.u32 %v7071_v56, %v6314_v57  ;;  %v7003_v0 = vld [vmem:[#allocation5 + $0xca4] sm:$0xf] }
 0x103   :  { %3586 = vmatpush.bf16.msra.mxu3 %v5837_v63  ;;  %v6042_v1 = vld [vmem:[#allocation5 + $0xcb0] sm:$0xf0]  ;;  %v7035_v2 = vld [vmem:[#allocation5 + $0xda4] sm:$0xf]  ;;  %3548 = vmatmul.bf16.vlgmr.msra.gmra.mxu0 %v7409_v19  ;;  %v6445_v3 = vor.u32 %v7103_v58, %v6442_v59 }
 0x104   :  { %3592 = vmatpush.bf16.msrb.mxu0 %v6077_v47  ;;  %v6170_v4 = vld [vmem:[#allocation5 + $0xdb0] sm:$0xf0]  ;;  %v7067_v5 = vld [vmem:[#allocation5 + $0xea4] sm:$0xf]  ;;  %3561 = vmatmul.bf16.vlgmr.msra.gmra.mxu1 %v7413_v24  ;;  %v6045_v11 = vor.u32 %v7003_v0, %v6042_v1  ;;  %v3341_v31 = vpop.f32.mrf.mxu0 }
 0x105   :  { %3605 = vmatpush.bf16.msrb.mxu1 %v6205_v48  ;;  %v6298_v6 = vld [vmem:[#allocation5 + $0xeb0] sm:$0xf0]  ;;  %3574 = vmatmul.bf16.vlgmr.msra.gmra.mxu2 %v7411_v23  ;;  %v7099_v7 = vld [vmem:[#allocation5 + $0xfa4] sm:$0xf]  ;;  %v6173_v12 = vor.u32 %v7035_v2, %v6170_v4  ;;  %v3342_v34 = vadd.f32 %v3341_v31, %v7444_v55 }
 0x106   :  { %3618 = vmatpush.bf16.msrb.mxu2 %v6333_v49  ;;  %v6426_v8 = vld [vmem:[#allocation5 + $0xfb0] sm:$0xf0]  ;;  %3587 = vmatmul.bf16.vlgmr.msra.gmra.mxu3 %v7415_v28  ;;  %v6301_v13 = vor.u32 %v7067_v5, %v6298_v6  ;;  %v6999_v15 = vld [vmem:[#allocation5 + $0xc84] sm:$0xf] }
 0x107   :  { %3631 = vmatpush.bf16.msrb.mxu3 %v6461_v53  ;;  %v6026_v17 = vld [vmem:[#allocation5 + $0xc90] sm:$0xf0]  ;;  %v7031_v18 = vld [vmem:[#allocation5 + $0xd84] sm:$0xf]  ;;  %v6429_v22 = vor.u32 %v7099_v7, %v6426_v8  ;;  %v3355_v63 = vadd.f32 %v3354_v37, %v3342_v34 }
 0x108   :  { %3593 = vmatpush.bf16.msrb.mxu0 %v6061_v60  ;;  %v6154_v25 = vld [vmem:[#allocation5 + $0xd90] sm:$0xf0]  ;;  %v7063_v29 = vld [vmem:[#allocation5 + $0xe84] sm:$0xf]  ;;  %v6029_v36 = vor.u32 %v6999_v15, %v6026_v17  ;;  %v3380_v1 = vpop.f32.mrf.mxu3  ;;  %v3356_v6 = vpop.f32.mrf.mxu1 }
 0x109   :  { %3606 = vmatpush.bf16.msrb.mxu1 %v6189_v61  ;;  %v6282_v30 = vld [vmem:[#allocation5 + $0xe90] sm:$0xf0]  ;;  %v7095_v32 = vld [vmem:[#allocation5 + $0xf84] sm:$0xf]  ;;  %v6157_v40 = vor.u32 %v7031_v18, %v6154_v25  ;;  %v6690_v6 = vld [vmem:[#allocation5 + $0x2d4] sm:$0xf0] }
 0x10a   :  { %3619 = vmatpush.bf16.msrb.mxu2 %v6317_v62  ;;  %v6410_v33 = vld [vmem:[#allocation5 + $0xf90] sm:$0xf0]  ;;  %v6285_v42 = vor.u32 %v7063_v29, %v6282_v30  ;;  %v6995_v43 = vld [vmem:[#allocation5 + $0xc64] sm:$0xf]  ;;  %v3367_v59 = vpop.f32.mrf.mxu2 }
 0x10b   :  { %3632 = vmatpush.bf16.msrb.mxu3 %v6445_v3  ;;  %v6010_v44 = vld [vmem:[#allocation5 + $0xc70] sm:$0xf0]  ;;  %v7027_v45 = vld [vmem:[#allocation5 + $0xd64] sm:$0xf]  ;;  %v6413_v46 = vor.u32 %v7095_v32, %v6410_v33  ;;  %v3368_v0 = vadd.f32 %v3367_v59, %v3355_v63 }
 0x10c   :  { %3594 = vmatpush.bf16.msrb.mxu0 %v6045_v11  ;;  %v6138_v47 = vld [vmem:[#allocation5 + $0xd70] sm:$0xf0]  ;;  %v7059_v48 = vld [vmem:[#allocation5 + $0xe64] sm:$0xf]  ;;  %v6013_v52 = vor.u32 %v6995_v43, %v6010_v44  ;;  %v3343_v4 = vpop.f32.mrf.mxu0 }
 0x10d   :  { %3607 = vmatpush.bf16.msrb.mxu1 %v6173_v12  ;;  %v6266_v49 = vld [vmem:[#allocation5 + $0xe70] sm:$0xf0]  ;;  %v7091_v50 = vld [vmem:[#allocation5 + $0xf64] sm:$0xf]  ;;  %v6141_v55 = vor.u32 %v7027_v45, %v6138_v47  ;;  %v7451_v7 = vadd.f32 %v3380_v1, %v3368_v0  ;;  %v4544_v47 = vld [vmem:[#allocation5 + $0xe8] sm:$0xf] }
 0x10e   :  { %3620 = vmatpush.bf16.msrb.mxu2 %v6301_v13  ;;  %v6394_v51 = vld [vmem:[#allocation5 + $0xf70] sm:$0xf0]  ;;  %v6269_v53 = vor.u32 %v7059_v48, %v6266_v49  ;;  %v6991_v54 = vld [vmem:[#allocation5 + $0xc44] sm:$0xf]  ;;  %v6630_v48 = vld [vmem:[#allocation5 + $0xf4] sm:$0xf0] }
 0x10f   :  { %3633 = vmatpush.bf16.msrb.mxu3 %v6429_v22  ;;  %v5994_v56 = vld [vmem:[#allocation5 + $0xc50] sm:$0xf0]  ;;  %v7023_v57 = vld [vmem:[#allocation5 + $0xd44] sm:$0xf]  ;;  %v6397_v58 = vor.u32 %v7091_v50, %v6394_v51  ;;  %v4672_v49 = vld [vmem:[#allocation5 + $0x1e8] sm:$0xf] }
 0x110   :  { %3595 = vmatpush.bf16.msrb.mxu0 %v6029_v36  ;;  %v6122_v60 = vld [vmem:[#allocation5 + $0xd50] sm:$0xf0]  ;;  %v7055_v61 = vld [vmem:[#allocation5 + $0xe44] sm:$0xf]  ;;  %v5997_v5 = vor.u32 %v6991_v54, %v5994_v56  ;;  %v3382_v50 = vpop.f32.mrf.mxu3  ;;  %v4528_v0 = vld [vmem:[#allocation5 + $0xc8] sm:$0xf] }
 0x111   :  { %3608 = vmatpush.bf16.msrb.mxu1 %v6157_v40  ;;  %v6250_v62 = vld [vmem:[#allocation5 + $0xe50] sm:$0xf0]  ;;  %v7087_v2 = vld [vmem:[#allocation5 + $0xf44] sm:$0xf]  ;;  %v6125_v8 = vor.u32 %v7023_v57, %v6122_v60  ;;  %v4928_v57 = vld [vmem:[#allocation5 + $0x3e8] sm:$0xf]  ;;  %v4545_v60 = vor.u32 %v6630_v48, %v4544_v47 }
 0x112   :  { %3621 = vmatpush.bf16.msrb.mxu2 %v6285_v42  ;;  %v6378_v3 = vld [vmem:[#allocation5 + $0xf50] sm:$0xf0]  ;;  %v6253_v11 = vor.u32 %v7055_v61, %v6250_v62  ;;  %v6987_v12 = vld [vmem:[#allocation5 + $0xc24] sm:$0xf]  ;;  %v3369_v63 = vpop.f32.mrf.mxu2  ;;  %v6626_v1 = vld [vmem:[#allocation5 + $0xd4] sm:$0xf0] }
 0x113   :  { %3634 = vmatpush.bf16.msrb.mxu3 %v6413_v46  ;;  %v5978_v13 = vld [vmem:[#allocation5 + $0xc30] sm:$0xf0]  ;;  %v7019_v15 = vld [vmem:[#allocation5 + $0xd24] sm:$0xf]  ;;  %v6381_v17 = vor.u32 %v7087_v2, %v6378_v3  ;;  %v4656_v2 = vld [vmem:[#allocation5 + $0x1c8] sm:$0xf] }
 0x114   :  { %3596 = vmatpush.bf16.msrb.mxu0 %v6013_v52  ;;  %v6106_v18 = vld [vmem:[#allocation5 + $0xd30] sm:$0xf0]  ;;  %v7051_v22 = vld [vmem:[#allocation5 + $0xe24] sm:$0xf]  ;;  %v5981_v31 = vor.u32 %v6987_v12, %v5978_v13  ;;  %v6662_v52 = vld [vmem:[#allocation5 + $0x1f4] sm:$0xf0]  ;;  %v4529_v12 = vor.u32 %v6626_v1, %v4528_v0 }
 0x115   :  { %3609 = vmatpush.bf16.msrb.mxu1 %v6141_v55  ;;  %v6234_v25 = vld [vmem:[#allocation5 + $0xe30] sm:$0xf0]  ;;  %v7083_v29 = vld [vmem:[#allocation5 + $0xf24] sm:$0xf]  ;;  %v6109_v34 = vor.u32 %v7019_v15, %v6106_v18  ;;  %v4800_v55 = vld [vmem:[#allocation5 + $0x2e8] sm:$0xf]  ;;  %v4673_v61 = vor.u32 %v6662_v52, %v4672_v49 }
 0x116   :  { %3622 = vmatpush.bf16.msrb.mxu2 %v6269_v53  ;;  %v6362_v30 = vld [vmem:[#allocation5 + $0xf30] sm:$0xf0]  ;;  %v6983_v32 = vld [vmem:[#allocation5 + $0xc04] sm:$0xf]  ;;  %v6237_v36 = vor.u32 %v7051_v22, %v6234_v25  ;;  %v6694_v53 = vld [vmem:[#allocation5 + $0x2f4] sm:$0xf0] }
 0x117   :  { %3635 = vmatpush.bf16.msrb.mxu3 %v6397_v58  ;;  %v5962_v33 = vld [vmem:[#allocation5 + $0xc10] sm:$0xf0]  ;;  %v7015_v37 = vld [vmem:[#allocation5 + $0xd04] sm:$0xf]  ;;  %v6365_v43 = vor.u32 %v7083_v29, %v6362_v30  ;;  %v6726_v58 = vld [vmem:[#allocation5 + $0x3f4] sm:$0xf0]  ;;  %v4801_v62 = vor.u32 %v6694_v53, %v4800_v55 }
 0x118   :  { %3597 = vmatpush.bf16.msrb.mxu0 %v5997_v5  ;;  %v6090_v40 = vld [vmem:[#allocation5 + $0xd10] sm:$0xf0]  ;;  %v7047_v42 = vld [vmem:[#allocation5 + $0xe04] sm:$0xf]  ;;  %v5965_v51 = vor.u32 %v6983_v32, %v5962_v33  ;;  %v4929_v3 = vor.u32 %v6726_v58, %v4928_v57  ;;  %v6658_v4 = vld [vmem:[#allocation5 + $0x1d4] sm:$0xf0] }
 0x119   :  { %3610 = vmatpush.bf16.msrb.mxu1 %v6125_v8  ;;  %v6218_v44 = vld [vmem:[#allocation5 + $0xe10] sm:$0xf0]  ;;  %v7079_v45 = vld [vmem:[#allocation5 + $0xf04] sm:$0xf]  ;;  %v6093_v54 = vor.u32 %v7015_v37, %v6090_v40  ;;  %v4784_v5 = vld [vmem:[#allocation5 + $0x2c8] sm:$0xf]  ;;  %v4657_v13 = vor.u32 %v6658_v4, %v4656_v2 }
 0x11a   :  { %3623 = vmatpush.bf16.msrb.mxu2 %v6253_v11  ;;  %v6346_v46 = vld [vmem:[#allocation5 + $0xf10] sm:$0xf0]  ;;  %v6221_v56 = vor.u32 %v7047_v42, %v6218_v44  ;;  %v4912_v8 = vld [vmem:[#allocation5 + $0x3c8] sm:$0xf]  ;;  %v6722_v11 = vld [vmem:[#allocation5 + $0x3d4] sm:$0xf0]  ;;  %v4785_v15 = vor.u32 %v6690_v6, %v4784_v5 }
 0x11b   :  { %3636 = vmatpush.bf16.msrb.mxu3 %v6381_v17  ;;  %v6349_v59 = vor.u32 %v7079_v45, %v6346_v46  ;;  %v4512_v17 = vld [vmem:[#allocation5 + $0xa8] sm:$0xf]  ;;  %v6622_v18 = vld [vmem:[#allocation5 + $0xb4] sm:$0xf0]  ;;  %v4913_v25 = vor.u32 %v6722_v11, %v4912_v8 }
 0x11c   :  { %3598 = vmatpush.bf16.msrb.mxu0 %v5981_v31  ;;  %v4640_v22 = vld [vmem:[#allocation5 + $0x1a8] sm:$0xf]  ;;  %v6654_v29 = vld [vmem:[#allocation5 + $0x1b4] sm:$0xf0] }
 0x11d   :  { %3611 = vmatpush.bf16.msrb.mxu1 %v6109_v34  ;;  %v4768_v30 = vld [vmem:[#allocation5 + $0x2a8] sm:$0xf]  ;;  %v6686_v31 = vld [vmem:[#allocation5 + $0x2b4] sm:$0xf0]  ;;  %v4513_v34 = vor.u32 %v6622_v18, %v4512_v17 }
 0x11e   :  { %3624 = vmatpush.bf16.msrb.mxu2 %v6237_v36  ;;  %v4896_v32 = vld [vmem:[#allocation5 + $0x3a8] sm:$0xf]  ;;  %v6718_v33 = vld [vmem:[#allocation5 + $0x3b4] sm:$0xf0]  ;;  %v4641_v36 = vor.u32 %v6654_v29, %v4640_v22  ;;  %v4769_v37 = vor.u32 %v6686_v31, %v4768_v30 }
 0x11f   :  { %3637 = vmatpush.bf16.msrb.mxu3 %v6365_v43  ;;  %v4496_v40 = vld [vmem:[#allocation5 + $0x88] sm:$0xf]  ;;  %v6618_v42 = vld [vmem:[#allocation5 + $0x94] sm:$0xf0]  ;;  %v4897_v44 = vor.u32 %v6718_v33, %v4896_v32 }
 0x120   :  { %3599 = vmatpush.bf16.msrb.mxu0 %v5965_v51  ;;  %v4624_v43 = vld [vmem:[#allocation5 + $0x188] sm:$0xf]  ;;  %v6650_v45 = vld [vmem:[#allocation5 + $0x194] sm:$0xf0]  ;;  %v4497_v51 = vor.u32 %v6618_v42, %v4496_v40 }
 0x121   :  { %3612 = vmatpush.bf16.msrb.mxu1 %v6093_v54  ;;  %v4752_v46 = vld [vmem:[#allocation5 + $0x288] sm:$0xf]  ;;  %v6682_v63 = vld [vmem:[#allocation5 + $0x294] sm:$0xf0]  ;;  %v3406_v52 = vpop.f32.mrf.mxu1  ;;  %v4625_v55 = vor.u32 %v6650_v45, %v4624_v43 }
 0x122   :  { %3625 = vmatpush.bf16.msrb.mxu2 %v6221_v56  ;;  %v3393_v47 = vpop.f32.mrf.mxu0  ;;  %v4880_v48 = vld [vmem:[#allocation5 + $0x388] sm:$0xf]  ;;  %v6714_v49 = vld [vmem:[#allocation5 + $0x394] sm:$0xf0]  ;;  %v4753_v53 = vor.u32 %v6682_v63, %v4752_v46 }
 0x123   :  { %3638 = vmatpush.bf16.msrb.mxu3 %v6349_v59  ;;  %3600 = vmatmul.bf16.vlgmr.msrb.gmra.mxu0 %v7421_v14  ;;  %v3394_v50 = vadd.f32 %v3393_v47, %v7451_v7  ;;  %v4480_v54 = vld [vmem:[#allocation5 + $0x68] sm:$0xf]  ;;  %v6614_v56 = vld [vmem:[#allocation5 + $0x74] sm:$0xf0]  ;;  %v4881_v58 = vor.u32 %v6714_v49, %v4880_v48 }
 0x124   :  { %3644 = vmatpush.bf16.msra.mxu0 %v4545_v60  ;;  %3613 = vmatmul.bf16.vlgmr.msrb.gmra.mxu1 %v7425_v21  ;;  %v4608_v57 = vld [vmem:[#allocation5 + $0x168] sm:$0xf]  ;;  %v6646_v60 = vld [vmem:[#allocation5 + $0x174] sm:$0xf0]  ;;  %v4481_v2 = vor.u32 %v6614_v56, %v4480_v54 }
 0x125   :  { %3657 = vmatpush.bf16.msra.mxu1 %v4673_v61  ;;  %3626 = vmatmul.bf16.vlgmr.msrb.gmra.mxu2 %v7423_v20  ;;  %v3407_v59 = vadd.f32 %v3406_v52, %v3394_v50  ;;  %v4736_v61 = vld [vmem:[#allocation5 + $0x268] sm:$0xf]  ;;  %v6710_v1 = vld [vmem:[#allocation5 + $0x374] sm:$0xf0]  ;;  %v4609_v7 = vor.u32 %v6646_v60, %v4608_v57 }
 0x126   :  { %3670 = vmatpush.bf16.msra.mxu2 %v4801_v62  ;;  %3639 = vmatmul.bf16.vlgmr.msrb.gmra.mxu3 %v7427_v27  ;;  %v6678_v62 = vld [vmem:[#allocation5 + $0x274] sm:$0xf0]  ;;  %v4864_v0 = vld [vmem:[#allocation5 + $0x368] sm:$0xf] }
 0x127   :  { %3683 = vmatpush.bf16.msra.mxu3 %v4929_v3  ;;  %v4737_v3 = vor.u32 %v6678_v62, %v4736_v61  ;;  %v4464_v4 = vld [vmem:[#allocation5 + $0x48] sm:$0xf]  ;;  %v6610_v5 = vld [vmem:[#allocation5 + $0x54] sm:$0xf0]  ;;  %v4865_v8 = vor.u32 %v6710_v1, %v4864_v0 }
 0x128   :  { %3645 = vmatpush.bf16.msra.mxu0 %v4529_v12  ;;  %v4592_v6 = vld [vmem:[#allocation5 + $0x148] sm:$0xf]  ;;  %v6642_v12 = vld [vmem:[#allocation5 + $0x154] sm:$0xf0]  ;;  %v4465_v30 = vor.u32 %v6610_v5, %v4464_v4 }
 0x129   :  { %3658 = vmatpush.bf16.msra.mxu1 %v4657_v13  ;;  %v4720_v13 = vld [vmem:[#allocation5 + $0x248] sm:$0xf]  ;;  %v3432_v18 = vpop.f32.mrf.mxu3  ;;  %v3408_v31 = vpop.f32.mrf.mxu1  ;;  %v4593_v33 = vor.u32 %v6642_v12, %v4592_v6  ;;  %v6638_v43 = vld [vmem:[#allocation5 + $0x134] sm:$0xf0] }
 0x12a   :  { %3671 = vmatpush.bf16.msra.mxu2 %v4785_v15  ;;  %v3419_v11 = vpop.f32.mrf.mxu2  ;;  %v6674_v15 = vld [vmem:[#allocation5 + $0x254] sm:$0xf0]  ;;  %v4848_v22 = vld [vmem:[#allocation5 + $0x348] sm:$0xf]  ;;  %v3395_v29 = vpop.f32.mrf.mxu0 }
 0x12b   :  { %3684 = vmatpush.bf16.msra.mxu3 %v4913_v25  ;;  %v3420_v17 = vadd.f32 %v3419_v11, %v3407_v59  ;;  %v6706_v25 = vld [vmem:[#allocation5 + $0x354] sm:$0xf0]  ;;  %v4576_v40 = vld [vmem:[#allocation5 + $0x128] sm:$0xf] }
 0x12c   :  { %3646 = vmatpush.bf16.msra.mxu0 %v4513_v34  ;;  %v4721_v34 = vor.u32 %v6674_v15, %v4720_v13  ;;  %v4849_v42 = vor.u32 %v6706_v25, %v4848_v22  ;;  %v6670_v45 = vld [vmem:[#allocation5 + $0x234] sm:$0xf0]  ;;  %v4832_v46 = vld [vmem:[#allocation5 + $0x328] sm:$0xf]  ;;  %v4577_v50 = vor.u32 %v6638_v43, %v4576_v40 }
 0x12d   :  { %3659 = vmatpush.bf16.msra.mxu1 %v4641_v36  ;;  %v7458_v32 = vadd.f32 %v3432_v18, %v3420_v17  ;;  %v4448_v36 = vld [vmem:[#allocation5 + $0x28] sm:$0xf]  ;;  %v6702_v63 = vld [vmem:[#allocation5 + $0x334] sm:$0xf0] }
 0x12e   :  { %3672 = vmatpush.bf16.msra.mxu2 %v4769_v37  ;;  %v6606_v37 = vld [vmem:[#allocation5 + $0x34] sm:$0xf0]  ;;  %v4432_v48 = vld [vmem:[#allocation5 + $0x8] sm:$0xf]  ;;  %v4833_v54 = vor.u32 %v6702_v63, %v4832_v46 }
 0x12f   :  { %3685 = vmatpush.bf16.msra.mxu3 %v4897_v44  ;;  %v4704_v44 = vld [vmem:[#allocation5 + $0x228] sm:$0xf]  ;;  %v4449_v47 = vor.u32 %v6606_v37, %v4448_v36  ;;  %v6602_v49 = vld [vmem:[#allocation5 + $0x14] sm:$0xf0] }
 0x130   :  { %3647 = vmatpush.bf16.msra.mxu0 %v4497_v51  ;;  %v4705_v51 = vor.u32 %v6670_v45, %v4704_v44  ;;  %v4560_v52 = vld [vmem:[#allocation5 + $0x108] sm:$0xf]  ;;  %v6666_v56 = vld [vmem:[#allocation5 + $0x214] sm:$0xf0]  ;;  %v4433_v1 = vor.u32 %v6602_v49, %v4432_v48 }
 0x131   :  { %3660 = vmatpush.bf16.msra.mxu1 %v4625_v55  ;;  %v6634_v55 = vld [vmem:[#allocation5 + $0x114] sm:$0xf0]  ;;  %v4816_v57 = vld [vmem:[#allocation5 + $0x308] sm:$0xf]  ;;  %v3434_v0 = vpop.f32.mrf.mxu3 }
 0x132   :  { %3673 = vmatpush.bf16.msra.mxu2 %v4753_v53  ;;  %v4688_v53 = vld [vmem:[#allocation5 + $0x208] sm:$0xf]  ;;  %v3421_v59 = vpop.f32.mrf.mxu2  ;;  %v6758_v61 = vld [vmem:[#allocation5 + $0x4f4] sm:$0xf0]  ;;  %v4561_v4 = vor.u32 %v6634_v55, %v4560_v52 }
 0x133   :  { %3686 = vmatpush.bf16.msra.mxu3 %v4881_v58  ;;  %v6698_v58 = vld [vmem:[#allocation5 + $0x314] sm:$0xf0]  ;;  %v5056_v60 = vld [vmem:[#allocation5 + $0x4e8] sm:$0xf]  ;;  %v4689_v5 = vor.u32 %v6666_v56, %v4688_v53  ;;  %v7160_v56 = vld [vmem:[#allocation7] sm:$0xf] }
 0x134   :  { %3648 = vmatpush.bf16.msra.mxu0 %v4481_v2  ;;  %v5184_v62 = vld [vmem:[#allocation5 + $0x5e8] sm:$0xf]  ;;  %v6790_v2 = vld [vmem:[#allocation5 + $0x5f4] sm:$0xf0]  ;;  %v4817_v11 = vor.u32 %v6698_v58, %v4816_v57  ;;  %v5057_v12 = vor.u32 %v6758_v61, %v5056_v60  ;;  %v661_v57 = vperm.slane %v7160_v56, 1 }
 0x135   :  { %3661 = vmatpush.bf16.msra.mxu1 %v4609_v7  ;;  %v5312_v7 = vld [vmem:[#allocation5 + $0x6e8] sm:$0xf]  ;;  %v5185_v13 = vor.u32 %v6790_v2, %v5184_v62  ;;  %v6754_v18 = vld [vmem:[#allocation5 + $0x4d4] sm:$0xf0] }
 0x136   :  { %3674 = vmatpush.bf16.msra.mxu2 %v4737_v3  ;;  %v6822_v3 = vld [vmem:[#allocation5 + $0x6f4] sm:$0xf0]  ;;  %v5440_v6 = vld [vmem:[#allocation5 + $0x7e8] sm:$0xf] }
 0x137   :  { %3687 = vmatpush.bf16.msra.mxu3 %v4865_v8  ;;  %v6854_v8 = vld [vmem:[#allocation5 + $0x7f4] sm:$0xf0]  ;;  %v5313_v15 = vor.u32 %v6822_v3, %v5312_v7  ;;  %v5040_v17 = vld [vmem:[#allocation5 + $0x4c8] sm:$0xf] }
 0x138   :  { %3649 = vmatpush.bf16.msra.mxu0 %v4465_v30  ;;  %v5168_v22 = vld [vmem:[#allocation5 + $0x5c8] sm:$0xf]  ;;  %v5441_v25 = vor.u32 %v6854_v8, %v5440_v6  ;;  %v6786_v29 = vld [vmem:[#allocation5 + $0x5d4] sm:$0xf0]  ;;  %v5041_v36 = vor.u32 %v6754_v18, %v5040_v17 }
 0x139   :  { %3662 = vmatpush.bf16.msra.mxu1 %v4593_v33  ;;  %v5296_v30 = vld [vmem:[#allocation5 + $0x6c8] sm:$0xf]  ;;  %v6818_v31 = vld [vmem:[#allocation5 + $0x6d4] sm:$0xf0]  ;;  %v5169_v37 = vor.u32 %v6786_v29, %v5168_v22 }
 0x13a   :  { %3675 = vmatpush.bf16.msra.mxu2 %v4721_v34  ;;  %v5424_v33 = vld [vmem:[#allocation5 + $0x7c8] sm:$0xf]  ;;  %v6850_v34 = vld [vmem:[#allocation5 + $0x7d4] sm:$0xf0]  ;;  %v5297_v40 = vor.u32 %v6818_v31, %v5296_v30 }
 0x13b   :  { %3688 = vmatpush.bf16.msra.mxu3 %v4849_v42  ;;  %v5024_v42 = vld [vmem:[#allocation5 + $0x4a8] sm:$0xf]  ;;  %v6750_v43 = vld [vmem:[#allocation5 + $0x4b4] sm:$0xf0]  ;;  %v5425_v45 = vor.u32 %v6850_v34, %v5424_v33 }
 0x13c   :  { %3650 = vmatpush.bf16.msra.mxu0 %v4449_v47  ;;  %v5152_v44 = vld [vmem:[#allocation5 + $0x5a8] sm:$0xf]  ;;  %v6782_v46 = vld [vmem:[#allocation5 + $0x5b4] sm:$0xf0] }
 0x13d   :  { %3663 = vmatpush.bf16.msra.mxu1 %v4577_v50  ;;  %v5280_v63 = vld [vmem:[#allocation5 + $0x6a8] sm:$0xf]  ;;  %v6814_v47 = vld [vmem:[#allocation5 + $0x6b4] sm:$0xf0]  ;;  %v5025_v50 = vor.u32 %v6750_v43, %v5024_v42  ;;  %v5153_v52 = vor.u32 %v6782_v46, %v5152_v44 }
 0x13e   :  { %3676 = vmatpush.bf16.msra.mxu2 %v4705_v51  ;;  %v5408_v48 = vld [vmem:[#allocation5 + $0x7a8] sm:$0xf]  ;;  %v6846_v49 = vld [vmem:[#allocation5 + $0x7b4] sm:$0xf0]  ;;  %v5281_v55 = vor.u32 %v6814_v47, %v5280_v63 }
 0x13f   :  { %3689 = vmatpush.bf16.msra.mxu3 %v4833_v54  ;;  %v5008_v51 = vld [vmem:[#allocation5 + $0x488] sm:$0xf]  ;;  %v6746_v53 = vld [vmem:[#allocation5 + $0x494] sm:$0xf0]  ;;  %v5409_v58 = vor.u32 %v6846_v49, %v5408_v48 }
 0x140   :  { %3651 = vmatpush.bf16.msra.mxu0 %v4433_v1  ;;  %v5136_v54 = vld [vmem:[#allocation5 + $0x588] sm:$0xf]  ;;  %v6778_v59 = vld [vmem:[#allocation5 + $0x594] sm:$0xf0]  ;;  %v5009_v1 = vor.u32 %v6746_v53, %v5008_v51  ;;  %v3445_v2 = vpop.f32.mrf.mxu0 }
 0x141   :  { %3664 = vmatpush.bf16.msra.mxu1 %v4561_v4  ;;  %v5264_v60 = vld [vmem:[#allocation5 + $0x688] sm:$0xf]  ;;  %v6810_v61 = vld [vmem:[#allocation5 + $0x694] sm:$0xf0]  ;;  %v5137_v7 = vor.u32 %v6778_v59, %v5136_v54  ;;  %v3446_v8 = vadd.f32 %v3445_v2, %v661_v57 }
 0x142   :  { %3677 = vmatpush.bf16.msra.mxu2 %v4689_v5  ;;  %v5392_v62 = vld [vmem:[#allocation5 + $0x788] sm:$0xf]  ;;  %v6842_v0 = vld [vmem:[#allocation5 + $0x794] sm:$0xf0]  ;;  %v5265_v3 = vor.u32 %v6810_v61, %v5264_v60 }
 0x143   :  { %3690 = vmatpush.bf16.msra.mxu3 %v4817_v11  ;;  %3652 = vmatmul.bf16.vlgmr.msra.gmra.mxu0 %v7387_v10  ;;  %v4992_v4 = vld [vmem:[#allocation5 + $0x468] sm:$0xf]  ;;  %v6742_v5 = vld [vmem:[#allocation5 + $0x474] sm:$0xf0]  ;;  %v3458_v11 = vpop.f32.mrf.mxu1 }
 0x144   :  { %3696 = vmatpush.bf16.msrb.mxu0 %v5057_v12  ;;  %3665 = vmatmul.bf16.vlgmr.msra.gmra.mxu1 %v7394_v26  ;;  %v5120_v6 = vld [vmem:[#allocation5 + $0x568] sm:$0xf]  ;;  %v5393_v12 = vor.u32 %v6842_v0, %v5392_v62  ;;  %v6806_v17 = vld [vmem:[#allocation5 + $0x674] sm:$0xf0]  ;;  %v4993_v29 = vor.u32 %v6742_v5, %v4992_v4 }
 0x145   :  { %3709 = vmatpush.bf16.msrb.mxu1 %v5185_v13  ;;  %3678 = vmatmul.bf16.vlgmr.msra.gmra.mxu2 %v7385_v9  ;;  %v6774_v13 = vld [vmem:[#allocation5 + $0x574] sm:$0xf0]  ;;  %v5376_v18 = vld [vmem:[#allocation5 + $0x768] sm:$0xf] }
 0x146   :  { %3722 = vmatpush.bf16.msrb.mxu2 %v5313_v15  ;;  %3691 = vmatmul.bf16.vlgmr.msra.gmra.mxu3 %v7389_v16  ;;  %v5248_v15 = vld [vmem:[#allocation5 + $0x668] sm:$0xf]  ;;  %v6838_v22 = vld [vmem:[#allocation5 + $0x774] sm:$0xf0]  ;;  %v5121_v30 = vor.u32 %v6774_v13, %v5120_v6 }
 0x147   :  { %3735 = vmatpush.bf16.msrb.mxu3 %v5441_v25  ;;  %v3459_v25 = vadd.f32 %v3458_v11, %v3446_v8  ;;  %v5249_v31 = vor.u32 %v6806_v17, %v5248_v15  ;;  %v4976_v33 = vld [vmem:[#allocation5 + $0x448] sm:$0xf]  ;;  %v6738_v34 = vld [vmem:[#allocation5 + $0x454] sm:$0xf0] }
 0x148   :  { %3697 = vmatpush.bf16.msrb.mxu0 %v5041_v36  ;;  %v5104_v36 = vld [vmem:[#allocation5 + $0x548] sm:$0xf]  ;;  %v6770_v42 = vld [vmem:[#allocation5 + $0x554] sm:$0xf0]  ;;  %v4977_v48 = vor.u32 %v6738_v34, %v4976_v33 }
 0x149   :  { %3710 = vmatpush.bf16.msrb.mxu1 %v5169_v37  ;;  %v3471_v37 = vpop.f32.mrf.mxu2  ;;  %v5232_v43 = vld [vmem:[#allocation5 + $0x648] sm:$0xf]  ;;  %v6802_v44 = vld [vmem:[#allocation5 + $0x654] sm:$0xf0]  ;;  %v3484_v46 = vpop.f32.mrf.mxu3  ;;  %v5105_v51 = vor.u32 %v6770_v42, %v5104_v36 }
 0x14a   :  { %3723 = vmatpush.bf16.msrb.mxu2 %v5297_v40  ;;  %v5377_v40 = vor.u32 %v6838_v22, %v5376_v18  ;;  %v5360_v63 = vld [vmem:[#allocation5 + $0x748] sm:$0xf]  ;;  %v6834_v47 = vld [vmem:[#allocation5 + $0x754] sm:$0xf0] }
 0x14b   :  { %3736 = vmatpush.bf16.msrb.mxu3 %v5425_v45  ;;  %v3472_v45 = vadd.f32 %v3471_v37, %v3459_v25  ;;  %v6734_v53 = vld [vmem:[#allocation5 + $0x434] sm:$0xf0]  ;;  %v5088_v54 = vld [vmem:[#allocation5 + $0x528] sm:$0xf]  ;;  %v3460_v56 = vpop.f32.mrf.mxu1  ;;  %v5361_v57 = vor.u32 %v6834_v47, %v5360_v63 }
 0x14c   :  { %3698 = vmatpush.bf16.msrb.mxu0 %v5025_v50  ;;  %v3447_v50 = vpop.f32.mrf.mxu0  ;;  %v5216_v59 = vld [vmem:[#allocation5 + $0x628] sm:$0xf]  ;;  %v6798_v60 = vld [vmem:[#allocation5 + $0x634] sm:$0xf0] }
 0x14d   :  { %3711 = vmatpush.bf16.msrb.mxu1 %v5153_v52  ;;  %v7464_v49 = vadd.f32 %v3484_v46, %v3472_v45  ;;  %v5233_v52 = vor.u32 %v6802_v44, %v5232_v43  ;;  %v5344_v61 = vld [vmem:[#allocation5 + $0x728] sm:$0xf]  ;;  %v6830_v62 = vld [vmem:[#allocation5 + $0x734] sm:$0xf0] }
 0x14e   :  { %3724 = vmatpush.bf16.msrb.mxu2 %v5281_v55  ;;  %v4960_v55 = vld [vmem:[#allocation5 + $0x428] sm:$0xf]  ;;  %v6730_v2 = vld [vmem:[#allocation5 + $0x414] sm:$0xf0]  ;;  %v5345_v11 = vor.u32 %v6830_v62, %v5344_v61 }
 0x14f   :  { %3737 = vmatpush.bf16.msrb.mxu3 %v5409_v58  ;;  %v6766_v58 = vld [vmem:[#allocation5 + $0x534] sm:$0xf0]  ;;  %v4961_v0 = vor.u32 %v6734_v53, %v4960_v55  ;;  %v5072_v4 = vld [vmem:[#allocation5 + $0x508] sm:$0xf] }
 0x150   :  { %3699 = vmatpush.bf16.msrb.mxu0 %v5009_v1  ;;  %v4944_v1 = vld [vmem:[#allocation5 + $0x408] sm:$0xf]  ;;  %v6762_v5 = vld [vmem:[#allocation5 + $0x514] sm:$0xf0] }
 0x151   :  { %3712 = vmatpush.bf16.msrb.mxu1 %v5137_v7  ;;  %v5089_v7 = vor.u32 %v6766_v58, %v5088_v54  ;;  %v5200_v6 = vld [vmem:[#allocation5 + $0x608] sm:$0xf]  ;;  %v3473_v8 = vpop.f32.mrf.mxu2  ;;  %v6826_v15 = vld [vmem:[#allocation5 + $0x714] sm:$0xf0]  ;;  %v3486_v17 = vpop.f32.mrf.mxu3  ;;  %v5073_v34 = vor.u32 %v6762_v5, %v5072_v4 }
 0x152   :  { %3725 = vmatpush.bf16.msrb.mxu2 %v5265_v3  ;;  %v5217_v3 = vor.u32 %v6798_v60, %v5216_v59  ;;  %v5328_v13 = vld [vmem:[#allocation5 + $0x708] sm:$0xf]  ;;  %v6886_v22 = vld [vmem:[#allocation5 + $0x8f4] sm:$0xf0] }
 0x153   :  { %3738 = vmatpush.bf16.msrb.mxu3 %v5393_v12  ;;  %v6794_v12 = vld [vmem:[#allocation5 + $0x614] sm:$0xf0]  ;;  %v5568_v18 = vld [vmem:[#allocation5 + $0x8e8] sm:$0xf]  ;;  %v5329_v42 = vor.u32 %v6826_v15, %v5328_v13 }
 0x154   :  { %3700 = vmatpush.bf16.msrb.mxu0 %v4993_v29  ;;  %v5696_v25 = vld [vmem:[#allocation5 + $0x9e8] sm:$0xf]  ;;  %v4945_v29 = vor.u32 %v6730_v2, %v4944_v1  ;;  %v6950_v33 = vld [vmem:[#allocation5 + $0xaf4] sm:$0xf0]  ;;  %v5201_v36 = vor.u32 %v6794_v12, %v5200_v6  ;;  %v5569_v43 = vor.u32 %v6886_v22, %v5568_v18 }
 0x155   :  { %3713 = vmatpush.bf16.msrb.mxu1 %v5121_v30  ;;  %v6918_v30 = vld [vmem:[#allocation5 + $0x9f4] sm:$0xf0]  ;;  %v5952_v37 = vld [vmem:[#allocation5 + $0xbe8] sm:$0xf] }
 0x156   :  { %3726 = vmatpush.bf16.msrb.mxu2 %v5249_v31  ;;  %v5824_v31 = vld [vmem:[#allocation5 + $0xae8] sm:$0xf]  ;;  %v5697_v44 = vor.u32 %v6918_v30, %v5696_v25  ;;  %v6882_v63 = vld [vmem:[#allocation5 + $0x8d4] sm:$0xf0] }
 0x157   :  { %3739 = vmatpush.bf16.msrb.mxu3 %v5377_v40  ;;  %v6982_v40 = vld [vmem:[#allocation5 + $0xbf4] sm:$0xf0]  ;;  %v5825_v45 = vor.u32 %v6950_v33, %v5824_v31  ;;  %v5552_v46 = vld [vmem:[#allocation5 + $0x8c8] sm:$0xf] }
 0x158   :  { %3701 = vmatpush.bf16.msrb.mxu0 %v4977_v48  ;;  %v5680_v47 = vld [vmem:[#allocation5 + $0x9c8] sm:$0xf]  ;;  %v5953_v48 = vor.u32 %v6982_v40, %v5952_v37  ;;  %v6914_v50 = vld [vmem:[#allocation5 + $0x9d4] sm:$0xf0]  ;;  %v5553_v54 = vor.u32 %v6882_v63, %v5552_v46 }
 0x159   :  { %3714 = vmatpush.bf16.msrb.mxu1 %v5105_v51  ;;  %v5808_v51 = vld [vmem:[#allocation5 + $0xac8] sm:$0xf]  ;;  %v6978_v53 = vld [vmem:[#allocation5 + $0xbd4] sm:$0xf0]  ;;  %v5681_v56 = vor.u32 %v6914_v50, %v5680_v47 }
 0x15a   :  { %3727 = vmatpush.bf16.msrb.mxu2 %v5233_v52  ;;  %v6946_v52 = vld [vmem:[#allocation5 + $0xad4] sm:$0xf0]  ;;  %v5936_v55 = vld [vmem:[#allocation5 + $0xbc8] sm:$0xf] }
 0x15b   :  { %3740 = vmatpush.bf16.msrb.mxu3 %v5361_v57  ;;  %v5809_v57 = vor.u32 %v6946_v52, %v5808_v51  ;;  %v5536_v58 = vld [vmem:[#allocation5 + $0x8a8] sm:$0xf]  ;;  %v6878_v59 = vld [vmem:[#allocation5 + $0x8b4] sm:$0xf0]  ;;  %v5937_v61 = vor.u32 %v6978_v53, %v5936_v55 }
 0x15c   :  { %3702 = vmatpush.bf16.msrb.mxu0 %v4961_v0  ;;  %v5664_v60 = vld [vmem:[#allocation5 + $0x9a8] sm:$0xf]  ;;  %v6910_v62 = vld [vmem:[#allocation5 + $0x9b4] sm:$0xf0] }
 0x15d   :  { %3715 = vmatpush.bf16.msrb.mxu1 %v5089_v7  ;;  %v5792_v0 = vld [vmem:[#allocation5 + $0xaa8] sm:$0xf]  ;;  %v6942_v1 = vld [vmem:[#allocation5 + $0xab4] sm:$0xf0]  ;;  %v5665_v4 = vor.u32 %v6910_v62, %v5664_v60 }
 0x15e   :  { %3728 = vmatpush.bf16.msrb.mxu2 %v5217_v3  ;;  %v5920_v2 = vld [vmem:[#allocation5 + $0xba8] sm:$0xf]  ;;  %v6974_v7 = vld [vmem:[#allocation5 + $0xbb4] sm:$0xf0]  ;;  %v5537_v3 = vor.u32 %v6878_v59, %v5536_v58  ;;  %v5793_v5 = vor.u32 %v6942_v1, %v5792_v0 }
 0x15f   :  { %3741 = vmatpush.bf16.msrb.mxu3 %v5345_v11  ;;  %v5520_v6 = vld [vmem:[#allocation5 + $0x888] sm:$0xf]  ;;  %v6874_v8 = vld [vmem:[#allocation5 + $0x894] sm:$0xf0]  ;;  %v5921_v12 = vor.u32 %v6974_v7, %v5920_v2 }
 0x160   :  { %3703 = vmatpush.bf16.msrb.mxu0 %v4945_v29  ;;  %v5648_v11 = vld [vmem:[#allocation5 + $0x988] sm:$0xf]  ;;  %v6906_v13 = vld [vmem:[#allocation5 + $0x994] sm:$0xf0]  ;;  %v5521_v25 = vor.u32 %v6874_v8, %v5520_v6  ;;  %v3497_v29 = vpop.f32.mrf.mxu0 }
 0x161   :  { %3716 = vmatpush.bf16.msrb.mxu1 %v5073_v34  ;;  %v5776_v15 = vld [vmem:[#allocation5 + $0xa88] sm:$0xf]  ;;  %v6938_v17 = vld [vmem:[#allocation5 + $0xa94] sm:$0xf0]  ;;  %v5649_v30 = vor.u32 %v6906_v13, %v5648_v11  ;;  %v3498_v37 = vadd.f32 %v3497_v29, %v7464_v49  ;;  %v3510_v40 = vpop.f32.mrf.mxu1 }
 0x162   :  { %3729 = vmatpush.bf16.msrb.mxu2 %v5201_v36  ;;  %v5904_v18 = vld [vmem:[#allocation5 + $0xb88] sm:$0xf]  ;;  %v6970_v22 = vld [vmem:[#allocation5 + $0xb94] sm:$0xf0]  ;;  %v5777_v31 = vor.u32 %v6938_v17, %v5776_v15 }
 0x163   :  { %3742 = vmatpush.bf16.msrb.mxu3 %v5329_v42  ;;  %3704 = vmatmul.bf16.vlgmr.msrb.gmra.mxu0 %v7399_v38  ;;  %v5504_v33 = vld [vmem:[#allocation5 + $0x868] sm:$0xf]  ;;  %v6870_v34 = vld [vmem:[#allocation5 + $0x874] sm:$0xf0]  ;;  %v5905_v42 = vor.u32 %v6970_v22, %v5904_v18  ;;  %v3511_v47 = vadd.f32 %v3510_v40, %v3498_v37 }
 0x164   :  { %3748 = vmatpush.bf16.msra.mxu0 %v5569_v43  ;;  %3717 = vmatmul.bf16.vlgmr.msrb.gmra.mxu1 %v7403_v41  ;;  %v5632_v36 = vld [vmem:[#allocation5 + $0x968] sm:$0xf]  ;;  %v6902_v43 = vld [vmem:[#allocation5 + $0x974] sm:$0xf0] }
 0x165   :  { %3761 = vmatpush.bf16.msra.mxu1 %v5697_v44  ;;  %3730 = vmatmul.bf16.vlgmr.msrb.gmra.mxu2 %v7397_v35  ;;  %v5760_v44 = vld [vmem:[#allocation5 + $0xa68] sm:$0xf]  ;;  %v6966_v63 = vld [vmem:[#allocation5 + $0xb74] sm:$0xf0]  ;;  %v5633_v50 = vor.u32 %v6902_v43, %v5632_v36 }
 0x166   :  { %3774 = vmatpush.bf16.msra.mxu2 %v5825_v45  ;;  %3743 = vmatmul.bf16.vlgmr.msrb.gmra.mxu3 %v7401_v39  ;;  %v6934_v45 = vld [vmem:[#allocation5 + $0xa74] sm:$0xf0]  ;;  %v5888_v46 = vld [vmem:[#allocation5 + $0xb68] sm:$0xf] }
 0x167   :  { %3787 = vmatpush.bf16.msra.mxu3 %v5953_v48  ;;  %v5505_v48 = vor.u32 %v6870_v34, %v5504_v33  ;;  %v5761_v51 = vor.u32 %v6934_v45, %v5760_v44  ;;  %v5488_v52 = vld [vmem:[#allocation5 + $0x848] sm:$0xf]  ;;  %v6866_v55 = vld [vmem:[#allocation5 + $0x854] sm:$0xf0]  ;;  %v5889_v49 = vor.u32 %v6966_v63, %v5888_v46 }
 0x168   :  { %3749 = vmatpush.bf16.msra.mxu0 %v5553_v54  ;;  %v5616_v53 = vld [vmem:[#allocation5 + $0x948] sm:$0xf]  ;;  %v3523_v54 = vpop.f32.mrf.mxu2  ;;  %v6930_v58 = vld [vmem:[#allocation5 + $0xa54] sm:$0xf0]  ;;  %v5489_v0 = vor.u32 %v6866_v55, %v5488_v52  ;;  %v3499_v2 = vpop.f32.mrf.mxu0 }
 0x169   :  { %3762 = vmatpush.bf16.msra.mxu1 %v5681_v56  ;;  %v6898_v56 = vld [vmem:[#allocation5 + $0x954] sm:$0xf0]  ;;  %v3524_v59 = vadd.f32 %v3523_v54, %v3511_v47  ;;  %v3536_v60 = vpop.f32.mrf.mxu3  ;;  %v5600_v6 = vld [vmem:[#allocation5 + $0x928] sm:$0xf]  ;;  %v3512_v8 = vpop.f32.mrf.mxu1 }
 0x16a   :  { %3775 = vmatpush.bf16.msra.mxu2 %v5809_v57  ;;  %v5744_v57 = vld [vmem:[#allocation5 + $0xa48] sm:$0xf]  ;;  %v6962_v62 = vld [vmem:[#allocation5 + $0xb54] sm:$0xf0]  ;;  %v5617_v7 = vor.u32 %v6898_v56, %v5616_v53 }
 0x16b   :  { %3788 = vmatpush.bf16.msra.mxu3 %v5937_v61  ;;  %v5872_v61 = vld [vmem:[#allocation5 + $0xb48] sm:$0xf]  ;;  %v7471_v1 = vadd.f32 %v3536_v60, %v3524_v59  ;;  %v6926_v15 = vld [vmem:[#allocation5 + $0xa34] sm:$0xf0] }
 0x16c   :  { %3750 = vmatpush.bf16.msra.mxu0 %v5537_v3  ;;  %v5745_v3 = vor.u32 %v6930_v58, %v5744_v57  ;;  %v5873_v11 = vor.u32 %v6962_v62, %v5872_v61  ;;  %v5728_v13 = vld [vmem:[#allocation5 + $0xa28] sm:$0xf]  ;;  %v6958_v18 = vld [vmem:[#allocation5 + $0xb34] sm:$0xf0] }
 0x16d   :  { %3763 = vmatpush.bf16.msra.mxu1 %v5665_v4  ;;  %v5472_v4 = vld [vmem:[#allocation5 + $0x828] sm:$0xf]  ;;  %v6858_v29 = vld [vmem:[#allocation5 + $0x814] sm:$0xf0] }
 0x16e   :  { %3776 = vmatpush.bf16.msra.mxu2 %v5793_v5  ;;  %v6862_v5 = vld [vmem:[#allocation5 + $0x834] sm:$0xf0]  ;;  %v5856_v17 = vld [vmem:[#allocation5 + $0xb28] sm:$0xf] }
 0x16f   :  { %3789 = vmatpush.bf16.msra.mxu3 %v5921_v12  ;;  %v6894_v12 = vld [vmem:[#allocation5 + $0x934] sm:$0xf0]  ;;  %v5473_v22 = vor.u32 %v6862_v5, %v5472_v4  ;;  %v5584_v33 = vld [vmem:[#allocation5 + $0x908] sm:$0xf]  ;;  %v5857_v40 = vor.u32 %v6958_v18, %v5856_v17 }
 0x170   :  { %3751 = vmatpush.bf16.msra.mxu0 %v5521_v25  ;;  %v5456_v25 = vld [vmem:[#allocation5 + $0x808] sm:$0xf]  ;;  %v6890_v34 = vld [vmem:[#allocation5 + $0x914] sm:$0xf0]  ;;  %v3525_v37 = vpop.f32.mrf.mxu2 }
 0x171   :  { %3764 = vmatpush.bf16.msra.mxu1 %v5649_v30  ;;  %v5601_v30 = vor.u32 %v6894_v12, %v5600_v6  ;;  %v5712_v36 = vld [vmem:[#allocation5 + $0xa08] sm:$0xf]  ;;  %v6954_v44 = vld [vmem:[#allocation5 + $0xb14] sm:$0xf0]  ;;  %v3538_v45 = vpop.f32.mrf.mxu3  ;;  %v5585_v55 = vor.u32 %v6890_v34, %v5584_v33 }
 0x172   :  { %3777 = vmatpush.bf16.msra.mxu2 %v5777_v31  ;;  %v5729_v31 = vor.u32 %v6926_v15, %v5728_v13  ;;  %v5840_v43 = vld [vmem:[#allocation5 + $0xb08] sm:$0xf]  ;;  %v7014_v63 = vld [vmem:[#allocation5 + $0xcf4] sm:$0xf0] }
 0x173   :  { %3790 = vmatpush.bf16.msra.mxu3 %v5905_v42  ;;  %v6922_v42 = vld [vmem:[#allocation5 + $0xa14] sm:$0xf0]  ;;  %v6080_v46 = vld [vmem:[#allocation5 + $0xce8] sm:$0xf]  ;;  %v5841_v56 = vor.u32 %v6954_v44, %v5840_v43 }
 0x174   :  { %3752 = vmatpush.bf16.msra.mxu0 %v5505_v48  ;;  %v6208_v47 = vld [vmem:[#allocation5 + $0xde8] sm:$0xf]  ;;  %v5457_v48 = vor.u32 %v6858_v29, %v5456_v25  ;;  %v7078_v52 = vld [vmem:[#allocation5 + $0xef4] sm:$0xf0]  ;;  %v5713_v53 = vor.u32 %v6922_v42, %v5712_v36  ;;  %v6081_v57 = vor.u32 %v7014_v63, %v6080_v46 }
 0x175   :  { %3765 = vmatpush.bf16.msra.mxu1 %v5633_v50  ;;  %v7046_v50 = vld [vmem:[#allocation5 + $0xdf4] sm:$0xf0]  ;;  %v6464_v54 = vld [vmem:[#allocation5 + $0xfe8] sm:$0xf] }
 0x176   :  { %3778 = vmatpush.bf16.msra.mxu2 %v5761_v51  ;;  %v6336_v51 = vld [vmem:[#allocation5 + $0xee8] sm:$0xf]  ;;  %v6209_v58 = vor.u32 %v7046_v50, %v6208_v47  ;;  %v7010_v61 = vld [vmem:[#allocation5 + $0xcd4] sm:$0xf0] }
 0x177   :  { %3791 = vmatpush.bf16.msra.mxu3 %v5889_v49  ;;  %v7110_v49 = vld [vmem:[#allocation5 + $0xff4] sm:$0xf0]  ;;  %v6337_v59 = vor.u32 %v7078_v52, %v6336_v51  ;;  %v6064_v60 = vld [vmem:[#allocation5 + $0xcc8] sm:$0xf] }
 0x178   :  { %3753 = vmatpush.bf16.msra.mxu0 %v5489_v0  ;;  %v6192_v62 = vld [vmem:[#allocation5 + $0xdc8] sm:$0xf]  ;;  %v6465_v0 = vor.u32 %v7110_v49, %v6464_v54  ;;  %v7042_v2 = vld [vmem:[#allocation5 + $0xdd4] sm:$0xf0]  ;;  %v6065_v6 = vor.u32 %v7010_v61, %v6064_v60 }
 0x179   :  { %3766 = vmatpush.bf16.msra.mxu1 %v5617_v7  ;;  %v6320_v7 = vld [vmem:[#allocation5 + $0xec8] sm:$0xf]  ;;  %v7106_v5 = vld [vmem:[#allocation5 + $0xfd4] sm:$0xf0]  ;;  %v6193_v8 = vor.u32 %v7042_v2, %v6192_v62 }
 0x17a   :  { %3779 = vmatpush.bf16.msra.mxu2 %v5745_v3  ;;  %v7074_v3 = vld [vmem:[#allocation5 + $0xed4] sm:$0xf0]  ;;  %v6448_v4 = vld [vmem:[#allocation5 + $0xfc8] sm:$0xf] }
 0x17b   :  { %3792 = vmatpush.bf16.msra.mxu3 %v5873_v11  ;;  %v6321_v11 = vor.u32 %v7074_v3, %v6320_v7  ;;  %v6048_v12 = vld [vmem:[#allocation5 + $0xca8] sm:$0xf]  ;;  %v7006_v13 = vld [vmem:[#allocation5 + $0xcb4] sm:$0xf0]  ;;  %v6449_v17 = vor.u32 %v7106_v5, %v6448_v4 }
 0x17c   :  { %3754 = vmatpush.bf16.msra.mxu0 %v5473_v22  ;;  %v6176_v15 = vld [vmem:[#allocation5 + $0xda8] sm:$0xf]  ;;  %v7038_v18 = vld [vmem:[#allocation5 + $0xdb4] sm:$0xf0] }
 0x17d   :  { %3767 = vmatpush.bf16.msra.mxu1 %v5601_v30  ;;  %v6304_v22 = vld [vmem:[#allocation5 + $0xea8] sm:$0xf]  ;;  %v7070_v25 = vld [vmem:[#allocation5 + $0xeb4] sm:$0xf0]  ;;  %v6177_v33 = vor.u32 %v7038_v18, %v6176_v15 }
 0x17e   :  { %3780 = vmatpush.bf16.msra.mxu2 %v5729_v31  ;;  %v6432_v29 = vld [vmem:[#allocation5 + $0xfa8] sm:$0xf]  ;;  %v7102_v30 = vld [vmem:[#allocation5 + $0xfb4] sm:$0xf0]  ;;  %v6049_v31 = vor.u32 %v7006_v13, %v6048_v12  ;;  %v6305_v34 = vor.u32 %v7070_v25, %v6304_v22 }
 0x17f   :  { %3793 = vmatpush.bf16.msra.mxu3 %v5857_v40  ;;  %v6032_v36 = vld [vmem:[#allocation5 + $0xc88] sm:$0xf]  ;;  %v7002_v37 = vld [vmem:[#allocation5 + $0xc94] sm:$0xf0]  ;;  %v6433_v42 = vor.u32 %v7102_v30, %v6432_v29 }
 0x180   :  { %3755 = vmatpush.bf16.msra.mxu0 %v5457_v48  ;;  %v6160_v40 = vld [vmem:[#allocation5 + $0xd88] sm:$0xf]  ;;  %v7034_v43 = vld [vmem:[#allocation5 + $0xd94] sm:$0xf0]  ;;  %v3549_v46 = vpop.f32.mrf.mxu0  ;;  %v6033_v50 = vor.u32 %v7002_v37, %v6032_v36 }
 0x181   :  { %3768 = vmatpush.bf16.msra.mxu1 %v5585_v55  ;;  %v6288_v44 = vld [vmem:[#allocation5 + $0xe88] sm:$0xf]  ;;  %v7066_v45 = vld [vmem:[#allocation5 + $0xe94] sm:$0xf0]  ;;  %v3550_v48 = vadd.f32 %v3549_v46, %v7471_v1  ;;  %v3562_v51 = vpop.f32.mrf.mxu1  ;;  %v6161_v52 = vor.u32 %v7034_v43, %v6160_v40 }
 0x182   :  { %3781 = vmatpush.bf16.msra.mxu2 %v5713_v53  ;;  %v6416_v63 = vld [vmem:[#allocation5 + $0xf88] sm:$0xf]  ;;  %v7098_v47 = vld [vmem:[#allocation5 + $0xf94] sm:$0xf0]  ;;  %v6289_v55 = vor.u32 %v7066_v45, %v6288_v44 }
 0x183   :  { %3794 = vmatpush.bf16.msra.mxu3 %v5841_v56  ;;  %3756 = vmatmul.bf16.vlgmr.msra.gmra.mxu0 %v7409_v19  ;;  %v6016_v53 = vld [vmem:[#allocation5 + $0xc68] sm:$0xf]  ;;  %v6998_v54 = vld [vmem:[#allocation5 + $0xc74] sm:$0xf0]  ;;  %v6417_v56 = vor.u32 %v7098_v47, %v6416_v63 }
 0x184   :  { %3800 = vmatpush.bf16.msrb.mxu0 %v6081_v57  ;;  %3769 = vmatmul.bf16.vlgmr.msra.gmra.mxu1 %v7413_v24  ;;  %v6144_v49 = vld [vmem:[#allocation5 + $0xd68] sm:$0xf]  ;;  %v3563_v57 = vadd.f32 %v3562_v51, %v3550_v48  ;;  %v7062_v60 = vld [vmem:[#allocation5 + $0xe74] sm:$0xf0] }
 0x185   :  { %3813 = vmatpush.bf16.msrb.mxu1 %v6209_v58  ;;  %3782 = vmatmul.bf16.vlgmr.msra.gmra.mxu2 %v7411_v23  ;;  %v7030_v58 = vld [vmem:[#allocation5 + $0xd74] sm:$0xf0]  ;;  %v6400_v61 = vld [vmem:[#allocation5 + $0xf68] sm:$0xf] }
 0x186   :  { %3826 = vmatpush.bf16.msrb.mxu2 %v6337_v59  ;;  %3795 = vmatmul.bf16.vlgmr.msra.gmra.mxu3 %v7415_v28  ;;  %v6272_v59 = vld [vmem:[#allocation5 + $0xe68] sm:$0xf]  ;;  %v7094_v62 = vld [vmem:[#allocation5 + $0xf74] sm:$0xf0]  ;;  %v6145_v1 = vor.u32 %v7030_v58, %v6144_v49 }
 0x187   :  { %3839 = vmatpush.bf16.msrb.mxu3 %v6465_v0  ;;  %v6017_v0 = vor.u32 %v6998_v54, %v6016_v53  ;;  %v6273_v2 = vor.u32 %v7062_v60, %v6272_v59  ;;  %v6000_v7 = vld [vmem:[#allocation5 + $0xc48] sm:$0xf]  ;;  %v6994_v3 = vld [vmem:[#allocation5 + $0xc54] sm:$0xf0]  ;;  %v6401_v5 = vor.u32 %v7094_v62, %v6400_v61  ;;  %v6628_v59 = vld [vmem:[#allocation5 + $0xec] sm:$0xf] }
 0x188   :  { %3801 = vmatpush.bf16.msrb.mxu0 %v6065_v6  ;;  %v6128_v4 = vld [vmem:[#allocation5 + $0xd48] sm:$0xf]  ;;  %v3575_v6 = vpop.f32.mrf.mxu2  ;;  %v7058_v12 = vld [vmem:[#allocation5 + $0xe54] sm:$0xf0]  ;;  %v3551_v22 = vpop.f32.mrf.mxu0  ;;  %v6001_v25 = vor.u32 %v6994_v3, %v6000_v7  ;;  %v4546_v60 = vld [vmem:[#allocation5 + $0xf8] sm:$0xf0] }
 0x189   :  { %3814 = vmatpush.bf16.msrb.mxu1 %v6193_v8  ;;  %v7026_v8 = vld [vmem:[#allocation5 + $0xd54] sm:$0xf0]  ;;  %v3576_v13 = vadd.f32 %v3575_v6, %v3563_v57  ;;  %v3588_v15 = vpop.f32.mrf.mxu3  ;;  %v3564_v29 = vpop.f32.mrf.mxu1  ;;  %v6112_v37 = vld [vmem:[#allocation5 + $0xd28] sm:$0xf]  ;;  %v6660_v61 = vld [vmem:[#allocation5 + $0x1ec] sm:$0xf] }
 0x18a   :  { %3827 = vmatpush.bf16.msrb.mxu2 %v6321_v11  ;;  %v6256_v11 = vld [vmem:[#allocation5 + $0xe48] sm:$0xf]  ;;  %v7090_v18 = vld [vmem:[#allocation5 + $0xf54] sm:$0xf0]  ;;  %v4802_v7 = vld [vmem:[#allocation5 + $0x2f8] sm:$0xf0] }
 0x18b   :  { %3840 = vmatpush.bf16.msrb.mxu3 %v6449_v17  ;;  %v6384_v17 = vld [vmem:[#allocation5 + $0xf48] sm:$0xf]  ;;  %v7478_v30 = vadd.f32 %v3588_v15, %v3576_v13  ;;  %v6990_v36 = vld [vmem:[#allocation5 + $0xc34] sm:$0xf0]  ;;  %v4930_v6 = vld [vmem:[#allocation5 + $0x3f8] sm:$0xf0] }
 0x18c   :  { %3802 = vmatpush.bf16.msrb.mxu0 %v6049_v31  ;;  %v6129_v31 = vor.u32 %v7026_v8, %v6128_v4  ;;  %v6385_v40 = vor.u32 %v7090_v18, %v6384_v17  ;;  %v6240_v43 = vld [vmem:[#allocation5 + $0xe28] sm:$0xf]  ;;  %v7054_v44 = vld [vmem:[#allocation5 + $0xe34] sm:$0xf0]  ;;  %v6624_v15 = vld [vmem:[#allocation5 + $0xcc] sm:$0xf] }
 0x18d   :  { %3815 = vmatpush.bf16.msrb.mxu1 %v6177_v33  ;;  %v6257_v33 = vor.u32 %v7058_v12, %v6256_v11  ;;  %v6368_v45 = vld [vmem:[#allocation5 + $0xf28] sm:$0xf]  ;;  %v7086_v46 = vld [vmem:[#allocation5 + $0xf34] sm:$0xf0]  ;;  %v6241_v51 = vor.u32 %v7054_v44, %v6240_v43  ;;  %v4549_v11 = vor.u32 %v6628_v59, %v4546_v60  ;;  %v4530_v17 = vld [vmem:[#allocation5 + $0xd8] sm:$0xf0] }
 0x18e   :  { %3828 = vmatpush.bf16.msrb.mxu2 %v6305_v34  ;;  %v5984_v34 = vld [vmem:[#allocation5 + $0xc28] sm:$0xf]  ;;  %v6986_v48 = vld [vmem:[#allocation5 + $0xc14] sm:$0xf0]  ;;  %v6369_v54 = vor.u32 %v7086_v46, %v6368_v45  ;;  %v6656_v18 = vld [vmem:[#allocation5 + $0x1cc] sm:$0xf] }
 0x18f   :  { %3841 = vmatpush.bf16.msrb.mxu3 %v6433_v42  ;;  %v7022_v42 = vld [vmem:[#allocation5 + $0xd34] sm:$0xf0]  ;;  %v5985_v63 = vor.u32 %v6990_v36, %v5984_v34  ;;  %v5968_v47 = vld [vmem:[#allocation5 + $0xc08] sm:$0xf]  ;;  %v6688_v29 = vld [vmem:[#allocation5 + $0x2cc] sm:$0xf]  ;;  %v4533_v36 = vor.u32 %v6624_v15, %v4530_v17 }
 0x190   :  { %3803 = vmatpush.bf16.msrb.mxu0 %v6033_v50  ;;  %v6113_v50 = vor.u32 %v7022_v42, %v6112_v37  ;;  %v6224_v53 = vld [vmem:[#allocation5 + $0xe08] sm:$0xf]  ;;  %v7050_v49 = vld [vmem:[#allocation5 + $0xe14] sm:$0xf0]  ;;  %v3577_v58 = vpop.f32.mrf.mxu2  ;;  %v4914_v34 = vld [vmem:[#allocation5 + $0x3d8] sm:$0xf0] }
 0x191   :  { %3816 = vmatpush.bf16.msrb.mxu1 %v6161_v52  ;;  %v6096_v52 = vld [vmem:[#allocation5 + $0xd08] sm:$0xf]  ;;  %v7082_v57 = vld [vmem:[#allocation5 + $0xf14] sm:$0xf0]  ;;  %v3590_v62 = vpop.f32.mrf.mxu3  ;;  %v6225_v4 = vor.u32 %v7050_v49, %v6224_v53  ;;  %v6620_v42 = vld [vmem:[#allocation5 + $0xac] sm:$0xf] }
 0x192   :  { %3829 = vmatpush.bf16.msrb.mxu2 %v6289_v55  ;;  %v7018_v55 = vld [vmem:[#allocation5 + $0xd14] sm:$0xf0]  ;;  %v4514_v43 = vld [vmem:[#allocation5 + $0xb8] sm:$0xf0]  ;;  %v6652_v44 = vld [vmem:[#allocation5 + $0x1ac] sm:$0xf] }
 0x193   :  { %3842 = vmatpush.bf16.msrb.mxu3 %v6417_v56  ;;  %v6352_v56 = vld [vmem:[#allocation5 + $0xf08] sm:$0xf]  ;;  %v6097_v3 = vor.u32 %v7018_v55, %v6096_v52  ;;  %v4642_v46 = vld [vmem:[#allocation5 + $0x1b8] sm:$0xf0]  ;;  %v6616_v53 = vld [vmem:[#allocation5 + $0x8c] sm:$0xf] }
 0x194   :  { %3804 = vmatpush.bf16.msrb.mxu0 %v6017_v0  ;;  %v5969_v0 = vor.u32 %v6986_v48, %v5968_v47  ;;  %v6353_v8 = vor.u32 %v7082_v57, %v6352_v56  ;;  %v4770_v47 = vld [vmem:[#allocation5 + $0x2b8] sm:$0xf0]  ;;  %v6716_v48 = vld [vmem:[#allocation5 + $0x3ac] sm:$0xf]  ;;  %v4645_v52 = vor.u32 %v6652_v44, %v4642_v46 }
 0x195   :  { %3817 = vmatpush.bf16.msrb.mxu1 %v6145_v1  ;;  %v4674_v1 = vld [vmem:[#allocation5 + $0x1f8] sm:$0xf0]  ;;  %v6648_v49 = vld [vmem:[#allocation5 + $0x18c] sm:$0xf] }
 0x196   :  { %3830 = vmatpush.bf16.msrb.mxu2 %v6273_v2  ;;  %v6692_v2 = vld [vmem:[#allocation5 + $0x2ec] sm:$0xf]  ;;  %v4677_v12 = vor.u32 %v6660_v61, %v4674_v1  ;;  %v4626_v57 = vld [vmem:[#allocation5 + $0x198] sm:$0xf0] }
 0x197   :  { %3843 = vmatpush.bf16.msrb.mxu3 %v6401_v5  ;;  %v6724_v5 = vld [vmem:[#allocation5 + $0x3ec] sm:$0xf]  ;;  %v4805_v13 = vor.u32 %v6692_v2, %v4802_v7  ;;  %v4754_v59 = vld [vmem:[#allocation5 + $0x298] sm:$0xf0]  ;;  %v4629_v7 = vor.u32 %v6648_v49, %v4626_v57 }
 0x198   :  { %3805 = vmatpush.bf16.msrb.mxu0 %v6001_v25  ;;  %v4933_v22 = vor.u32 %v6724_v5, %v4930_v6  ;;  %v4658_v25 = vld [vmem:[#allocation5 + $0x1d8] sm:$0xf0]  ;;  %v6680_v58 = vld [vmem:[#allocation5 + $0x28c] sm:$0xf] }
 0x199   :  { %3818 = vmatpush.bf16.msrb.mxu1 %v6129_v31  ;;  %v4786_v31 = vld [vmem:[#allocation5 + $0x2d8] sm:$0xf0]  ;;  %v4661_v37 = vor.u32 %v6656_v18, %v4658_v25  ;;  %v6712_v61 = vld [vmem:[#allocation5 + $0x38c] sm:$0xf] }
 0x19a   :  { %3831 = vmatpush.bf16.msrb.mxu2 %v6257_v33  ;;  %v6720_v33 = vld [vmem:[#allocation5 + $0x3cc] sm:$0xf]  ;;  %v4882_v62 = vld [vmem:[#allocation5 + $0x398] sm:$0xf0] }
 0x19b   :  { %3844 = vmatpush.bf16.msrb.mxu3 %v6385_v40  ;;  %v4789_v40 = vor.u32 %v6688_v29, %v4786_v31  ;;  %v4917_v45 = vor.u32 %v6720_v33, %v4914_v34  ;;  %v4482_v5 = vld [vmem:[#allocation5 + $0x78] sm:$0xf0]  ;;  %v6644_v6 = vld [vmem:[#allocation5 + $0x16c] sm:$0xf] }
 0x19c   :  { %3806 = vmatpush.bf16.msrb.mxu0 %v5985_v63  ;;  %v6684_v63 = vld [vmem:[#allocation5 + $0x2ac] sm:$0xf]  ;;  %v4738_v15 = vld [vmem:[#allocation5 + $0x278] sm:$0xf0] }
 0x19d   :  { %3819 = vmatpush.bf16.msrb.mxu1 %v6113_v50  ;;  %v4898_v50 = vld [vmem:[#allocation5 + $0x3b8] sm:$0xf0]  ;;  %v4773_v55 = vor.u32 %v6684_v63, %v4770_v47  ;;  %v6708_v17 = vld [vmem:[#allocation5 + $0x36c] sm:$0xf] }
 0x19e   :  { %3832 = vmatpush.bf16.msrb.mxu2 %v6241_v51  ;;  %v4517_v51 = vor.u32 %v6620_v42, %v4514_v43  ;;  %v4901_v56 = vor.u32 %v6716_v48, %v4898_v50  ;;  %v4866_v18 = vld [vmem:[#allocation5 + $0x378] sm:$0xf0]  ;;  %v6608_v29 = vld [vmem:[#allocation5 + $0x4c] sm:$0xf] }
 0x19f   :  { %3845 = vmatpush.bf16.msrb.mxu3 %v6369_v54  ;;  %v4498_v54 = vld [vmem:[#allocation5 + $0x98] sm:$0xf0]  ;;  %v6640_v33 = vld [vmem:[#allocation5 + $0x14c] sm:$0xf]  ;;  %v4869_v34 = vor.u32 %v6708_v17, %v4866_v18 }
 0x1a0   :  { %3807 = vmatpush.bf16.msrb.mxu0 %v5969_v0  ;;  %v3601_v60 = vpop.f32.mrf.mxu0  ;;  %v4501_v1 = vor.u32 %v6616_v53, %v4498_v54  ;;  %v4466_v31 = vld [vmem:[#allocation5 + $0x58] sm:$0xf0]  ;;  %v6636_v54 = vld [vmem:[#allocation5 + $0x12c] sm:$0xf] }
 0x1a1   :  { %3820 = vmatpush.bf16.msrb.mxu1 %v6097_v3  ;;  %v3602_v0 = vadd.f32 %v3601_v60, %v7478_v30  ;;  %v3614_v2 = vpop.f32.mrf.mxu1  ;;  %v4757_v3 = vor.u32 %v6680_v58, %v4754_v59  ;;  %v4722_v42 = vld [vmem:[#allocation5 + $0x258] sm:$0xf0]  ;;  %v4469_v47 = vor.u32 %v6608_v29, %v4466_v31  ;;  %v6668_v57 = vld [vmem:[#allocation5 + $0x22c] sm:$0xf] }
 0x1a2   :  { %3833 = vmatpush.bf16.msrb.mxu2 %v6225_v4  ;;  %v6612_v4 = vld [vmem:[#allocation5 + $0x6c] sm:$0xf]  ;;  %v4850_v46 = vld [vmem:[#allocation5 + $0x358] sm:$0xf0] }
 0x1a3   :  { %3846 = vmatpush.bf16.msrb.mxu3 %v6353_v8  ;;  %3808 = vmatmul.bf16.vlgmr.msrb.gmra.mxu0 %v7421_v14  ;;  %v4885_v8 = vor.u32 %v6712_v61, %v4882_v62  ;;  %v4450_v53 = vld [vmem:[#allocation5 + $0x38] sm:$0xf0]  ;;  %v6700_v59 = vld [vmem:[#allocation5 + $0x32c] sm:$0xf] }
 0x1a4   :  { %3852 = vmatpush.bf16.msra.mxu0 %v4549_v11  ;;  %3821 = vmatmul.bf16.vlgmr.msrb.gmra.mxu1 %v7425_v21  ;;  %v3615_v11 = vadd.f32 %v3614_v2, %v3602_v0  ;;  %v4706_v58 = vld [vmem:[#allocation5 + $0x238] sm:$0xf0]  ;;  %v6600_v62 = vld [vmem:[#allocation5 + $0xc] sm:$0xf] }
 0x1a5   :  { %3865 = vmatpush.bf16.msra.mxu1 %v4677_v12  ;;  %3834 = vmatmul.bf16.vlgmr.msrb.gmra.mxu2 %v7423_v20  ;;  %v4610_v12 = vld [vmem:[#allocation5 + $0x178] sm:$0xf0]  ;;  %v4709_v2 = vor.u32 %v6668_v57, %v4706_v58  ;;  %v6788_v17 = vld [vmem:[#allocation5 + $0x5ec] sm:$0xf] }
 0x1a6   :  { %3878 = vmatpush.bf16.msra.mxu2 %v4805_v13  ;;  %3847 = vmatmul.bf16.vlgmr.msrb.gmra.mxu3 %v7427_v27  ;;  %v6676_v13 = vld [vmem:[#allocation5 + $0x26c] sm:$0xf]  ;;  %v4613_v30 = vor.u32 %v6644_v6, %v4610_v12  ;;  %v4834_v60 = vld [vmem:[#allocation5 + $0x338] sm:$0xf0] }
 0x1a7   :  { %3891 = vmatpush.bf16.msra.mxu3 %v4933_v22  ;;  %v4485_v22 = vor.u32 %v6612_v4, %v4482_v5  ;;  %v4741_v25 = vor.u32 %v6676_v13, %v4738_v15  ;;  %v4434_v0 = vld [vmem:[#allocation5 + $0x18] sm:$0xf0]  ;;  %v6664_v4 = vld [vmem:[#allocation5 + $0x20c] sm:$0xf]  ;;  %v4837_v5 = vor.u32 %v6700_v59, %v4834_v60 }
 0x1a8   :  { %3853 = vmatpush.bf16.msra.mxu0 %v4533_v36  ;;  %v3627_v36 = vpop.f32.mrf.mxu2  ;;  %v3603_v63 = vpop.f32.mrf.mxu0  ;;  %v4690_v6 = vld [vmem:[#allocation5 + $0x218] sm:$0xf0]  ;;  %v6756_v13 = vld [vmem:[#allocation5 + $0x4ec] sm:$0xf] }
 0x1a9   :  { %3866 = vmatpush.bf16.msra.mxu1 %v4661_v37  ;;  %v4594_v37 = vld [vmem:[#allocation5 + $0x158] sm:$0xf0]  ;;  %v3628_v43 = vadd.f32 %v3627_v36, %v3615_v11  ;;  %v3640_v44 = vpop.f32.mrf.mxu3  ;;  %v3616_v48 = vpop.f32.mrf.mxu1  ;;  %v6780_v58 = vld [vmem:[#allocation5 + $0x5ac] sm:$0xf] }
 0x1aa   :  { %3879 = vmatpush.bf16.msra.mxu2 %v4789_v40  ;;  %v6672_v40 = vld [vmem:[#allocation5 + $0x24c] sm:$0xf]  ;;  %v4818_v11 = vld [vmem:[#allocation5 + $0x318] sm:$0xf0] }
 0x1ab   :  { %3892 = vmatpush.bf16.msra.mxu3 %v4917_v45  ;;  %v6704_v45 = vld [vmem:[#allocation5 + $0x34c] sm:$0xf]  ;;  %v7485_v50 = vadd.f32 %v3640_v44, %v3628_v43  ;;  %v5058_v15 = vld [vmem:[#allocation5 + $0x4f8] sm:$0xf0] }
 0x1ac   :  { %3854 = vmatpush.bf16.msra.mxu0 %v4517_v51  ;;  %v4597_v51 = vor.u32 %v6640_v33, %v4594_v37  ;;  %v4853_v49 = vor.u32 %v6704_v45, %v4850_v46  ;;  %v5314_v29 = vld [vmem:[#allocation5 + $0x6f8] sm:$0xf0]  ;;  %v4693_v33 = vor.u32 %v6664_v4, %v4690_v6  ;;  %v6752_v44 = vld [vmem:[#allocation5 + $0x4cc] sm:$0xf] }
 0x1ad   :  { %3867 = vmatpush.bf16.msra.mxu1 %v4645_v52  ;;  %v4725_v52 = vor.u32 %v6672_v40, %v4722_v42  ;;  %v5442_v36 = vld [vmem:[#allocation5 + $0x7f8] sm:$0xf0]  ;;  %v5061_v40 = vor.u32 %v6756_v13, %v5058_v15  ;;  %v6784_v46 = vld [vmem:[#allocation5 + $0x5cc] sm:$0xf] }
 0x1ae   :  { %3880 = vmatpush.bf16.msra.mxu2 %v4773_v55  ;;  %v6604_v55 = vld [vmem:[#allocation5 + $0x2c] sm:$0xf]  ;;  %v5042_v45 = vld [vmem:[#allocation5 + $0x4d8] sm:$0xf0] }
 0x1af   :  { %3893 = vmatpush.bf16.msra.mxu3 %v4901_v56  ;;  %v4578_v56 = vld [vmem:[#allocation5 + $0x138] sm:$0xf0]  ;;  %v4453_v61 = vor.u32 %v6604_v55, %v4450_v53  ;;  %v6816_v48 = vld [vmem:[#allocation5 + $0x6cc] sm:$0xf]  ;;  %v5045_v53 = vor.u32 %v6752_v44, %v5042_v45 }
 0x1b0   :  { %3855 = vmatpush.bf16.msra.mxu0 %v4501_v1  ;;  %v4581_v1 = vor.u32 %v6636_v54, %v4578_v56  ;;  %v3629_v12 = vpop.f32.mrf.mxu2  ;;  %v5426_v55 = vld [vmem:[#allocation5 + $0x7d8] sm:$0xf0]  ;;  %v6748_v56 = vld [vmem:[#allocation5 + $0x4ac] sm:$0xf] }
 0x1b1   :  { %3868 = vmatpush.bf16.msra.mxu1 %v4629_v7  ;;  %v6632_v7 = vld [vmem:[#allocation5 + $0x10c] sm:$0xf]  ;;  %v3642_v18 = vpop.f32.mrf.mxu3  ;;  %v5026_v57 = vld [vmem:[#allocation5 + $0x4b8] sm:$0xf0] }
 0x1b2   :  { %3881 = vmatpush.bf16.msra.mxu2 %v4757_v3  ;;  %v4562_v3 = vld [vmem:[#allocation5 + $0x118] sm:$0xf0]  ;;  %v6776_v6 = vld [vmem:[#allocation5 + $0x58c] sm:$0xf] }
 0x1b3   :  { %3894 = vmatpush.bf16.msra.mxu3 %v4885_v8  ;;  %v6696_v8 = vld [vmem:[#allocation5 + $0x30c] sm:$0xf]  ;;  %v4565_v31 = vor.u32 %v6632_v7, %v4562_v3  ;;  %v5154_v60 = vld [vmem:[#allocation5 + $0x5b8] sm:$0xf0] }
 0x1b4   :  { %3856 = vmatpush.bf16.msra.mxu0 %v4485_v22  ;;  %v4437_v22 = vor.u32 %v6600_v62, %v4434_v0  ;;  %v4821_v37 = vor.u32 %v6696_v8, %v4818_v11  ;;  %v5282_v62 = vld [vmem:[#allocation5 + $0x6b8] sm:$0xf0]  ;;  %v6844_v0 = vld [vmem:[#allocation5 + $0x7ac] sm:$0xf]  ;;  %v5157_v3 = vor.u32 %v6780_v58, %v5154_v60  ;;  %v7491_v8 = vld [vmem:[#allocation7] sm:$0xf] }
 0x1b5   :  { %3869 = vmatpush.bf16.msra.mxu1 %v4613_v30  ;;  %v5186_v30 = vld [vmem:[#allocation5 + $0x5f8] sm:$0xf0]  ;;  %v6744_v7 = vld [vmem:[#allocation5 + $0x48c] sm:$0xf] }
 0x1b6   :  { %3882 = vmatpush.bf16.msra.mxu2 %v4741_v25  ;;  %v6820_v25 = vld [vmem:[#allocation5 + $0x6ec] sm:$0xf]  ;;  %v5189_v42 = vor.u32 %v6788_v17, %v5186_v30  ;;  %v5394_v15 = vld [vmem:[#allocation5 + $0x798] sm:$0xf0] }
 0x1b7   :  { %3895 = vmatpush.bf16.msra.mxu3 %v4869_v34  ;;  %v6852_v34 = vld [vmem:[#allocation5 + $0x7ec] sm:$0xf]  ;;  %v5317_v43 = vor.u32 %v6820_v25, %v5314_v29  ;;  %v4994_v25 = vld [vmem:[#allocation5 + $0x478] sm:$0xf0] }
 0x1b8   :  { %3857 = vmatpush.bf16.msra.mxu0 %v4469_v47  ;;  %v5445_v63 = vor.u32 %v6852_v34, %v5442_v36  ;;  %v5170_v47 = vld [vmem:[#allocation5 + $0x5d8] sm:$0xf0]  ;;  %v6808_v12 = vld [vmem:[#allocation5 + $0x68c] sm:$0xf] }
 0x1b9   :  { %3870 = vmatpush.bf16.msra.mxu1 %v4597_v51  ;;  %v5298_v51 = vld [vmem:[#allocation5 + $0x6d8] sm:$0xf0]  ;;  %v5173_v54 = vor.u32 %v6784_v46, %v5170_v47  ;;  %v6840_v13 = vld [vmem:[#allocation5 + $0x78c] sm:$0xf] }
 0x1ba   :  { %3883 = vmatpush.bf16.msra.mxu2 %v4725_v52  ;;  %v6848_v52 = vld [vmem:[#allocation5 + $0x7cc] sm:$0xf]  ;;  %v5397_v34 = vor.u32 %v6840_v13, %v5394_v15  ;;  %v5122_v36 = vld [vmem:[#allocation5 + $0x578] sm:$0xf0] }
 0x1bb   :  { %3896 = vmatpush.bf16.msra.mxu3 %v4853_v49  ;;  %v5301_v49 = vor.u32 %v6816_v48, %v5298_v51  ;;  %v5429_v59 = vor.u32 %v6848_v52, %v5426_v55  ;;  %v6740_v30 = vld [vmem:[#allocation5 + $0x46c] sm:$0xf]  ;;  %v4978_v48 = vld [vmem:[#allocation5 + $0x458] sm:$0xf0] }
 0x1bc   :  { %3858 = vmatpush.bf16.msra.mxu0 %v4453_v61  ;;  %v6812_v61 = vld [vmem:[#allocation5 + $0x6ac] sm:$0xf]  ;;  %v4997_v45 = vor.u32 %v6740_v30, %v4994_v25  ;;  %v4946_v15 = vld [vmem:[#allocation5 + $0x418] sm:$0xf0] }
 0x1bd   :  { %3871 = vmatpush.bf16.msra.mxu1 %v4581_v1  ;;  %v5410_v1 = vld [vmem:[#allocation5 + $0x7b8] sm:$0xf0]  ;;  %v5285_v4 = vor.u32 %v6812_v61, %v5282_v62  ;;  %v6772_v29 = vld [vmem:[#allocation5 + $0x56c] sm:$0xf] }
 0x1be   :  { %3884 = vmatpush.bf16.msra.mxu2 %v4709_v2  ;;  %v5029_v2 = vor.u32 %v6748_v56, %v5026_v57  ;;  %v5413_v11 = vor.u32 %v6844_v0, %v5410_v1  ;;  %v5125_v46 = vor.u32 %v6772_v29, %v5122_v36  ;;  %v6736_v47 = vld [vmem:[#allocation5 + $0x44c] sm:$0xf] }
 0x1bf   :  { %3897 = vmatpush.bf16.msra.mxu3 %v4837_v5  ;;  %v5010_v5 = vld [vmem:[#allocation5 + $0x498] sm:$0xf0]  ;;  %v6768_v51 = vld [vmem:[#allocation5 + $0x54c] sm:$0xf]  ;;  %v4981_v60 = vor.u32 %v6736_v47, %v4978_v48 }
 0x1c0   :  { %3859 = vmatpush.bf16.msra.mxu0 %v4437_v22  ;;  %v5013_v17 = vor.u32 %v6744_v7, %v5010_v5  ;;  %v6832_v58 = vld [vmem:[#allocation5 + $0x74c] sm:$0xf]  ;;  %v4962_v7 = vld [vmem:[#allocation5 + $0x438] sm:$0xf0] }
 0x1c1   :  { %3872 = vmatpush.bf16.msra.mxu1 %v4565_v31  ;;  %v6728_v13 = vld [vmem:[#allocation5 + $0x40c] sm:$0xf] }
 0x1c2   :  { %3885 = vmatpush.bf16.msra.mxu2 %v4693_v33  ;;  %v3666_v33 = vpop.f32.mrf.mxu1  ;;  %v6792_v30 = vld [vmem:[#allocation5 + $0x60c] sm:$0xf] }
 0x1c3   :  { %3898 = vmatpush.bf16.msra.mxu3 %v4821_v37  ;;  %3860 = vmatmul.bf16.vlgmr.msra.gmra.mxu0 %v7387_v10  ;;  %v5138_v10 = vld [vmem:[#allocation5 + $0x598] sm:$0xf0]  ;;  %v6804_v37 = vld [vmem:[#allocation5 + $0x66c] sm:$0xf] }
 0x1c4   :  { %3904 = vmatpush.bf16.msrb.mxu0 %v5061_v40  ;;  %3873 = vmatmul.bf16.vlgmr.msra.gmra.mxu1 %v7394_v26  ;;  %v3653_v26 = vpop.f32.mrf.mxu0  ;;  %v5141_v18 = vor.u32 %v6776_v6, %v5138_v10  ;;  %v5250_v40 = vld [vmem:[#allocation5 + $0x678] sm:$0xf0]  ;;  %v6828_v10 = vld [vmem:[#allocation5 + $0x72c] sm:$0xf] }
 0x1c5   :  { %3917 = vmatpush.bf16.msrb.mxu1 %v5189_v42  ;;  %3886 = vmatmul.bf16.vlgmr.msra.gmra.mxu2 %v7385_v9  ;;  %v662_v9 = vperm.slane %v7491_v8, 2  ;;  %v6836_v42 = vld [vmem:[#allocation5 + $0x76c] sm:$0xf]  ;;  %v5090_v6 = vld [vmem:[#allocation5 + $0x538] sm:$0xf0] }
 0x1c6   :  { %3930 = vmatpush.bf16.msrb.mxu2 %v5317_v43  ;;  %3899 = vmatmul.bf16.vlgmr.msra.gmra.mxu3 %v7389_v16  ;;  %v5266_v16 = vld [vmem:[#allocation5 + $0x698] sm:$0xf0]  ;;  %v6980_v48 = vld [vmem:[#allocation5 + $0xbec] sm:$0xf] }
 0x1c7   :  { %3943 = vmatpush.bf16.msrb.mxu3 %v5445_v63  ;;  %v5269_v22 = vor.u32 %v6808_v12, %v5266_v16  ;;  %v3654_v31 = vadd.f32 %v3653_v26, %v662_v9  ;;  %v5378_v43 = vld [vmem:[#allocation5 + $0x778] sm:$0xf0]  ;;  %v5253_v63 = vor.u32 %v6804_v37, %v5250_v40  ;;  %v6796_v9 = vld [vmem:[#allocation5 + $0x62c] sm:$0xf] }
 0x1c8   :  { %3905 = vmatpush.bf16.msrb.mxu0 %v5045_v53  ;;  %v3679_v52 = vpop.f32.mrf.mxu2  ;;  %v5381_v55 = vor.u32 %v6836_v42, %v5378_v43  ;;  %v5106_v53 = vld [vmem:[#allocation5 + $0x558] sm:$0xf0]  ;;  %v6884_v37 = vld [vmem:[#allocation5 + $0x8ec] sm:$0xf]  ;;  %v4949_v43 = vor.u32 %v6728_v13, %v4946_v15 }
 0x1c9   :  { %3918 = vmatpush.bf16.msrb.mxu1 %v5173_v54  ;;  %v3667_v44 = vadd.f32 %v3666_v33, %v3654_v31  ;;  %v6800_v54 = vld [vmem:[#allocation5 + $0x64c] sm:$0xf]  ;;  %v3692_v57 = vpop.f32.mrf.mxu3  ;;  %v5109_v0 = vor.u32 %v6768_v51, %v5106_v53  ;;  %v5346_v12 = vld [vmem:[#allocation5 + $0x738] sm:$0xf0] }
 0x1ca   :  { %3931 = vmatpush.bf16.msrb.mxu2 %v5301_v49  ;;  %v5234_v49 = vld [vmem:[#allocation5 + $0x658] sm:$0xf0]  ;;  %v5349_v29 = vor.u32 %v6828_v10, %v5346_v12  ;;  %v6824_v33 = vld [vmem:[#allocation5 + $0x70c] sm:$0xf] }
 0x1cb   :  { %3944 = vmatpush.bf16.msrb.mxu3 %v5429_v59  ;;  %v3680_v56 = vadd.f32 %v3679_v52, %v3667_v44  ;;  %v5362_v59 = vld [vmem:[#allocation5 + $0x758] sm:$0xf0]  ;;  %v5237_v1 = vor.u32 %v6800_v54, %v5234_v49  ;;  %v6916_v42 = vld [vmem:[#allocation5 + $0x9ec] sm:$0xf] }
 0x1cc   :  { %3906 = vmatpush.bf16.msrb.mxu0 %v5029_v2  ;;  %v3655_v62 = vpop.f32.mrf.mxu0  ;;  %v6732_v2 = vld [vmem:[#allocation5 + $0x42c] sm:$0xf]  ;;  %v5365_v5 = vor.u32 %v6832_v58, %v5362_v59  ;;  %v5202_v31 = vld [vmem:[#allocation5 + $0x618] sm:$0xf0] }
 0x1cd   :  { %3919 = vmatpush.bf16.msrb.mxu1 %v5157_v3  ;;  %v7494_v61 = vadd.f32 %v3692_v57, %v3680_v56  ;;  %v6764_v3 = vld [vmem:[#allocation5 + $0x52c] sm:$0xf]  ;;  %v4965_v16 = vor.u32 %v6732_v2, %v4962_v7  ;;  %v5570_v40 = vld [vmem:[#allocation5 + $0x8f8] sm:$0xf0]  ;;  %v5205_v47 = vor.u32 %v6792_v30, %v5202_v31 }
 0x1ce   :  { %3932 = vmatpush.bf16.msrb.mxu2 %v5285_v4  ;;  %v3668_v4 = vpop.f32.mrf.mxu1  ;;  %v5698_v44 = vld [vmem:[#allocation5 + $0x9f8] sm:$0xf0]  ;;  %v6880_v49 = vld [vmem:[#allocation5 + $0x8cc] sm:$0xf] }
 0x1cf   :  { %3945 = vmatpush.bf16.msrb.mxu3 %v5413_v11  ;;  %v5218_v11 = vld [vmem:[#allocation5 + $0x638] sm:$0xf0]  ;;  %v5701_v53 = vor.u32 %v6916_v42, %v5698_v44  ;;  %v6912_v57 = vld [vmem:[#allocation5 + $0x9cc] sm:$0xf] }
 0x1d0   :  { %3907 = vmatpush.bf16.msrb.mxu0 %v5013_v17  ;;  %v5093_v17 = vor.u32 %v6764_v3, %v5090_v6  ;;  %v5221_v26 = vor.u32 %v6796_v9, %v5218_v11  ;;  %v3681_v25 = vpop.f32.mrf.mxu2  ;;  %v5954_v51 = vld [vmem:[#allocation5 + $0xbf8] sm:$0xf0]  ;;  %v6876_v4 = vld [vmem:[#allocation5 + $0x8ac] sm:$0xf] }
 0x1d1   :  { %3920 = vmatpush.bf16.msrb.mxu1 %v5141_v18  ;;  %v6760_v18 = vld [vmem:[#allocation5 + $0x50c] sm:$0xf]  ;;  %v3694_v36 = vpop.f32.mrf.mxu3  ;;  %v5554_v56 = vld [vmem:[#allocation5 + $0x8d8] sm:$0xf0]  ;;  %v5957_v58 = vor.u32 %v6980_v48, %v5954_v51 }
 0x1d2   :  { %3933 = vmatpush.bf16.msrb.mxu2 %v5269_v22  ;;  %v5074_v22 = vld [vmem:[#allocation5 + $0x518] sm:$0xf0]  ;;  %v5557_v2 = vor.u32 %v6880_v49, %v5554_v56  ;;  %v6908_v6 = vld [vmem:[#allocation5 + $0x9ac] sm:$0xf] }
 0x1d3   :  { %3946 = vmatpush.bf16.msrb.mxu3 %v5397_v34  ;;  %v5330_v34 = vld [vmem:[#allocation5 + $0x718] sm:$0xf0]  ;;  %v6940_v10 = vld [vmem:[#allocation5 + $0xaac] sm:$0xf] }
 0x1d4   :  { %3908 = vmatpush.bf16.msrb.mxu0 %v4997_v45  ;;  %v6948_v45 = vld [vmem:[#allocation5 + $0xaec] sm:$0xf]  ;;  %v5333_v52 = vor.u32 %v6824_v33, %v5330_v34  ;;  %v5682_v59 = vld [vmem:[#allocation5 + $0x9d8] sm:$0xf0] }
 0x1d5   :  { %3921 = vmatpush.bf16.msrb.mxu1 %v5125_v46  ;;  %v5826_v46 = vld [vmem:[#allocation5 + $0xaf8] sm:$0xf0]  ;;  %v5685_v7 = vor.u32 %v6912_v57, %v5682_v59  ;;  %v6968_v33 = vld [vmem:[#allocation5 + $0xb8c] sm:$0xf] }
 0x1d6   :  { %3934 = vmatpush.bf16.msrb.mxu2 %v5253_v63  ;;  %v5077_v63 = vor.u32 %v6760_v18, %v5074_v22  ;;  %v5829_v54 = vor.u32 %v6948_v45, %v5826_v46  ;;  %v5810_v62 = vld [vmem:[#allocation5 + $0xad8] sm:$0xf0]  ;;  %v6872_v18 = vld [vmem:[#allocation5 + $0x88c] sm:$0xf] }
 0x1d7   :  { %3947 = vmatpush.bf16.msrb.mxu3 %v5381_v55  ;;  %v5573_v55 = vor.u32 %v6884_v37, %v5570_v40  ;;  %v5666_v11 = vld [vmem:[#allocation5 + $0x9b8] sm:$0xf0]  ;;  %v6868_v37 = vld [vmem:[#allocation5 + $0x86c] sm:$0xf] }
 0x1d8   :  { %3909 = vmatpush.bf16.msrb.mxu0 %v4981_v60  ;;  %v6944_v60 = vld [vmem:[#allocation5 + $0xacc] sm:$0xf]  ;;  %v5794_v12 = vld [vmem:[#allocation5 + $0xab8] sm:$0xf0] }
 0x1d9   :  { %3922 = vmatpush.bf16.msrb.mxu1 %v5109_v0  ;;  %v6976_v0 = vld [vmem:[#allocation5 + $0xbcc] sm:$0xf]  ;;  %v5813_v3 = vor.u32 %v6944_v60, %v5810_v62  ;;  %v5922_v13 = vld [vmem:[#allocation5 + $0xbb8] sm:$0xf0] }
 0x1da   :  { %3935 = vmatpush.bf16.msrb.mxu2 %v5237_v1  ;;  %v5938_v1 = vld [vmem:[#allocation5 + $0xbd8] sm:$0xf0]  ;;  %v6900_v42 = vld [vmem:[#allocation5 + $0x96c] sm:$0xf] }
 0x1db   :  { %3948 = vmatpush.bf16.msrb.mxu3 %v5365_v5  ;;  %v5538_v5 = vld [vmem:[#allocation5 + $0x8b8] sm:$0xf0]  ;;  %v5941_v9 = vor.u32 %v6976_v0, %v5938_v1  ;;  %v6932_v46 = vld [vmem:[#allocation5 + $0xa6c] sm:$0xf] }
 0x1dc   :  { %3910 = vmatpush.bf16.msrb.mxu0 %v4965_v16  ;;  %v6972_v16 = vld [vmem:[#allocation5 + $0xbac] sm:$0xf]  ;;  %v5541_v15 = vor.u32 %v6876_v4, %v5538_v5  ;;  %v5522_v22 = vld [vmem:[#allocation5 + $0x898] sm:$0xf0] }
 0x1dd   :  { %3923 = vmatpush.bf16.msrb.mxu1 %v5093_v17  ;;  %v5669_v17 = vor.u32 %v6908_v6, %v5666_v11  ;;  %v5925_v30 = vor.u32 %v6972_v16, %v5922_v13  ;;  %v5650_v25 = vld [vmem:[#allocation5 + $0x998] sm:$0xf0]  ;;  %v6896_v49 = vld [vmem:[#allocation5 + $0x94c] sm:$0xf] }
 0x1de   :  { %3936 = vmatpush.bf16.msrb.mxu2 %v5221_v26  ;;  %v5797_v26 = vor.u32 %v6940_v10, %v5794_v12  ;;  %v5778_v31 = vld [vmem:[#allocation5 + $0xa98] sm:$0xf0]  ;;  %v6928_v59 = vld [vmem:[#allocation5 + $0xa4c] sm:$0xf] }
 0x1df   :  { %3949 = vmatpush.bf16.msrb.mxu3 %v5349_v29  ;;  %v6936_v29 = vld [vmem:[#allocation5 + $0xa8c] sm:$0xf]  ;;  %v5506_v40 = vld [vmem:[#allocation5 + $0x878] sm:$0xf0] }
 0x1e0   :  { %3911 = vmatpush.bf16.msrb.mxu0 %v4949_v43  ;;  %v7500_v34 = vpop.f32.mrf.mxu0  ;;  %v5781_v36 = vor.u32 %v6936_v29, %v5778_v31  ;;  %v5634_v45 = vld [vmem:[#allocation5 + $0x978] sm:$0xf0]  ;;  %v5509_v51 = vor.u32 %v6868_v37, %v5506_v40  ;;  %v6960_v0 = vld [vmem:[#allocation5 + $0xb4c] sm:$0xf] }
 0x1e1   :  { %3924 = vmatpush.bf16.msrb.mxu1 %v5077_v63  ;;  %v7502_v43 = vpop.f32.mrf.mxu1  ;;  %v5762_v63 = vld [vmem:[#allocation5 + $0xa78] sm:$0xf0]  ;;  %v6860_v5 = vld [vmem:[#allocation5 + $0x82c] sm:$0xf] }
 0x1e2   :  { %3937 = vmatpush.bf16.msrb.mxu2 %v5205_v47  ;;  %v6964_v47 = vld [vmem:[#allocation5 + $0xb6c] sm:$0xf]  ;;  %v5890_v48 = vld [vmem:[#allocation5 + $0xb78] sm:$0xf0] }
 0x1e3   :  { %3950 = vmatpush.bf16.msrb.mxu3 %v5333_v52  ;;  %3912 = vmatmul.bf16.vlgmr.msrb.gmra.mxu0 %v7399_v38  ;;  %v5906_v38 = vld [vmem:[#allocation5 + $0xb98] sm:$0xf0]  ;;  %v5637_v52 = vor.u32 %v6900_v42, %v5634_v45  ;;  %v5893_v57 = vor.u32 %v6964_v47, %v5890_v48  ;;  %v6924_v16 = vld [vmem:[#allocation5 + $0xa2c] sm:$0xf] }
 0x1e4   :  { %3956 = vmatpush.bf16.msra.mxu0 %v5573_v55  ;;  %3925 = vmatmul.bf16.vlgmr.msrb.gmra.mxu1 %v7403_v41  ;;  %v5909_v44 = vor.u32 %v6968_v33, %v5906_v38  ;;  %v5765_v55 = vor.u32 %v6932_v46, %v5762_v63  ;;  %v5746_v60 = vld [vmem:[#allocation5 + $0xa58] sm:$0xf0]  ;;  %v6920_v31 = vld [vmem:[#allocation5 + $0xa0c] sm:$0xf] }
 0x1e5   :  { %3969 = vmatpush.bf16.msra.mxu1 %v5701_v53  ;;  %3938 = vmatmul.bf16.vlgmr.msrb.gmra.mxu2 %v7397_v35  ;;  %v6904_v35 = vld [vmem:[#allocation5 + $0x98c] sm:$0xf]  ;;  %v5874_v1 = vld [vmem:[#allocation5 + $0xb58] sm:$0xf0]  ;;  %v5749_v4 = vor.u32 %v6928_v59, %v5746_v60 }
 0x1e6   :  { %3982 = vmatpush.bf16.msra.mxu2 %v5829_v54  ;;  %3951 = vmatmul.bf16.vlgmr.msrb.gmra.mxu3 %v7401_v39  ;;  %v5525_v39 = vor.u32 %v6872_v18, %v5522_v22  ;;  %v5653_v41 = vor.u32 %v6904_v35, %v5650_v25  ;;  %v6864_v53 = vld [vmem:[#allocation5 + $0x84c] sm:$0xf]  ;;  %v5490_v54 = vld [vmem:[#allocation5 + $0x858] sm:$0xf0]  ;;  %v5877_v10 = vor.u32 %v6960_v0, %v5874_v1 }
 0x1e7   :  { %3995 = vmatpush.bf16.msra.mxu3 %v5957_v58  ;;  %v5618_v58 = vld [vmem:[#allocation5 + $0x958] sm:$0xf0]  ;;  %v6856_v18 = vld [vmem:[#allocation5 + $0x80c] sm:$0xf] }
 0x1e8   :  { %3957 = vmatpush.bf16.msra.mxu0 %v5557_v2  ;;  %v7504_v56 = vpop.f32.mrf.mxu2  ;;  %v5493_v2 = vor.u32 %v6864_v53, %v5490_v54  ;;  %v5474_v6 = vld [vmem:[#allocation5 + $0x838] sm:$0xf0]  ;;  %v6888_v25 = vld [vmem:[#allocation5 + $0x90c] sm:$0xf] }
 0x1e9   :  { %3970 = vmatpush.bf16.msra.mxu1 %v5685_v7  ;;  %v7506_v62 = vpop.f32.mrf.mxu3  ;;  %v3707_v7 = vpop.f32.mrf.mxu0  ;;  %v5602_v12 = vld [vmem:[#allocation5 + $0x938] sm:$0xf0]  ;;  %v7012_v40 = vld [vmem:[#allocation5 + $0xcec] sm:$0xf] }
 0x1ea   :  { %3983 = vmatpush.bf16.msra.mxu2 %v5813_v3  ;;  %v5621_v3 = vor.u32 %v6896_v49, %v5618_v58  ;;  %v3720_v11 = vpop.f32.mrf.mxu1  ;;  %v5730_v13 = vld [vmem:[#allocation5 + $0xa38] sm:$0xf0]  ;;  %v7076_v63 = vld [vmem:[#allocation5 + $0xeec] sm:$0xf] }
 0x1eb   :  { %3996 = vmatpush.bf16.msra.mxu3 %v5941_v9  ;;  %v6892_v9 = vld [vmem:[#allocation5 + $0x92c] sm:$0xf]  ;;  %v5458_v22 = vld [vmem:[#allocation5 + $0x818] sm:$0xf0] }
 0x1ec   :  { %3958 = vmatpush.bf16.msra.mxu0 %v5541_v15  ;;  %v6956_v15 = vld [vmem:[#allocation5 + $0xb2c] sm:$0xf]  ;;  %v5605_v35 = vor.u32 %v6892_v9, %v5602_v12  ;;  %v5586_v29 = vld [vmem:[#allocation5 + $0x918] sm:$0xf0]  ;;  %v5461_v45 = vor.u32 %v6856_v18, %v5458_v22 }
 0x1ed   :  { %3971 = vmatpush.bf16.msra.mxu1 %v5669_v17  ;;  %v5858_v17 = vld [vmem:[#allocation5 + $0xb38] sm:$0xf0]  ;;  %v5589_v48 = vor.u32 %v6888_v25, %v5586_v29  ;;  %v7008_v58 = vld [vmem:[#allocation5 + $0xccc] sm:$0xf] }
 0x1ee   :  { %3984 = vmatpush.bf16.msra.mxu2 %v5797_v26  ;;  %v5477_v26 = vor.u32 %v6860_v5, %v5474_v6  ;;  %v5861_v38 = vor.u32 %v6956_v15, %v5858_v17  ;;  %v6082_v42 = vld [vmem:[#allocation5 + $0xcf8] sm:$0xf0]  ;;  %v7040_v60 = vld [vmem:[#allocation5 + $0xdcc] sm:$0xf] }
 0x1ef   :  { %3997 = vmatpush.bf16.msra.mxu3 %v5925_v30  ;;  %v5733_v30 = vor.u32 %v6924_v16, %v5730_v13  ;;  %v6210_v46 = vld [vmem:[#allocation5 + $0xdf8] sm:$0xf0]  ;;  %v6085_v54 = vor.u32 %v7012_v40, %v6082_v42  ;;  %v7004_v11 = vld [vmem:[#allocation5 + $0xcac] sm:$0xf] }
 0x1f0   :  { %3959 = vmatpush.bf16.msra.mxu0 %v5525_v39  ;;  %v3733_v33 = vpop.f32.mrf.mxu2  ;;  %v5714_v39 = vld [vmem:[#allocation5 + $0xa18] sm:$0xf0]  ;;  %v7036_v12 = vld [vmem:[#allocation5 + $0xdac] sm:$0xf] }
 0x1f1   :  { %3972 = vmatpush.bf16.msra.mxu1 %v5653_v41  ;;  %v6952_v41 = vld [vmem:[#allocation5 + $0xb0c] sm:$0xf]  ;;  %v3746_v37 = vpop.f32.mrf.mxu3  ;;  %v6338_v47 = vld [vmem:[#allocation5 + $0xef8] sm:$0xf0] }
 0x1f2   :  { %3985 = vmatpush.bf16.msra.mxu2 %v5781_v36  ;;  %v5842_v36 = vld [vmem:[#allocation5 + $0xb18] sm:$0xf0]  ;;  %v7068_v15 = vld [vmem:[#allocation5 + $0xeac] sm:$0xf] }
 0x1f3   :  { %3998 = vmatpush.bf16.msra.mxu3 %v5909_v44  ;;  %v7044_v44 = vld [vmem:[#allocation5 + $0xdec] sm:$0xf]  ;;  %v5845_v53 = vor.u32 %v6952_v41, %v5842_v36  ;;  %v6066_v59 = vld [vmem:[#allocation5 + $0xcd8] sm:$0xf0] }
 0x1f4   :  { %3960 = vmatpush.bf16.msra.mxu0 %v5509_v51  ;;  %v5717_v51 = vor.u32 %v6920_v31, %v5714_v39  ;;  %v6213_v49 = vor.u32 %v7044_v44, %v6210_v46  ;;  %v6194_v1 = vld [vmem:[#allocation5 + $0xdd8] sm:$0xf0]  ;;  %v6069_v5 = vor.u32 %v7008_v58, %v6066_v59  ;;  %v7000_v25 = vld [vmem:[#allocation5 + $0xc8c] sm:$0xf] }
 0x1f5   :  { %3973 = vmatpush.bf16.msra.mxu1 %v5637_v52  ;;  %v7108_v52 = vld [vmem:[#allocation5 + $0xfec] sm:$0xf]  ;;  %v6322_v7 = vld [vmem:[#allocation5 + $0xed8] sm:$0xf0]  ;;  %v6197_v6 = vor.u32 %v7040_v60, %v6194_v1 }
 0x1f6   :  { %3986 = vmatpush.bf16.msra.mxu2 %v5765_v55  ;;  %v6466_v55 = vld [vmem:[#allocation5 + $0xff8] sm:$0xf0]  ;;  %v7032_v29 = vld [vmem:[#allocation5 + $0xd8c] sm:$0xf] }
 0x1f7   :  { %3999 = vmatpush.bf16.msra.mxu3 %v5893_v57  ;;  %v6341_v57 = vor.u32 %v7076_v63, %v6338_v47  ;;  %v6469_v0 = vor.u32 %v7108_v52, %v6466_v55  ;;  %v6178_v13 = vld [vmem:[#allocation5 + $0xdb8] sm:$0xf0]  ;;  %v6996_v42 = vld [vmem:[#allocation5 + $0xc6c] sm:$0xf] }
 0x1f8   :  { %3961 = vmatpush.bf16.msra.mxu0 %v5493_v2  ;;  %v7072_v2 = vld [vmem:[#allocation5 + $0xecc] sm:$0xf]  ;;  %v6306_v17 = vld [vmem:[#allocation5 + $0xeb8] sm:$0xf0] }
 0x1f9   :  { %3974 = vmatpush.bf16.msra.mxu1 %v5621_v3  ;;  %v7104_v3 = vld [vmem:[#allocation5 + $0xfcc] sm:$0xf]  ;;  %v6325_v9 = vor.u32 %v7072_v2, %v6322_v7  ;;  %v6434_v18 = vld [vmem:[#allocation5 + $0xfb8] sm:$0xf0] }
 0x1fa   :  { %3987 = vmatpush.bf16.msra.mxu2 %v5749_v4  ;;  %v6450_v4 = vld [vmem:[#allocation5 + $0xfd8] sm:$0xf0]  ;;  %v7060_v47 = vld [vmem:[#allocation5 + $0xe6c] sm:$0xf] }
 0x1fb   :  { %4000 = vmatpush.bf16.msra.mxu3 %v5877_v10  ;;  %v6050_v10 = vld [vmem:[#allocation5 + $0xcb8] sm:$0xf0]  ;;  %v6453_v16 = vor.u32 %v7104_v3, %v6450_v4  ;;  %v7024_v58 = vld [vmem:[#allocation5 + $0xd4c] sm:$0xf] }
 0x1fc   :  { %3962 = vmatpush.bf16.msra.mxu0 %v5477_v26  ;;  %v7100_v26 = vld [vmem:[#allocation5 + $0xfac] sm:$0xf]  ;;  %v6053_v22 = vor.u32 %v7004_v11, %v6050_v10  ;;  %v6162_v33 = vld [vmem:[#allocation5 + $0xd98] sm:$0xf0] }
 0x1fd   :  { %3975 = vmatpush.bf16.msra.mxu1 %v5605_v35  ;;  %v6181_v35 = vor.u32 %v7036_v12, %v6178_v13  ;;  %v6437_v31 = vor.u32 %v7100_v26, %v6434_v18  ;;  %v6418_v41 = vld [vmem:[#allocation5 + $0xf98] sm:$0xf0]  ;;  %v6165_v37 = vor.u32 %v7032_v29, %v6162_v33  ;;  %v7056_v1 = vld [vmem:[#allocation5 + $0xe4c] sm:$0xf] }
 0x1fe   :  { %3988 = vmatpush.bf16.msra.mxu2 %v5733_v30  ;;  %v6309_v30 = vor.u32 %v7068_v15, %v6306_v17  ;;  %v6018_v44 = vld [vmem:[#allocation5 + $0xc78] sm:$0xf0]  ;;  %v7088_v3 = vld [vmem:[#allocation5 + $0xf4c] sm:$0xf] }
 0x1ff   :  { %4001 = vmatpush.bf16.msra.mxu3 %v5861_v38  ;;  %v7064_v38 = vld [vmem:[#allocation5 + $0xe8c] sm:$0xf]  ;;  %v6146_v63 = vld [vmem:[#allocation5 + $0xd78] sm:$0xf0]  ;;  %v6021_v55 = vor.u32 %v6996_v42, %v6018_v44 }
 0x200   :  { %3963 = vmatpush.bf16.msra.mxu0 %v5461_v45  ;;  %v7512_v39 = vpop.f32.mrf.mxu0  ;;  %v7028_v45 = vld [vmem:[#allocation5 + $0xd6c] sm:$0xf]  ;;  %v6402_v52 = vld [vmem:[#allocation5 + $0xf78] sm:$0xf0] }
 0x201   :  { %3976 = vmatpush.bf16.msra.mxu1 %v5589_v48  ;;  %v7514_v36 = vpop.f32.mrf.mxu1  ;;  %v6274_v48 = vld [vmem:[#allocation5 + $0xe78] sm:$0xf0]  ;;  %v7020_v15 = vld [vmem:[#allocation5 + $0xd2c] sm:$0xf] }
 0x202   :  { %3989 = vmatpush.bf16.msra.mxu2 %v5717_v51  ;;  %v7092_v51 = vld [vmem:[#allocation5 + $0xf6c] sm:$0xf]  ;;  %v6258_v2 = vld [vmem:[#allocation5 + $0xe58] sm:$0xf0] }
 0x203   :  { %4002 = vmatpush.bf16.msra.mxu3 %v5845_v53  ;;  %3964 = vmatmul.bf16.vlgmr.msra.gmra.mxu0 %v7409_v19  ;;  %v6034_v19 = vld [vmem:[#allocation5 + $0xc98] sm:$0xf0]  ;;  %v6149_v53 = vor.u32 %v7028_v45, %v6146_v63  ;;  %v6405_v59 = vor.u32 %v7092_v51, %v6402_v52  ;;  %v6261_v12 = vor.u32 %v7056_v1, %v6258_v2  ;;  %v7052_v18 = vld [vmem:[#allocation5 + $0xe2c] sm:$0xf] }
 0x204   :  { %4008 = vmatpush.bf16.msrb.mxu0 %v6085_v54  ;;  %3977 = vmatmul.bf16.vlgmr.msra.gmra.mxu1 %v7413_v24  ;;  %v7096_v24 = vld [vmem:[#allocation5 + $0xf8c] sm:$0xf]  ;;  %v6277_v54 = vor.u32 %v7060_v47, %v6274_v48  ;;  %v6386_v4 = vld [vmem:[#allocation5 + $0xf58] sm:$0xf0] }
 0x205   :  { %4021 = vmatpush.bf16.msrb.mxu1 %v6213_v49  ;;  %3990 = vmatmul.bf16.vlgmr.msra.gmra.mxu2 %v7411_v23  ;;  %v6290_v23 = vld [vmem:[#allocation5 + $0xe98] sm:$0xf0]  ;;  %v6421_v46 = vor.u32 %v7096_v24, %v6418_v41  ;;  %v6992_v49 = vld [vmem:[#allocation5 + $0xc4c] sm:$0xf]  ;;  %v6389_v17 = vor.u32 %v7088_v3, %v6386_v4 }
 0x206   :  { %4034 = vmatpush.bf16.msrb.mxu2 %v6341_v57  ;;  %4003 = vmatmul.bf16.vlgmr.msra.gmra.mxu3 %v7415_v28  ;;  %v6037_v28 = vor.u32 %v7000_v25, %v6034_v19  ;;  %v6293_v40 = vor.u32 %v7064_v38, %v6290_v23  ;;  %v6002_v57 = vld [vmem:[#allocation5 + $0xc58] sm:$0xf0]  ;;  %v6984_v29 = vld [vmem:[#allocation5 + $0xc0c] sm:$0xf] }
 0x207   :  { %4047 = vmatpush.bf16.msrb.mxu3 %v6469_v0  ;;  %v6130_v0 = vld [vmem:[#allocation5 + $0xd58] sm:$0xf0]  ;;  %v7016_v33 = vld [vmem:[#allocation5 + $0xd0c] sm:$0xf] }
 0x208   :  { %4009 = vmatpush.bf16.msrb.mxu0 %v6069_v5  ;;  %v7516_v60 = vpop.f32.mrf.mxu2  ;;  %v3759_v5 = vpop.f32.mrf.mxu0  ;;  %v6133_v10 = vor.u32 %v7024_v58, %v6130_v0  ;;  %v5986_v13 = vld [vmem:[#allocation5 + $0xc38] sm:$0xf0]  ;;  %v7048_v24 = vld [vmem:[#allocation5 + $0xe0c] sm:$0xf]  ;;  %v7115_v0 = vld [vmem:[#allocation8 + $0x20] sm:$0xff] }
 0x209   :  { %4022 = vmatpush.bf16.msrb.mxu1 %v6197_v6  ;;  %v7518_v7 = vpop.f32.mrf.mxu3  ;;  %v3706_v6 = vadd.f32 %v7500_v34, %v7494_v61  ;;  %v3772_v11 = vpop.f32.mrf.mxu1  ;;  %v6114_v26 = vld [vmem:[#allocation5 + $0xd38] sm:$0xf0] }
 0x20a   :  { %4035 = vmatpush.bf16.msrb.mxu2 %v6325_v9  ;;  %v6005_v9 = vor.u32 %v6992_v49, %v6002_v57  ;;  %v6117_v34 = vor.u32 %v7020_v15, %v6114_v26  ;;  %v6098_v23 = vld [vmem:[#allocation5 + $0xd18] sm:$0xf0]  ;;  %v7116_v49 = vld [vmem:[#allocation8 + $0x28] sm:$0xff] }
 0x20b   :  { %4048 = vmatpush.bf16.msrb.mxu3 %v6453_v16  ;;  %v6988_v16 = vld [vmem:[#allocation5 + $0xc2c] sm:$0xf]  ;;  %v3719_v25 = vadd.f32 %v7502_v43, %v3706_v6  ;;  %v6226_v41 = vld [vmem:[#allocation5 + $0xe18] sm:$0xf0]  ;;  %v6101_v45 = vor.u32 %v7016_v33, %v6098_v23  ;;  %v663_v33 = vperm.slane %v7491_v8, 3  ;;  %v7141_v8 = vld [vmem:[#allocation8 + $0xf0] sm:$0xff] }
 0x20c   :  { %4010 = vmatpush.bf16.msrb.mxu0 %v6053_v22  ;;  %v6242_v22 = vld [vmem:[#allocation5 + $0xe38] sm:$0xf0]  ;;  %v5989_v61 = vor.u32 %v6988_v16, %v5986_v13  ;;  %v7132_v57 = vld [vmem:[#allocation8 + $0xa8] sm:$0xff] }
 0x20d   :  { %4023 = vmatpush.bf16.msrb.mxu1 %v6181_v35  ;;  %v7084_v35 = vld [vmem:[#allocation5 + $0xf2c] sm:$0xf]  ;;  %v6245_v19 = vor.u32 %v7052_v18, %v6242_v22  ;;  %v3732_v43 = vadd.f32 %v7504_v56, %v3719_v25  ;;  %v7118_v47 = vld [vmem:[#allocation8 + $0x38] sm:$0xff]  ;;  %v7117_v56 = vld [vmem:[#allocation8 + $0x30] sm:$0xff] }
 0x20e   :  { %4036 = vmatpush.bf16.msrb.mxu2 %v6309_v30  ;;  %v6370_v30 = vld [vmem:[#allocation5 + $0xf38] sm:$0xf0]  ;;  %v7120_v13 = vld [vmem:[#allocation8 + $0x48] sm:$0xff]  ;;  %v7111_v22 = vld [vmem:[#allocation8] sm:$0xff] }
 0x20f   :  { %4049 = vmatpush.bf16.msrb.mxu3 %v6437_v31  ;;  %v5970_v31 = vld [vmem:[#allocation5 + $0xc18] sm:$0xf0]  ;;  %v6373_v38 = vor.u32 %v7084_v35, %v6370_v30  ;;  %v3745_v52 = vadd.f32 %v7506_v62, %v3732_v43  ;;  %v7128_v15 = vld [vmem:[#allocation8 + $0x88] sm:$0xff]  ;;  %v4060_v35 = vmax.f32 %v7458_v32, 0.0  ;;  %v7119_v30 = vld [vmem:[#allocation8 + $0x40] sm:$0xff] }
 0x210   :  { %4011 = vmatpush.bf16.msrb.mxu0 %v6037_v28  ;;  %v3785_v28 = vpop.f32.mrf.mxu2  ;;  %v5973_v44 = vor.u32 %v6984_v29, %v5970_v31  ;;  %v7126_v48 = vld [vmem:[#allocation8 + $0x78] sm:$0xff]  ;;  %v7127_v25 = vld [vmem:[#allocation8 + $0x80] sm:$0xff] }
 0x211   :  { %4024 = vmatpush.bf16.msrb.mxu1 %v6165_v37  ;;  %v7080_v37 = vld [vmem:[#allocation5 + $0xf0c] sm:$0xf]  ;;  %v3798_v42 = vpop.f32.mrf.mxu3  ;;  %v7134_v51 = vld [vmem:[#allocation8 + $0xb8] sm:$0xff] }
 0x212   :  { %4037 = vmatpush.bf16.msrb.mxu2 %v6293_v40  ;;  %v6354_v40 = vld [vmem:[#allocation5 + $0xf18] sm:$0xf0] }
 0x213   :  { %4050 = vmatpush.bf16.msrb.mxu3 %v6421_v46  ;;  %v6229_v46 = vor.u32 %v7048_v24, %v6226_v41  ;;  %v6357_v63 = vor.u32 %v7080_v37, %v6354_v40  ;;  %v7122_v2 = vld [vmem:[#allocation8 + $0x58] sm:$0xff] }
 0x214   :  { %4012 = vmatpush.bf16.msrb.mxu0 %v6021_v55  ;;  %v3758_v55 = vadd.f32 %v7512_v39, %v3745_v52  ;;  %v7124_v39 = vld [vmem:[#allocation8 + $0x68] sm:$0xff]  ;;  %v7130_v3 = vld [vmem:[#allocation8 + $0x98] sm:$0xff] }
 0x215   :  { %4025 = vmatpush.bf16.msrb.mxu1 %v6149_v53  ;;  %v7125_v53 = vld [vmem:[#allocation8 + $0x70] sm:$0xff] }
 0x216   :  { %4038 = vmatpush.bf16.msrb.mxu2 %v6277_v54  ;;  %v7133_v54 = vld [vmem:[#allocation8 + $0xb0] sm:$0xff]  ;;  %v3771_v62 = vadd.f32 %v7514_v36, %v3758_v55  ;;  %v7114_v36 = vld [vmem:[#allocation8 + $0x18] sm:$0xff] }
 0x217   :  { %4051 = vmatpush.bf16.msrb.mxu3 %v6405_v59 }
 0x218   :  { %4013 = vmatpush.bf16.msrb.mxu0 %v6005_v9  ;;  %v3784_v58 = vadd.f32 %v7516_v60, %v3771_v62  ;;  %v7113_v9 = vld [vmem:[#allocation8 + $0x10] sm:$0xff]  ;;  %v7138_v62 = vld [vmem:[#allocation8 + $0xd8] sm:$0xff] }
 0x219   :  { %4026 = vmatpush.bf16.msrb.mxu1 %v6133_v10  ;;  %v7121_v10 = vld [vmem:[#allocation8 + $0x50] sm:$0xff] }
 0x21a   :  { %4039 = vmatpush.bf16.msrb.mxu2 %v6261_v12  ;;  %v7129_v12 = vld [vmem:[#allocation8 + $0x90] sm:$0xff] }
 0x21b   :  { %4052 = vmatpush.bf16.msrb.mxu3 %v6389_v17 }
 0x21c   :  { %4014 = vmatpush.bf16.msrb.mxu0 %v5989_v61  ;;  %v4061_v61 = vmax.f32 %v7485_v50, 0.0 }
 0x21d   :  { %4027 = vmatpush.bf16.msrb.mxu1 %v6117_v34 }
 0x21e   :  { %4040 = vmatpush.bf16.msrb.mxu2 %v6245_v19  ;;  %v4064_v19 = vpack.c.bf16 %v4060_v35, %v4060_v35  ;;  %v4065_v29 = vpack.c.bf16 %v4061_v61, %v4061_v61  ;;  %v7153_v61 = vld [vmem:[#allocation10] ss:$0 sm:$0xff] }
 0x21f   :  { %4053 = vmatpush.bf16.msrb.mxu3 %v6373_v38 }
 0x220   :  { %4015 = vmatpush.bf16.msrb.mxu0 %v5973_v44  ;;  %v3809_v59 = vpop.f32.mrf.mxu0 }
 0x221   :  { %4028 = vmatpush.bf16.msrb.mxu1 %v6101_v45 }
 0x222   :  { %4041 = vmatpush.bf16.msrb.mxu2 %v6229_v46 }
 0x223   :  { %4054 = vmatpush.bf16.msrb.mxu3 %v6357_v63  ;;  %4016 = vmatmul.bf16.vlgmr.msrb.gmra.mxu0 %v7421_v14  ;;  %v3822_v14 = vpop.f32.mrf.mxu1 }
 0x224   :  { %4328 = vmatpush.bf16.msra.mxu0 %v7118_v47  ;;  %4029 = vmatmul.bf16.vlgmr.msrb.gmra.mxu1 %v7425_v21  ;;  %v7123_v21 = vld [vmem:[#allocation8 + $0x60] sm:$0xff] }
 0x225   :  { %4341 = vmatpush.bf16.msra.mxu1 %v7126_v48  ;;  %4042 = vmatmul.bf16.vlgmr.msrb.gmra.mxu2 %v7423_v20  ;;  %v7131_v20 = vld [vmem:[#allocation8 + $0xa0] sm:$0xff]  ;;  %v7142_v48 = vld [vmem:[#allocation8 + $0xf8] sm:$0xff] }
 0x226   :  { %4354 = vmatpush.bf16.msra.mxu2 %v7134_v51  ;;  %4055 = vmatmul.bf16.vlgmr.msrb.gmra.mxu3 %v7427_v27  ;;  %v3797_v27 = vadd.f32 %v7518_v7, %v3784_v58  ;;  %v7112_v7 = vld [vmem:[#allocation8 + $0x8] sm:$0xff] }
 0x227   :  { %4367 = vmatpush.bf16.msra.mxu3 %v7142_v48  ;;  %v7136_v58 = vld [vmem:[#allocation8 + $0xc8] sm:$0xff] }
 0x228   :  { %4329 = vmatpush.bf16.msra.mxu0 %v7117_v56  ;;  %v3810_v1 = vadd.f32 %v3809_v59, %v3797_v27  ;;  %v3835_v4 = vpop.f32.mrf.mxu2  ;;  %v3811_v60 = vpop.f32.mrf.mxu0  ;;  %v7140_v56 = vld [vmem:[#allocation8 + $0xe8] sm:$0xff]  ;;  %v7135_v27 = vld [vmem:[#allocation8 + $0xc0] sm:$0xff] }
 0x229   :  { %4342 = vmatpush.bf16.msra.mxu1 %v7125_v53  ;;  %v3848_v5 = vpop.f32.mrf.mxu3 }
 0x22a   :  { %4355 = vmatpush.bf16.msra.mxu2 %v7133_v54  ;;  %v3823_v6 = vadd.f32 %v3822_v14, %v3810_v1  ;;  %v7139_v54 = vld [vmem:[#allocation8 + $0xe0] sm:$0xff] }
 0x22b   :  { %v3824_v11 = vpop.f32.mrf.mxu1  ;;  %4368 = vmatpush.bf16.msra.mxu3 %v7141_v8 }
 0x22c   :  { %4330 = vmatpush.bf16.msra.mxu0 %v7116_v49  ;;  %v3836_v16 = vadd.f32 %v3835_v4, %v3823_v6 }
 0x22d   :  { %4343 = vmatpush.bf16.msra.mxu1 %v7124_v39 }
 0x22e   :  { %4356 = vmatpush.bf16.msra.mxu2 %v7132_v57  ;;  %v3849_v17 = vadd.f32 %v3848_v5, %v3836_v16  ;;  %v7137_v57 = vld [vmem:[#allocation8 + $0xd0] sm:$0xff] }
 0x22f   :  { %4369 = vmatpush.bf16.msra.mxu3 %v7140_v56 }
 0x230   :  { %4331 = vmatpush.bf16.msra.mxu0 %v7115_v0  ;;  %v3837_v26 = vpop.f32.mrf.mxu2  ;;  %v4062_v34 = vmax.f32 %v3849_v17, 0.0 }
 0x231   :  { %4344 = vmatpush.bf16.msra.mxu1 %v7123_v21  ;;  %v3850_v18 = vpop.f32.mrf.mxu3 }
 0x232   :  { %4357 = vmatpush.bf16.msra.mxu2 %v7131_v20  ;;  %v4066_v31 = vpack.c.bf16 %v4062_v34, %v4062_v34 }
 0x233   :  { %4370 = vmatpush.bf16.msra.mxu3 %v7139_v54 }
 0x234   :  { %4332 = vmatpush.bf16.msra.mxu0 %v7114_v36 }
 0x235   :  { %4345 = vmatpush.bf16.msra.mxu1 %v7122_v2 }
 0x236   :  { %4358 = vmatpush.bf16.msra.mxu2 %v7130_v3 }
 0x237   :  { %4371 = vmatpush.bf16.msra.mxu3 %v7138_v62 }
 0x238   :  { %4333 = vmatpush.bf16.msra.mxu0 %v7113_v9 }
 0x239   :  { %4346 = vmatpush.bf16.msra.mxu1 %v7121_v10 }
 0x23a   :  { %4359 = vmatpush.bf16.msra.mxu2 %v7129_v12 }
 0x23b   :  { %4372 = vmatpush.bf16.msra.mxu3 %v7137_v57 }
 0x23c   :  { %4334 = vmatpush.bf16.msra.mxu0 %v7112_v7 }
 0x23d   :  { %4347 = vmatpush.bf16.msra.mxu1 %v7120_v13 }
 0x23e   :  { %4360 = vmatpush.bf16.msra.mxu2 %v7128_v15 }
 0x23f   :  { %4373 = vmatpush.bf16.msra.mxu3 %v7136_v58 }
 0x240   :  { %4335 = vmatpush.bf16.msra.mxu0 %v7111_v22  ;;  %v3861_v38 = vpop.f32.mrf.mxu0 }
 0x241   :  { %4348 = vmatpush.bf16.msra.mxu1 %v7119_v30  ;;  %v3862_v32 = vadd.f32 %v3861_v38, %v663_v33  ;;  %v3874_v23 = vpop.f32.mrf.mxu1 }
 0x242   :  { %4361 = vmatpush.bf16.msra.mxu2 %v7127_v25 }
 0x243   :  { %4336 = vmatmul.bf16.vlgmr.msra.gmra.mxu0 %v4064_v19  ;;  %v3875_v24 = vadd.f32 %v3874_v23, %v3862_v32  ;;  %4374 = vmatpush.bf16.msra.mxu3 %v7135_v27 }
 0x244   :  { %4349 = vmatmul.bf16.vlgmr.msra.gmra.mxu1 %v4065_v29 }
 0x245   :  { %4362 = vmatmul.bf16.vlgmr.msra.gmra.mxu2 %v4066_v31 }
 0x248   :  { %v3887_v41 = vpop.f32.mrf.mxu2  ;;  %v3863_v40 = vpop.f32.mrf.mxu0 }
 0x249   :  { %v3888_v28 = vadd.f32 %v3887_v41, %v3875_v24  ;;  %v3900_v37 = vpop.f32.mrf.mxu3  ;;  %v3876_v42 = vpop.f32.mrf.mxu1 }
 0x24b   :  { %v3901_v50 = vadd.f32 %v3900_v37, %v3888_v28  ;;  %v7154_v37 = vld [vmem:[#allocation11] ss:$0 sm:$0xff] }
 0x250   :  { %v3889_v43 = vpop.f32.mrf.mxu2 }
 0x251   :  { %v3902_v44 = vpop.f32.mrf.mxu3  ;;  %v7155_v43 = vld [vmem:[#allocation2] ss:$0 sm:$0xff] }
 0x260   :  { %v3913_v45 = vpop.f32.mrf.mxu0 }
 0x261   :  { %v3926_v46 = vpop.f32.mrf.mxu1  ;;  %v3914_v59 = vadd.f32 %v3913_v45, %v3901_v50 }
 0x263   :  { %v3927_v1 = vadd.f32 %v3926_v46, %v3914_v59 }
 0x268   :  { %v3939_v63 = vpop.f32.mrf.mxu2  ;;  %v3915_v51 = vpop.f32.mrf.mxu0 }
 0x269   :  { %v3952_v47 = vpop.f32.mrf.mxu3  ;;  %v3928_v52 = vpop.f32.mrf.mxu1  ;;  %v3940_v36 = vadd.f32 %v3939_v63, %v3927_v1 }
 0x26b   :  { %v3953_v4 = vadd.f32 %v3952_v47, %v3940_v36 }
 0x270   :  { %v3941_v55 = vpop.f32.mrf.mxu2 }
 0x271   :  { %v3954_v53 = vpop.f32.mrf.mxu3 }
 0x280   :  { %v3965_v49 = vpop.f32.mrf.mxu0 }
 0x281   :  { %v3978_v39 = vpop.f32.mrf.mxu1  ;;  %v3966_v5 = vadd.f32 %v3965_v49, %v3953_v4 }
 0x283   :  { %v3979_v60 = vadd.f32 %v3978_v39, %v3966_v5 }
 0x288   :  { %v3991_v0 = vpop.f32.mrf.mxu2  ;;  %v3967_v21 = vpop.f32.mrf.mxu0 }
 0x289   :  { %v4004_v14 = vpop.f32.mrf.mxu3  ;;  %v3980_v20 = vpop.f32.mrf.mxu1  ;;  %v3992_v6 = vadd.f32 %v3991_v0, %v3979_v60 }
 0x28b   :  { %v4005_v9 = vadd.f32 %v4004_v14, %v3992_v6 }
 0x290   :  { %v3993_v2 = vpop.f32.mrf.mxu2 }
 0x291   :  { %v4006_v3 = vpop.f32.mrf.mxu3 }
 0x2a0   :  { %v4017_v11 = vpop.f32.mrf.mxu0 }
 0x2a1   :  { %v4030_v10 = vpop.f32.mrf.mxu1  ;;  %v4018_v12 = vadd.f32 %v4017_v11, %v4005_v9 }
 0x2a3   :  { %v4031_v16 = vadd.f32 %v4030_v10, %v4018_v12 }
 0x2a8   :  { %v4043_v7 = vpop.f32.mrf.mxu2  ;;  %v4019_v17 = vpop.f32.mrf.mxu0 }
 0x2a9   :  { %v4056_v13 = vpop.f32.mrf.mxu3  ;;  %v4044_v15 = vadd.f32 %v4043_v7, %v4031_v16  ;;  %v4032_v26 = vpop.f32.mrf.mxu1 }
 0x2ab   :  { %v4057_v18 = vadd.f32 %v4056_v13, %v4044_v15 }
 0x2ad   :  { %v4063_v22 = vmax.f32 %v4057_v18, 0.0 }
 0x2af   :  { %v4067_v35 = vpack.c.bf16 %v4063_v22, %v4063_v22 }
 0x2b0   :  { %v4045_v30 = vpop.f32.mrf.mxu2 }
 0x2b1   :  { %v4058_v25 = vpop.f32.mrf.mxu3  ;;  %4375 = vmatmul.bf16.vlgmr.msra.gmra.mxu3 %v4067_v35 }
 0x2c0   :  { %v4337_v34 = vpop.f32.mrf.mxu0 }
 0x2c1   :  { %v4338_v19 = vadd.f32 %v7153_v61, %v4337_v34  ;;  %v4350_v29 = vpop.f32.mrf.mxu1 }
 0x2c3   :  { %v4351_v31 = vadd.f32 %v4350_v29, %v4338_v19 }
 0x2c8   :  { %v4363_v33 = vpop.f32.mrf.mxu2  ;;  %v4339_v32 = vpop.f32.mrf.mxu0 }
 0x2c9   :  { %v4364_v38 = vadd.f32 %v4363_v33, %v4351_v31  ;;  %v4352_v23 = vpop.f32.mrf.mxu1 }
 0x2d0   :  { %v4365_v24 = vpop.f32.mrf.mxu2 }
 0x334   :  { %v4376_v41 = vpop.f32.mrf.mxu3 }
 0x335   :  { %v4377_v28 = vadd.f32 %v4376_v41, %v4364_v38 }
 0x337   :  { %v4380_v50 = vmax.f32 %v4377_v28, 0.0 }
 0x339   :  { %v4385_v40 = vmul.f32 %v7154_v37, %v4380_v50 }
 0x33b   :  { %4386 = vadd.xlane.f32.xlu0 %v4385_v40 }
 0x33c   :  { %v4378_v42 = vpop.f32.mrf.mxu3 }
 0x3ae   :  { %v4387_v44 = vpop.xlane.xlu0 %4386 }
 0x3af   :  { %v4392_v45 = vadd.f32 %v7155_v43, %v4387_v44 }
 0x3b1   :  { %v6598_v46 = vmul.f32 -1.442695, %v4392_v45 }
 0x3b3   :  { %7156 = vpow2.f32 %v6598_v46 }
 0x3b9   :  { %v7157_v63 = vpop.eup %7156 }
 0x3ba   :  { %v4396_v47 = vadd.f32 1.0, %v7157_v63 }
 0x3bc   :  { %7158 = vrcp.f32 %v4396_v47  ;;  %v4408_v8 = vand.u32 2147483648, %v4396_v47  ;;  %v4406_v56 = vand.u32 2147483647, %v4396_v47  ;;  %vm4402_vm1 = vweird.f32 %v4396_v47 }
 0x3be   :  { %v4409_v54 = vor.u32 1.1754944e-38, %v4408_v8  ;;  %vm4407_vm4 = vcmp.eq.f32.partialorder %v4406_v56, 8.507059e+37 }
 0x3c2   :  { %v7159_v48 = vpop.eup %7158 }
 0x3c3   :  { %v4398_v51 = vmul.f32 %v7159_v48, %v4396_v47  ;;  %vm4403_vm0 = vweird.f32 %v7159_v48 }
 0x3c4   :  { %vm4404_vm2 = vmor %vm4402_vm1, %vm4403_vm0 }
 0x3c5   :  { %v4399_v52 = vsub.f32 1.0, %v4398_v51 }
 0x3c7   :  { %v4400_v55 = vmul.f32 %v7159_v48, %v4399_v52 }
 0x3c9   :  { %v4401_v53 = vadd.f32 %v7159_v48, %v4400_v55 }
 0x3cb   :  { %v4405_v62 = vsel %vm4404_vm2, %v7159_v48, %v4401_v53 }
 0x3cc   :  { %v4410_v49 = vsel %vm4407_vm4, %v4409_v54, %v4405_v62 }
 0x3cd   :  { %4413 = vst.msk [vmem:[%s7546_s7] sm:$0xff] %vm4412_vm3, %v4410_v49 }
 0x3ce   :  { %4418 = vsyncpa [#allocation4], 1 }
 0x3cf   :  { %4419 = vsyncpa [#allocation6], 1 }
 0x3d0   :  { %4420 = vsyncpa [#allocation9], 1 }
 0x3d1   :  { %4421 = vsyncpa [#allocation12], 1 }

</bundles_post_ra>
